<compile_context>
chip_gen: v7x
topology: tpu7x:2x2x1
jax: 0.10.0
libtpu: 0.0.40
codegen_flags: <defaults>
</compile_context>

<pallas_src>
import functools

import jax
import jax.numpy as jnp
from jax import lax
from jax.experimental import pallas as pl
from jax.experimental.pallas import tpu as pltpu


def _layernorm(x, gamma, beta, eps=1e-5):
    mean = jnp.mean(x, axis=-1, keepdims=True)
    var = jnp.mean((x - mean) ** 2, axis=-1, keepdims=True)
    return (x - mean) * lax.rsqrt(var + eps) * gamma + beta


def attention_block_kernel(
    x_ref,            # (TB, S, D)  f32   full sequence for this batch tile
    wqkv_ref,         # (D, 3D)     bf16  in_proj^T, Q columns pre-scaled
    bqkv_ref,         # (1, 3D)     f32   Q part pre-scaled
    wo_ref,           # (D, D)      bf16
    bo_ref,           # (1, D)      f32
    w1_ref,           # (D, 2D)     bf16
    b1_ref,           # (1, 2D)     f32
    w2_ref,           # (2D, D)     bf16
    b2_ref,           # (1, D)      f32
    g1_ref, be1_ref,  # (1, D)      f32   layernorm1
    g2_ref, be2_ref,  # (1, D)      f32   layernorm2
    o_ref,            # (TB, TQ, D)
    q_scr,            # (TB, H, S, hd) bf16 scratch (persists across q tiles)
    k_scr,            # (TB, H, S, hd) bf16 scratch
    v_scr,            # (TB, H, S, hd) bf16 scratch
    ctx_scr,          # (TB*TQ, D)  f32 scratch (per-head context rows)
    *,
    nhead,
    block_q,
):
    TB, S, D = x_ref.shape
    TQ = block_q
    H = nhead
    hd = D // H
    qi = pl.program_id(1)

    # ---- once per batch tile: project full-sequence Q/K/V, store head-major ----
    @pl.when(qi == 0)
    def _():
        x_all = x_ref[...].reshape(TB * S, D).astype(jnp.bfloat16)

        def project(col0, scr):
            # one (TB*S, D) matmul; f32 accumulation, immediate bf16 cast
            y = jnp.dot(x_all, wqkv_ref[:, col0:col0 + D],
                        preferred_element_type=jnp.float32)
            y = (y + bqkv_ref[:, col0:col0 + D]).astype(jnp.bfloat16)
            y = y.reshape(TB, S, D)
            # head split done once per batch tile (amortized over all q tiles)
            for h in range(H):
                scr[:, h, :, :] = y[:, :, h * hd:(h + 1) * hd]

        project(0, q_scr)        # Q (softmax scale + bias folded in wrapper)
        project(D, k_scr)        # K
        project(2 * D, v_scr)    # V

    # ---- this q tile: rows [qi*TQ, qi*TQ+TQ) of every sequence in the tile ----
    q_start = pl.multiple_of(qi * TQ, TQ)

    for b in range(TB):                              # static, small
        for h in range(H):                           # static
            q_h = q_scr[b, h, pl.ds(q_start, TQ), :]   # (TQ, hd) bf16
            k_h = k_scr[b, h, :, :]                    # (S, hd)  bf16
            v_h = v_scr[b, h, :, :]                    # (S, hd)  bf16
            # q_h @ k_h^T  ->  (TQ, S) f32 scores (NT contraction, MXU)
            s = lax.dot_general(q_h, k_h, (((1,), (1,)), ((), ())),
                                preferred_element_type=jnp.float32)
            m = jnp.max(s, axis=-1, keepdims=True)
            p = jnp.exp(s - m)
            l = jnp.sum(p, axis=-1, keepdims=True)
            ctx_h = jnp.dot(p.astype(jnp.bfloat16), v_h,
                            preferred_element_type=jnp.float32)  # (TQ, hd)
            # normalize AFTER the PV matmul; approx reciprocal runs on the EUP
            ctx_scr[b * TQ:(b + 1) * TQ, h * hd:(h + 1) * hd] = (
                ctx_h * pl.reciprocal(l, approx=True))

    x_q = x_ref[:, pl.ds(q_start, TQ), :].reshape(TB * TQ, D)   # f32 residual

    attn = jnp.dot(ctx_scr[...].astype(jnp.bfloat16), wo_ref[...],
                   preferred_element_type=jnp.float32) + bo_ref[...]

    # ---- residual + layernorm1 ----
    x1 = _layernorm(x_q + attn, g1_ref[...], be1_ref[...])

    # ---- feed-forward: linear1 -> relu -> linear2 ----
    h1 = jnp.dot(x1.astype(jnp.bfloat16), w1_ref[...],
                 preferred_element_type=jnp.float32) + b1_ref[...]
    h1 = jnp.maximum(h1, 0.0)
    ff = jnp.dot(h1.astype(jnp.bfloat16), w2_ref[...],
                 preferred_element_type=jnp.float32) + b2_ref[...]

    # ---- residual + layernorm2 ----
    out = _layernorm(x1 + ff, g2_ref[...], be2_ref[...])
    o_ref[...] = out.reshape(TB, TQ, D).astype(o_ref.dtype)


def _vmem_limit_bytes():
    """Generation-aware scoped-VMEM limit (leave headroom below physical)."""
    cap = None
    try:
        cap = getattr(pltpu.get_tpu_info(), "vmem_capacity_bytes", None)
    except Exception:
        cap = None
    if cap is None:
        return 64 * 1024 * 1024            # conservative default, fits every gen
    if cap >= 128 * 1024 * 1024:           # v5e / v6e: 128 MiB physical
        return 100 * 1024 * 1024
    return int(cap * 3 // 4)               # v7x: 64 MiB physical -> ~48 MiB


def attention_block(x, params, nhead, *, block_b=1, block_q=None,
                    weight_dtype=jnp.bfloat16):
    """x: (B, S, D) float32. params: dict of weights (see init_params)."""
    B, S, D = x.shape
    assert D % nhead == 0
    hd = D // nhead
    if block_q is None:
        # target an MXU-width (256) row slab on v6e/v7x; fall back to divisors
        for cand in (256, 128, 64, 32, 16, 8, 4, 2, 1):
            if cand <= S and S % cand == 0:
                block_q = cand
                break
    block_q = min(block_q, S)
    assert B % block_b == 0, "block_b must divide B"
    assert S % block_q == 0, "block_q must divide S"
    # NOTE: D % 128 == 0 and head_dim >= 128 is the lane-dense performance path;
    # other shapes (e.g. the D=32 smoke test) are correctness-only.

    # fold the 1/sqrt(hd) softmax scale into the Q projection (in f32, before
    # the bf16 cast); pre-transpose linear weights to (in, out).
    scale = 1.0 / (hd ** 0.5)
    in_w = jnp.asarray(params['in_proj_w'], jnp.float32)       # (3D, D)
    in_b = jnp.asarray(params['in_proj_b'], jnp.float32)       # (3D,)
    in_w = jnp.concatenate([in_w[:D] * scale, in_w[D:]], axis=0)
    in_b = jnp.concatenate([in_b[:D] * scale, in_b[D:]], axis=0)

    wqkv_t = in_w.T.astype(weight_dtype)                       # (D, 3D)
    wo_t = jnp.asarray(params['out_proj_w']).T.astype(weight_dtype)   # (D, D)
    w1_t = jnp.asarray(params['linear1_w']).T.astype(weight_dtype)    # (D, 2D)
    w2_t = jnp.asarray(params['linear2_w']).T.astype(weight_dtype)    # (2D, D)
    bqkv = in_b[None, :]
    bo = jnp.asarray(params['out_proj_b'], jnp.float32)[None, :]
    b1 = jnp.asarray(params['linear1_b'], jnp.float32)[None, :]
    b2 = jnp.asarray(params['linear2_b'], jnp.float32)[None, :]
    g1 = jnp.asarray(params['norm1_w'], jnp.float32)[None, :]
    be1 = jnp.asarray(params['norm1_b'], jnp.float32)[None, :]
    g2 = jnp.asarray(params['norm2_w'], jnp.float32)[None, :]
    be2 = jnp.asarray(params['norm2_b'], jnp.float32)[None, :]

    operands = (x, wqkv_t, bqkv, wo_t, bo, w1_t, b1, w2_t, b2,
                g1, be1, g2, be2)

    kernel = functools.partial(attention_block_kernel,
                               nhead=nhead, block_q=block_q)
    grid = (B // block_b, S // block_q)

    def build_and_call(single_buffer):
        def spec(shape, index_map):
            if single_buffer:
                # these blocks are never (weights) or rarely (x: once per batch
                # tile) re-fetched -> one buffer each, halving their VMEM cost.
                return pl.BlockSpec(shape, index_map,
                                    pipeline_mode=pl.Buffered(1))
            return pl.BlockSpec(shape, index_map)

        def resident(arr):
            zeros = (0,) * arr.ndim
            return spec(arr.shape, lambda b, q, _z=zeros: _z)

        in_specs = [
            spec((block_b, S, D), lambda b, q: (b, 0, 0)),   # x (full sequence)
            resident(wqkv_t), resident(bqkv),
            resident(wo_t), resident(bo),
            resident(w1_t), resident(b1),
            resident(w2_t), resident(b2),
            resident(g1), resident(be1),
            resident(g2), resident(be2),
        ]

        return pl.pallas_call(
            kernel,
            out_shape=jax.ShapeDtypeStruct((B, S, D), x.dtype),
            grid_spec=pltpu.PrefetchScalarGridSpec(
                num_scalar_prefetch=0,
                grid=grid,
                in_specs=in_specs,
                out_specs=pl.BlockSpec((block_b, block_q, D),
                                       lambda b, q: (b, q, 0)),
                scratch_shapes=[
                    pltpu.VMEM((block_b, nhead, S, hd), jnp.bfloat16),  # Q
                    pltpu.VMEM((block_b, nhead, S, hd), jnp.bfloat16),  # K
                    pltpu.VMEM((block_b, nhead, S, hd), jnp.bfloat16),  # V
                    pltpu.VMEM((block_b * block_q, D), jnp.float32),    # ctx
                ],
            ),
            compiler_params=pltpu.CompilerParams(
                # batch tiles are independent (megacore); the q-tile axis carries
                # the Q/K/V scratch so it must stay sequential.
                dimension_semantics=("parallel", "arbitrary"),
                vmem_limit_bytes=_vmem_limit_bytes(),
            ),
        )(*operands)

    try:
        return build_and_call(single_buffer=True)
    except Exception:
        # pipeline_mode=pl.Buffered(1) unsupported on this jax version -> fall
        # back to default double buffering (correctness is unchanged).
        return build_and_call(single_buffer=False)


def init_params(key, d_model):
    """Deterministic synthetic parameters matching the PyTorch module's shapes."""
    ks = jax.random.split(key, 8)
    s = 0.05
    return {
        'in_proj_w':  s * jax.random.normal(ks[0], (3 * d_model, d_model), jnp.float32),
        'in_proj_b':  s * jax.random.normal(ks[1], (3 * d_model,), jnp.float32),
        'out_proj_w': s * jax.random.normal(ks[2], (d_model, d_model), jnp.float32),
        'out_proj_b': s * jax.random.normal(ks[3], (d_model,), jnp.float32),
        'linear1_w':  s * jax.random.normal(ks[4], (2 * d_model, d_model), jnp.float32),
        'linear1_b':  s * jax.random.normal(ks[5], (2 * d_model,), jnp.float32),
        'linear2_w':  s * jax.random.normal(ks[6], (d_model, 2 * d_model), jnp.float32),
        'linear2_b':  s * jax.random.normal(ks[7], (d_model,), jnp.float32),
        'norm1_w':    jnp.ones((d_model,), jnp.float32),
        'norm1_b':    jnp.zeros((d_model,), jnp.float32),
        'norm2_w':    jnp.ones((d_model,), jnp.float32),
        'norm2_b':    jnp.zeros((d_model,), jnp.float32),
    }


def reference_attention_block(x, p, nhead):
    """Pure-JAX f32 reference of the PyTorch forward (eval mode, no attn_mask)."""
    B, S, D = x.shape
    hd = D // nhead
    qkv = jnp.einsum('bsd,ed->bse', x, p['in_proj_w']) + p['in_proj_b']
    q, k, v = qkv[..., :D], qkv[..., D:2 * D], qkv[..., 2 * D:]
    q = q.reshape(B, S, nhead, hd).transpose(0, 2, 1, 3)
    k = k.reshape(B, S, nhead, hd).transpose(0, 2, 1, 3)
    v = v.reshape(B, S, nhead, hd).transpose(0, 2, 1, 3)
    scores = jnp.einsum('bhqd,bhkd->bhqk', q, k) / (hd ** 0.5)
    attn = jax.nn.softmax(scores, axis=-1)
    ctx = jnp.einsum('bhqk,bhkd->bhqd', attn, v).transpose(0, 2, 1, 3).reshape(B, S, D)
    attn_out = jnp.einsum('bsd,ed->bse', ctx, p['out_proj_w']) + p['out_proj_b']

    def ln(y, g, b, eps=1e-5):
        mu = y.mean(-1, keepdims=True)
        var = ((y - mu) ** 2).mean(-1, keepdims=True)
        return (y - mu) / jnp.sqrt(var + eps) * g + b

    x1 = ln(x + attn_out, p['norm1_w'], p['norm1_b'])
    h = jax.nn.relu(jnp.einsum('bsd,ed->bse', x1, p['linear1_w']) + p['linear1_b'])
    ff = jnp.einsum('bse,de->bsd', h, p['linear2_w']) + p['linear2_b']
    return ln(x1 + ff, p['norm2_w'], p['norm2_b'])


if __name__ == "__main__":
    def run_case(B, S, D, H, block_b, block_q, key, tol):
        kx, kp = jax.random.split(key)
        x = jax.random.normal(kx, (B, S, D), jnp.float32)
        params = init_params(kp, D)
        out = attention_block(x, params, nhead=H,
                              block_b=block_b, block_q=block_q)
        out = jax.block_until_ready(out)
        ref = reference_attention_block(x, params, H)
        assert out.shape == (B, S, D)
        err = float(jnp.max(jnp.abs(out - ref)))
        # bf16 MXU operands -> relaxed tolerance vs. the f32 reference
        assert jnp.allclose(out, ref, rtol=tol, atol=tol), f"max abs err {err}"

    key = jax.random.PRNGKey(0)
    k1, k2, k3 = jax.random.split(key, 3)
    # correctness-only smoke test at the module's tiny shapes (D=32, hd=8).
    run_case(B=2, S=8, D=32, H=4, block_b=2, block_q=8, key=k1, tol=3e-2)
    # lane-dense, q-tiled path: 2 batch tiles (megacore friendly) x 2 q tiles.
    run_case(B=2, S=256, D=128, H=4, block_b=1, block_q=128, key=k2, tol=3e-2)
    # MXU-width row slab (block_q=256) with head_dim=128 (the performance path);
    # deeper bf16 contractions -> slightly looser tolerance vs. the f32 reference.
    run_case(B=2, S=512, D=256, H=2, block_b=1, block_q=256, key=k3, tol=5e-2)

    print("KERNEL_OK")
</pallas_src>

<mosaic_0001>
module attributes {stable_mosaic.version = 11 : i64} {
  func.func @attention_block_kernel(%arg0: i32, %arg1: i32, %arg2: memref<2x8x32xf32, #tpu.memory_space<vmem>>, %arg3: memref<32x96xbf16, #tpu.memory_space<vmem>>, %arg4: memref<1x96xf32, #tpu.memory_space<vmem>>, %arg5: memref<32x32xbf16, #tpu.memory_space<vmem>>, %arg6: memref<1x32xf32, #tpu.memory_space<vmem>>, %arg7: memref<32x64xbf16, #tpu.memory_space<vmem>>, %arg8: memref<1x64xf32, #tpu.memory_space<vmem>>, %arg9: memref<64x32xbf16, #tpu.memory_space<vmem>>, %arg10: memref<1x32xf32, #tpu.memory_space<vmem>>, %arg11: memref<1x32xf32, #tpu.memory_space<vmem>>, %arg12: memref<1x32xf32, #tpu.memory_space<vmem>>, %arg13: memref<1x32xf32, #tpu.memory_space<vmem>>, %arg14: memref<1x32xf32, #tpu.memory_space<vmem>>, %arg15: memref<2x8x32xf32, #tpu.memory_space<vmem>>, %arg16: memref<2x4x8x8xbf16, #tpu.memory_space<vmem>>, %arg17: memref<2x4x8x8xbf16, #tpu.memory_space<vmem>>, %arg18: memref<2x4x8x8xbf16, #tpu.memory_space<vmem>>, %arg19: memref<16x32xf32, #tpu.memory_space<vmem>>) attributes {dimension_semantics = [#tpu.dimension_semantics<parallel>, #tpu.dimension_semantics<arbitrary>], iteration_bounds = array<i64: 1, 1>, scalar_prefetch = 0 : i64, scratch_operands = 4 : i64, tpu.core_type = #tpu.core_type<tc>, window_params = [{pipeline_mode = #tpu.pipeline_mode<synchronous>, transform_indices = @transform_0, window_bounds = array<i64: 2, 8, 32>}, {pipeline_mode = #tpu.pipeline_mode<synchronous>, transform_indices = @transform_1, window_bounds = array<i64: 32, 96>}, {pipeline_mode = #tpu.pipeline_mode<synchronous>, transform_indices = @transform_2, window_bounds = array<i64: 1, 96>}, {pipeline_mode = #tpu.pipeline_mode<synchronous>, transform_indices = @transform_3, window_bounds = array<i64: 32, 32>}, {pipeline_mode = #tpu.pipeline_mode<synchronous>, transform_indices = @transform_4, window_bounds = array<i64: 1, 32>}, {pipeline_mode = #tpu.pipeline_mode<synchronous>, transform_indices = @transform_5, window_bounds = array<i64: 32, 64>}, {pipeline_mode = #tpu.pipeline_mode<synchronous>, transform_indices = @transform_6, window_bounds = array<i64: 1, 64>}, {pipeline_mode = #tpu.pipeline_mode<synchronous>, transform_indices = @transform_7, window_bounds = array<i64: 64, 32>}, {pipeline_mode = #tpu.pipeline_mode<synchronous>, transform_indices = @transform_8, window_bounds = array<i64: 1, 32>}, {pipeline_mode = #tpu.pipeline_mode<synchronous>, transform_indices = @transform_9, window_bounds = array<i64: 1, 32>}, {pipeline_mode = #tpu.pipeline_mode<synchronous>, transform_indices = @transform_10, window_bounds = array<i64: 1, 32>}, {pipeline_mode = #tpu.pipeline_mode<synchronous>, transform_indices = @transform_11, window_bounds = array<i64: 1, 32>}, {pipeline_mode = #tpu.pipeline_mode<synchronous>, transform_indices = @transform_12, window_bounds = array<i64: 1, 32>}, {transform_indices = @transform_13, window_bounds = array<i64: 2, 8, 32>}]} {
    %c0_i32 = arith.constant 0 : i32
    %0 = arith.cmpi eq, %arg1, %c0_i32 : i32
    %1 = arith.extui %0 : i1 to i32
    %c0_i32_0 = arith.constant 0 : i32
    %2 = arith.cmpi ne, %1, %c0_i32_0 : i32
    scf.if %2 {
      %c0_170 = arith.constant 0 : index
      %c0_171 = arith.constant 0 : index
      %c0_172 = arith.constant 0 : index
      %249 = vector.load %arg2[%c0_170, %c0_171, %c0_172] : memref<2x8x32xf32, #tpu.memory_space<vmem>>, vector<2x8x32xf32>
      %250 = vector.shape_cast %249 : vector<2x8x32xf32> to vector<16x32xf32>
      %251 = arith.truncf %250 : vector<16x32xf32> to vector<16x32xbf16>
      %c0_173 = arith.constant 0 : index
      %c0_174 = arith.constant 0 : index
      %252 = vector.load %arg3[%c0_173, %c0_174] : memref<32x96xbf16, #tpu.memory_space<vmem>>, vector<32x32xbf16>
      %cst_175 = arith.constant dense<0.000000e+00> : vector<16x32xf32>
      %253 = tpu.matmul %251, %252, %cst_175 {dimension_numbers = #tpu.dot_dimension_numbers<[1], [0], [0], [1], [0, 0, 1, 1], [], []>} : vector<16x32xbf16>, vector<32x32xbf16>, vector<16x32xf32> -> vector<16x32xf32>
      %c0_176 = arith.constant 0 : index
      %c0_177 = arith.constant 0 : index
      %254 = vector.load %arg4[%c0_176, %c0_177] : memref<1x96xf32, #tpu.memory_space<vmem>>, vector<1x32xf32>
      %255 = vector.broadcast %254 : vector<1x32xf32> to vector<16x32xf32>
      %256 = arith.addf %253, %255 : vector<16x32xf32>
      %257 = arith.truncf %256 : vector<16x32xf32> to vector<16x32xbf16>
      %258 = vector.shape_cast %257 : vector<16x32xbf16> to vector<2x8x32xbf16>
      %259 = vector.extract_strided_slice %258 {offsets = [0, 0, 0], sizes = [2, 8, 8], strides = [1, 1, 1]} : vector<2x8x32xbf16> to vector<2x8x8xbf16>
      %c0_178 = arith.constant 0 : index
      %c0_179 = arith.constant 0 : index
      %c0_180 = arith.constant 0 : index
      %c0_181 = arith.constant 0 : index
      %260 = vector.load %arg16[%c0_178, %c0_179, %c0_180, %c0_181] : memref<2x4x8x8xbf16, #tpu.memory_space<vmem>>, vector<2x1x8x8xbf16>
      %261 = vector.shape_cast %260 : vector<2x1x8x8xbf16> to vector<2x8x8xbf16>
      %262 = vector.shape_cast %259 : vector<2x8x8xbf16> to vector<2x1x8x8xbf16>
      tpu.vector_store %arg16[%c0_178, %c0_179, %c0_180, %c0_181], %262 {strides = array<i32>} : memref<2x4x8x8xbf16, #tpu.memory_space<vmem>>, vector<2x1x8x8xbf16>,
      %263 = vector.extract_strided_slice %258 {offsets = [0, 0, 8], sizes = [2, 8, 8], strides = [1, 1, 1]} : vector<2x8x32xbf16> to vector<2x8x8xbf16>
      %c0_182 = arith.constant 0 : index
      %c1_183 = arith.constant 1 : index
      %c0_184 = arith.constant 0 : index
      %c0_185 = arith.constant 0 : index
      %264 = vector.load %arg16[%c0_182, %c1_183, %c0_184, %c0_185] : memref<2x4x8x8xbf16, #tpu.memory_space<vmem>>, vector<2x1x8x8xbf16>
      %265 = vector.shape_cast %264 : vector<2x1x8x8xbf16> to vector<2x8x8xbf16>
      %266 = vector.shape_cast %263 : vector<2x8x8xbf16> to vector<2x1x8x8xbf16>
      tpu.vector_store %arg16[%c0_182, %c1_183, %c0_184, %c0_185], %266 {strides = array<i32>} : memref<2x4x8x8xbf16, #tpu.memory_space<vmem>>, vector<2x1x8x8xbf16>,
      %267 = vector.extract_strided_slice %258 {offsets = [0, 0, 16], sizes = [2, 8, 8], strides = [1, 1, 1]} : vector<2x8x32xbf16> to vector<2x8x8xbf16>
      %c0_186 = arith.constant 0 : index
      %c2_187 = arith.constant 2 : index
      %c0_188 = arith.constant 0 : index
      %c0_189 = arith.constant 0 : index
      %268 = vector.load %arg16[%c0_186, %c2_187, %c0_188, %c0_189] : memref<2x4x8x8xbf16, #tpu.memory_space<vmem>>, vector<2x1x8x8xbf16>
      %269 = vector.shape_cast %268 : vector<2x1x8x8xbf16> to vector<2x8x8xbf16>
      %270 = vector.shape_cast %267 : vector<2x8x8xbf16> to vector<2x1x8x8xbf16>
      tpu.vector_store %arg16[%c0_186, %c2_187, %c0_188, %c0_189], %270 {strides = array<i32>} : memref<2x4x8x8xbf16, #tpu.memory_space<vmem>>, vector<2x1x8x8xbf16>,
      %271 = vector.extract_strided_slice %258 {offsets = [0, 0, 24], sizes = [2, 8, 8], strides = [1, 1, 1]} : vector<2x8x32xbf16> to vector<2x8x8xbf16>
      %c0_190 = arith.constant 0 : index
      %c3_191 = arith.constant 3 : index
      %c0_192 = arith.constant 0 : index
      %c0_193 = arith.constant 0 : index
      %272 = vector.load %arg16[%c0_190, %c3_191, %c0_192, %c0_193] : memref<2x4x8x8xbf16, #tpu.memory_space<vmem>>, vector<2x1x8x8xbf16>
      %273 = vector.shape_cast %272 : vector<2x1x8x8xbf16> to vector<2x8x8xbf16>
      %274 = vector.shape_cast %271 : vector<2x8x8xbf16> to vector<2x1x8x8xbf16>
      tpu.vector_store %arg16[%c0_190, %c3_191, %c0_192, %c0_193], %274 {strides = array<i32>} : memref<2x4x8x8xbf16, #tpu.memory_space<vmem>>, vector<2x1x8x8xbf16>,
      %c0_194 = arith.constant 0 : index
      %c32 = arith.constant 32 : index
      %275 = vector.load %arg3[%c0_194, %c32] : memref<32x96xbf16, #tpu.memory_space<vmem>>, vector<32x32xbf16>
      %cst_195 = arith.constant dense<0.000000e+00> : vector<16x32xf32>
      %276 = tpu.matmul %251, %275, %cst_195 {dimension_numbers = #tpu.dot_dimension_numbers<[1], [0], [0], [1], [0, 0, 1, 1], [], []>} : vector<16x32xbf16>, vector<32x32xbf16>, vector<16x32xf32> -> vector<16x32xf32>
      %c0_196 = arith.constant 0 : index
      %c32_197 = arith.constant 32 : index
      %277 = vector.load %arg4[%c0_196, %c32_197] : memref<1x96xf32, #tpu.memory_space<vmem>>, vector<1x32xf32>
      %278 = vector.broadcast %277 : vector<1x32xf32> to vector<16x32xf32>
      %279 = arith.addf %276, %278 : vector<16x32xf32>
      %280 = arith.truncf %279 : vector<16x32xf32> to vector<16x32xbf16>
      %281 = vector.shape_cast %280 : vector<16x32xbf16> to vector<2x8x32xbf16>
      %282 = vector.extract_strided_slice %281 {offsets = [0, 0, 0], sizes = [2, 8, 8], strides = [1, 1, 1]} : vector<2x8x32xbf16> to vector<2x8x8xbf16>
      %c0_198 = arith.constant 0 : index
      %c0_199 = arith.constant 0 : index
      %c0_200 = arith.constant 0 : index
      %c0_201 = arith.constant 0 : index
      %283 = vector.load %arg17[%c0_198, %c0_199, %c0_200, %c0_201] : memref<2x4x8x8xbf16, #tpu.memory_space<vmem>>, vector<2x1x8x8xbf16>
      %284 = vector.shape_cast %283 : vector<2x1x8x8xbf16> to vector<2x8x8xbf16>
      %285 = vector.shape_cast %282 : vector<2x8x8xbf16> to vector<2x1x8x8xbf16>
      tpu.vector_store %arg17[%c0_198, %c0_199, %c0_200, %c0_201], %285 {strides = array<i32>} : memref<2x4x8x8xbf16, #tpu.memory_space<vmem>>, vector<2x1x8x8xbf16>,
      %286 = vector.extract_strided_slice %281 {offsets = [0, 0, 8], sizes = [2, 8, 8], strides = [1, 1, 1]} : vector<2x8x32xbf16> to vector<2x8x8xbf16>
      %c0_202 = arith.constant 0 : index
      %c1_203 = arith.constant 1 : index
      %c0_204 = arith.constant 0 : index
      %c0_205 = arith.constant 0 : index
      %287 = vector.load %arg17[%c0_202, %c1_203, %c0_204, %c0_205] : memref<2x4x8x8xbf16, #tpu.memory_space<vmem>>, vector<2x1x8x8xbf16>
      %288 = vector.shape_cast %287 : vector<2x1x8x8xbf16> to vector<2x8x8xbf16>
      %289 = vector.shape_cast %286 : vector<2x8x8xbf16> to vector<2x1x8x8xbf16>
      tpu.vector_store %arg17[%c0_202, %c1_203, %c0_204, %c0_205], %289 {strides = array<i32>} : memref<2x4x8x8xbf16, #tpu.memory_space<vmem>>, vector<2x1x8x8xbf16>,
      %290 = vector.extract_strided_slice %281 {offsets = [0, 0, 16], sizes = [2, 8, 8], strides = [1, 1, 1]} : vector<2x8x32xbf16> to vector<2x8x8xbf16>
      %c0_206 = arith.constant 0 : index
      %c2_207 = arith.constant 2 : index
      %c0_208 = arith.constant 0 : index
      %c0_209 = arith.constant 0 : index
      %291 = vector.load %arg17[%c0_206, %c2_207, %c0_208, %c0_209] : memref<2x4x8x8xbf16, #tpu.memory_space<vmem>>, vector<2x1x8x8xbf16>
      %292 = vector.shape_cast %291 : vector<2x1x8x8xbf16> to vector<2x8x8xbf16>
      %293 = vector.shape_cast %290 : vector<2x8x8xbf16> to vector<2x1x8x8xbf16>
      tpu.vector_store %arg17[%c0_206, %c2_207, %c0_208, %c0_209], %293 {strides = array<i32>} : memref<2x4x8x8xbf16, #tpu.memory_space<vmem>>, vector<2x1x8x8xbf16>,
      %294 = vector.extract_strided_slice %281 {offsets = [0, 0, 24], sizes = [2, 8, 8], strides = [1, 1, 1]} : vector<2x8x32xbf16> to vector<2x8x8xbf16>
      %c0_210 = arith.constant 0 : index
      %c3_211 = arith.constant 3 : index
      %c0_212 = arith.constant 0 : index
      %c0_213 = arith.constant 0 : index
      %295 = vector.load %arg17[%c0_210, %c3_211, %c0_212, %c0_213] : memref<2x4x8x8xbf16, #tpu.memory_space<vmem>>, vector<2x1x8x8xbf16>
      %296 = vector.shape_cast %295 : vector<2x1x8x8xbf16> to vector<2x8x8xbf16>
      %297 = vector.shape_cast %294 : vector<2x8x8xbf16> to vector<2x1x8x8xbf16>
      tpu.vector_store %arg17[%c0_210, %c3_211, %c0_212, %c0_213], %297 {strides = array<i32>} : memref<2x4x8x8xbf16, #tpu.memory_space<vmem>>, vector<2x1x8x8xbf16>,
      %c0_214 = arith.constant 0 : index
      %c64 = arith.constant 64 : index
      %298 = vector.load %arg3[%c0_214, %c64] : memref<32x96xbf16, #tpu.memory_space<vmem>>, vector<32x32xbf16>
      %cst_215 = arith.constant dense<0.000000e+00> : vector<16x32xf32>
      %299 = tpu.matmul %251, %298, %cst_215 {dimension_numbers = #tpu.dot_dimension_numbers<[1], [0], [0], [1], [0, 0, 1, 1], [], []>} : vector<16x32xbf16>, vector<32x32xbf16>, vector<16x32xf32> -> vector<16x32xf32>
      %c0_216 = arith.constant 0 : index
      %c64_217 = arith.constant 64 : index
      %300 = vector.load %arg4[%c0_216, %c64_217] : memref<1x96xf32, #tpu.memory_space<vmem>>, vector<1x32xf32>
      %301 = vector.broadcast %300 : vector<1x32xf32> to vector<16x32xf32>
      %302 = arith.addf %299, %301 : vector<16x32xf32>
      %303 = arith.truncf %302 : vector<16x32xf32> to vector<16x32xbf16>
      %304 = vector.shape_cast %303 : vector<16x32xbf16> to vector<2x8x32xbf16>
      %305 = vector.extract_strided_slice %304 {offsets = [0, 0, 0], sizes = [2, 8, 8], strides = [1, 1, 1]} : vector<2x8x32xbf16> to vector<2x8x8xbf16>
      %c0_218 = arith.constant 0 : index
      %c0_219 = arith.constant 0 : index
      %c0_220 = arith.constant 0 : index
      %c0_221 = arith.constant 0 : index
      %306 = vector.load %arg18[%c0_218, %c0_219, %c0_220, %c0_221] : memref<2x4x8x8xbf16, #tpu.memory_space<vmem>>, vector<2x1x8x8xbf16>
      %307 = vector.shape_cast %306 : vector<2x1x8x8xbf16> to vector<2x8x8xbf16>
      %308 = vector.shape_cast %305 : vector<2x8x8xbf16> to vector<2x1x8x8xbf16>
      tpu.vector_store %arg18[%c0_218, %c0_219, %c0_220, %c0_221], %308 {strides = array<i32>} : memref<2x4x8x8xbf16, #tpu.memory_space<vmem>>, vector<2x1x8x8xbf16>,
      %309 = vector.extract_strided_slice %304 {offsets = [0, 0, 8], sizes = [2, 8, 8], strides = [1, 1, 1]} : vector<2x8x32xbf16> to vector<2x8x8xbf16>
      %c0_222 = arith.constant 0 : index
      %c1_223 = arith.constant 1 : index
      %c0_224 = arith.constant 0 : index
      %c0_225 = arith.constant 0 : index
      %310 = vector.load %arg18[%c0_222, %c1_223, %c0_224, %c0_225] : memref<2x4x8x8xbf16, #tpu.memory_space<vmem>>, vector<2x1x8x8xbf16>
      %311 = vector.shape_cast %310 : vector<2x1x8x8xbf16> to vector<2x8x8xbf16>
      %312 = vector.shape_cast %309 : vector<2x8x8xbf16> to vector<2x1x8x8xbf16>
      tpu.vector_store %arg18[%c0_222, %c1_223, %c0_224, %c0_225], %312 {strides = array<i32>} : memref<2x4x8x8xbf16, #tpu.memory_space<vmem>>, vector<2x1x8x8xbf16>,
      %313 = vector.extract_strided_slice %304 {offsets = [0, 0, 16], sizes = [2, 8, 8], strides = [1, 1, 1]} : vector<2x8x32xbf16> to vector<2x8x8xbf16>
      %c0_226 = arith.constant 0 : index
      %c2_227 = arith.constant 2 : index
      %c0_228 = arith.constant 0 : index
      %c0_229 = arith.constant 0 : index
      %314 = vector.load %arg18[%c0_226, %c2_227, %c0_228, %c0_229] : memref<2x4x8x8xbf16, #tpu.memory_space<vmem>>, vector<2x1x8x8xbf16>
      %315 = vector.shape_cast %314 : vector<2x1x8x8xbf16> to vector<2x8x8xbf16>
      %316 = vector.shape_cast %313 : vector<2x8x8xbf16> to vector<2x1x8x8xbf16>
      tpu.vector_store %arg18[%c0_226, %c2_227, %c0_228, %c0_229], %316 {strides = array<i32>} : memref<2x4x8x8xbf16, #tpu.memory_space<vmem>>, vector<2x1x8x8xbf16>,
      %317 = vector.extract_strided_slice %304 {offsets = [0, 0, 24], sizes = [2, 8, 8], strides = [1, 1, 1]} : vector<2x8x32xbf16> to vector<2x8x8xbf16>
      %c0_230 = arith.constant 0 : index
      %c3_231 = arith.constant 3 : index
      %c0_232 = arith.constant 0 : index
      %c0_233 = arith.constant 0 : index
      %318 = vector.load %arg18[%c0_230, %c3_231, %c0_232, %c0_233] : memref<2x4x8x8xbf16, #tpu.memory_space<vmem>>, vector<2x1x8x8xbf16>
      %319 = vector.shape_cast %318 : vector<2x1x8x8xbf16> to vector<2x8x8xbf16>
      %320 = vector.shape_cast %317 : vector<2x8x8xbf16> to vector<2x1x8x8xbf16>
      tpu.vector_store %arg18[%c0_230, %c3_231, %c0_232, %c0_233], %320 {strides = array<i32>} : memref<2x4x8x8xbf16, #tpu.memory_space<vmem>>, vector<2x1x8x8xbf16>,
    } else {
    }
    %c8_i32 = arith.constant 8 : i32
    %3 = arith.muli %arg1, %c8_i32 : i32
    %4 = tpu.assume_multiple %3, 8 : i32
    %c0 = arith.constant 0 : index
    %c0_1 = arith.constant 0 : index
    %5 = arith.index_cast %4 : i32 to index
    %c0_2 = arith.constant 0 : index
    %6 = vector.load %arg16[%c0, %c0_1, %5, %c0_2] : memref<2x4x8x8xbf16, #tpu.memory_space<vmem>>, vector<1x1x8x8xbf16>
    %7 = vector.shape_cast %6 : vector<1x1x8x8xbf16> to vector<8x8xbf16>
    %c0_3 = arith.constant 0 : index
    %c0_4 = arith.constant 0 : index
    %c0_5 = arith.constant 0 : index
    %c0_6 = arith.constant 0 : index
    %8 = vector.load %arg17[%c0_3, %c0_4, %c0_5, %c0_6] : memref<2x4x8x8xbf16, #tpu.memory_space<vmem>>, vector<1x1x8x8xbf16>
    %9 = vector.shape_cast %8 : vector<1x1x8x8xbf16> to vector<8x8xbf16>
    %c0_7 = arith.constant 0 : index
    %c0_8 = arith.constant 0 : index
    %c0_9 = arith.constant 0 : index
    %c0_10 = arith.constant 0 : index
    %10 = vector.load %arg18[%c0_7, %c0_8, %c0_9, %c0_10] : memref<2x4x8x8xbf16, #tpu.memory_space<vmem>>, vector<1x1x8x8xbf16>
    %11 = vector.shape_cast %10 : vector<1x1x8x8xbf16> to vector<8x8xbf16>
    %cst = arith.constant dense<0.000000e+00> : vector<8x8xf32>
    %12 = tpu.matmul %7, %9, %cst {dimension_numbers = #tpu.dot_dimension_numbers<[1], [1], [0], [0], [0, 0, 1, 0], [], []>} : vector<8x8xbf16>, vector<8x8xbf16>, vector<8x8xf32> -> vector<8x8xf32>
    %cst_11 = arith.constant dense<0xFF800000> : vector<8xf32>
    %13 = vector.multi_reduction <maximumf>, %12, %cst_11 [1] : vector<8x8xf32> to vector<8xf32>
    %14 = vector.shape_cast %13 : vector<8xf32> to vector<8x1xf32>
    %15 = vector.broadcast %14 : vector<8x1xf32> to vector<8x8xf32>
    %16 = arith.subf %12, %15 : vector<8x8xf32>
    %17 = math.exp %16 : vector<8x8xf32>
    %cst_12 = arith.constant dense<0.000000e+00> : vector<8xf32>
    %18 = vector.multi_reduction <add>, %17, %cst_12 [1] : vector<8x8xf32> to vector<8xf32>
    %19 = vector.shape_cast %18 : vector<8xf32> to vector<8x1xf32>
    %20 = arith.truncf %17 : vector<8x8xf32> to vector<8x8xbf16>
    %cst_13 = arith.constant dense<0.000000e+00> : vector<8x8xf32>
    %21 = tpu.matmul %20, %11, %cst_13 {dimension_numbers = #tpu.dot_dimension_numbers<[1], [0], [0], [1], [0, 0, 1, 1], [], []>} : vector<8x8xbf16>, vector<8x8xbf16>, vector<8x8xf32> -> vector<8x8xf32>
    %22 = tpu.reciprocal %19 {approx = true} : vector<8x1xf32> -> vector<8x1xf32>
    %23 = vector.broadcast %22 : vector<8x1xf32> to vector<8x8xf32>
    %24 = arith.mulf %21, %23 : vector<8x8xf32>
    %c0_14 = arith.constant 0 : index
    %c0_15 = arith.constant 0 : index
    %25 = vector.load %arg19[%c0_14, %c0_15] : memref<16x32xf32, #tpu.memory_space<vmem>>, vector<8x8xf32>
    tpu.vector_store %arg19[%c0_14, %c0_15], %24 {strides = array<i32>} : memref<16x32xf32, #tpu.memory_space<vmem>>, vector<8x8xf32>,
    %c0_16 = arith.constant 0 : index
    %c1 = arith.constant 1 : index
    %26 = arith.index_cast %4 : i32 to index
    %c0_17 = arith.constant 0 : index
    %27 = vector.load %arg16[%c0_16, %c1, %26, %c0_17] : memref<2x4x8x8xbf16, #tpu.memory_space<vmem>>, vector<1x1x8x8xbf16>
    %28 = vector.shape_cast %27 : vector<1x1x8x8xbf16> to vector<8x8xbf16>
    %c0_18 = arith.constant 0 : index
    %c1_19 = arith.constant 1 : index
    %c0_20 = arith.constant 0 : index
    %c0_21 = arith.constant 0 : index
    %29 = vector.load %arg17[%c0_18, %c1_19, %c0_20, %c0_21] : memref<2x4x8x8xbf16, #tpu.memory_space<vmem>>, vector<1x1x8x8xbf16>
    %30 = vector.shape_cast %29 : vector<1x1x8x8xbf16> to vector<8x8xbf16>
    %c0_22 = arith.constant 0 : index
    %c1_23 = arith.constant 1 : index
    %c0_24 = arith.constant 0 : index
    %c0_25 = arith.constant 0 : index
    %31 = vector.load %arg18[%c0_22, %c1_23, %c0_24, %c0_25] : memref<2x4x8x8xbf16, #tpu.memory_space<vmem>>, vector<1x1x8x8xbf16>
    %32 = vector.shape_cast %31 : vector<1x1x8x8xbf16> to vector<8x8xbf16>
    %cst_26 = arith.constant dense<0.000000e+00> : vector<8x8xf32>
    %33 = tpu.matmul %28, %30, %cst_26 {dimension_numbers = #tpu.dot_dimension_numbers<[1], [1], [0], [0], [0, 0, 1, 0], [], []>} : vector<8x8xbf16>, vector<8x8xbf16>, vector<8x8xf32> -> vector<8x8xf32>
    %cst_27 = arith.constant dense<0xFF800000> : vector<8xf32>
    %34 = vector.multi_reduction <maximumf>, %33, %cst_27 [1] : vector<8x8xf32> to vector<8xf32>
    %35 = vector.shape_cast %34 : vector<8xf32> to vector<8x1xf32>
    %36 = vector.broadcast %35 : vector<8x1xf32> to vector<8x8xf32>
    %37 = arith.subf %33, %36 : vector<8x8xf32>
    %38 = math.exp %37 : vector<8x8xf32>
    %cst_28 = arith.constant dense<0.000000e+00> : vector<8xf32>
    %39 = vector.multi_reduction <add>, %38, %cst_28 [1] : vector<8x8xf32> to vector<8xf32>
    %40 = vector.shape_cast %39 : vector<8xf32> to vector<8x1xf32>
    %41 = arith.truncf %38 : vector<8x8xf32> to vector<8x8xbf16>
    %cst_29 = arith.constant dense<0.000000e+00> : vector<8x8xf32>
    %42 = tpu.matmul %41, %32, %cst_29 {dimension_numbers = #tpu.dot_dimension_numbers<[1], [0], [0], [1], [0, 0, 1, 1], [], []>} : vector<8x8xbf16>, vector<8x8xbf16>, vector<8x8xf32> -> vector<8x8xf32>
    %43 = tpu.reciprocal %40 {approx = true} : vector<8x1xf32> -> vector<8x1xf32>
    %44 = vector.broadcast %43 : vector<8x1xf32> to vector<8x8xf32>
    %45 = arith.mulf %42, %44 : vector<8x8xf32>
    %c0_30 = arith.constant 0 : index
    %c8 = arith.constant 8 : index
    %46 = vector.load %arg19[%c0_30, %c8] : memref<16x32xf32, #tpu.memory_space<vmem>>, vector<8x8xf32>
    tpu.vector_store %arg19[%c0_30, %c8], %45 {strides = array<i32>} : memref<16x32xf32, #tpu.memory_space<vmem>>, vector<8x8xf32>,
    %c0_31 = arith.constant 0 : index
    %c2 = arith.constant 2 : index
    %47 = arith.index_cast %4 : i32 to index
    %c0_32 = arith.constant 0 : index
    %48 = vector.load %arg16[%c0_31, %c2, %47, %c0_32] : memref<2x4x8x8xbf16, #tpu.memory_space<vmem>>, vector<1x1x8x8xbf16>
    %49 = vector.shape_cast %48 : vector<1x1x8x8xbf16> to vector<8x8xbf16>
    %c0_33 = arith.constant 0 : index
    %c2_34 = arith.constant 2 : index
    %c0_35 = arith.constant 0 : index
    %c0_36 = arith.constant 0 : index
    %50 = vector.load %arg17[%c0_33, %c2_34, %c0_35, %c0_36] : memref<2x4x8x8xbf16, #tpu.memory_space<vmem>>, vector<1x1x8x8xbf16>
    %51 = vector.shape_cast %50 : vector<1x1x8x8xbf16> to vector<8x8xbf16>
    %c0_37 = arith.constant 0 : index
    %c2_38 = arith.constant 2 : index
    %c0_39 = arith.constant 0 : index
    %c0_40 = arith.constant 0 : index
    %52 = vector.load %arg18[%c0_37, %c2_38, %c0_39, %c0_40] : memref<2x4x8x8xbf16, #tpu.memory_space<vmem>>, vector<1x1x8x8xbf16>
    %53 = vector.shape_cast %52 : vector<1x1x8x8xbf16> to vector<8x8xbf16>
    %cst_41 = arith.constant dense<0.000000e+00> : vector<8x8xf32>
    %54 = tpu.matmul %49, %51, %cst_41 {dimension_numbers = #tpu.dot_dimension_numbers<[1], [1], [0], [0], [0, 0, 1, 0], [], []>} : vector<8x8xbf16>, vector<8x8xbf16>, vector<8x8xf32> -> vector<8x8xf32>
    %cst_42 = arith.constant dense<0xFF800000> : vector<8xf32>
    %55 = vector.multi_reduction <maximumf>, %54, %cst_42 [1] : vector<8x8xf32> to vector<8xf32>
    %56 = vector.shape_cast %55 : vector<8xf32> to vector<8x1xf32>
    %57 = vector.broadcast %56 : vector<8x1xf32> to vector<8x8xf32>
    %58 = arith.subf %54, %57 : vector<8x8xf32>
    %59 = math.exp %58 : vector<8x8xf32>
    %cst_43 = arith.constant dense<0.000000e+00> : vector<8xf32>
    %60 = vector.multi_reduction <add>, %59, %cst_43 [1] : vector<8x8xf32> to vector<8xf32>
    %61 = vector.shape_cast %60 : vector<8xf32> to vector<8x1xf32>
    %62 = arith.truncf %59 : vector<8x8xf32> to vector<8x8xbf16>
    %cst_44 = arith.constant dense<0.000000e+00> : vector<8x8xf32>
    %63 = tpu.matmul %62, %53, %cst_44 {dimension_numbers = #tpu.dot_dimension_numbers<[1], [0], [0], [1], [0, 0, 1, 1], [], []>} : vector<8x8xbf16>, vector<8x8xbf16>, vector<8x8xf32> -> vector<8x8xf32>
    %64 = tpu.reciprocal %61 {approx = true} : vector<8x1xf32> -> vector<8x1xf32>
    %65 = vector.broadcast %64 : vector<8x1xf32> to vector<8x8xf32>
    %66 = arith.mulf %63, %65 : vector<8x8xf32>
    %c0_45 = arith.constant 0 : index
    %c16 = arith.constant 16 : index
    %67 = vector.load %arg19[%c0_45, %c16] : memref<16x32xf32, #tpu.memory_space<vmem>>, vector<8x8xf32>
    tpu.vector_store %arg19[%c0_45, %c16], %66 {strides = array<i32>} : memref<16x32xf32, #tpu.memory_space<vmem>>, vector<8x8xf32>,
    %c0_46 = arith.constant 0 : index
    %c3 = arith.constant 3 : index
    %68 = arith.index_cast %4 : i32 to index
    %c0_47 = arith.constant 0 : index
    %69 = vector.load %arg16[%c0_46, %c3, %68, %c0_47] : memref<2x4x8x8xbf16, #tpu.memory_space<vmem>>, vector<1x1x8x8xbf16>
    %70 = vector.shape_cast %69 : vector<1x1x8x8xbf16> to vector<8x8xbf16>
    %c0_48 = arith.constant 0 : index
    %c3_49 = arith.constant 3 : index
    %c0_50 = arith.constant 0 : index
    %c0_51 = arith.constant 0 : index
    %71 = vector.load %arg17[%c0_48, %c3_49, %c0_50, %c0_51] : memref<2x4x8x8xbf16, #tpu.memory_space<vmem>>, vector<1x1x8x8xbf16>
    %72 = vector.shape_cast %71 : vector<1x1x8x8xbf16> to vector<8x8xbf16>
    %c0_52 = arith.constant 0 : index
    %c3_53 = arith.constant 3 : index
    %c0_54 = arith.constant 0 : index
    %c0_55 = arith.constant 0 : index
    %73 = vector.load %arg18[%c0_52, %c3_53, %c0_54, %c0_55] : memref<2x4x8x8xbf16, #tpu.memory_space<vmem>>, vector<1x1x8x8xbf16>
    %74 = vector.shape_cast %73 : vector<1x1x8x8xbf16> to vector<8x8xbf16>
    %cst_56 = arith.constant dense<0.000000e+00> : vector<8x8xf32>
    %75 = tpu.matmul %70, %72, %cst_56 {dimension_numbers = #tpu.dot_dimension_numbers<[1], [1], [0], [0], [0, 0, 1, 0], [], []>} : vector<8x8xbf16>, vector<8x8xbf16>, vector<8x8xf32> -> vector<8x8xf32>
    %cst_57 = arith.constant dense<0xFF800000> : vector<8xf32>
    %76 = vector.multi_reduction <maximumf>, %75, %cst_57 [1] : vector<8x8xf32> to vector<8xf32>
    %77 = vector.shape_cast %76 : vector<8xf32> to vector<8x1xf32>
    %78 = vector.broadcast %77 : vector<8x1xf32> to vector<8x8xf32>
    %79 = arith.subf %75, %78 : vector<8x8xf32>
    %80 = math.exp %79 : vector<8x8xf32>
    %cst_58 = arith.constant dense<0.000000e+00> : vector<8xf32>
    %81 = vector.multi_reduction <add>, %80, %cst_58 [1] : vector<8x8xf32> to vector<8xf32>
    %82 = vector.shape_cast %81 : vector<8xf32> to vector<8x1xf32>
    %83 = arith.truncf %80 : vector<8x8xf32> to vector<8x8xbf16>
    %cst_59 = arith.constant dense<0.000000e+00> : vector<8x8xf32>
    %84 = tpu.matmul %83, %74, %cst_59 {dimension_numbers = #tpu.dot_dimension_numbers<[1], [0], [0], [1], [0, 0, 1, 1], [], []>} : vector<8x8xbf16>, vector<8x8xbf16>, vector<8x8xf32> -> vector<8x8xf32>
    %85 = tpu.reciprocal %82 {approx = true} : vector<8x1xf32> -> vector<8x1xf32>
    %86 = vector.broadcast %85 : vector<8x1xf32> to vector<8x8xf32>
    %87 = arith.mulf %84, %86 : vector<8x8xf32>
    %c0_60 = arith.constant 0 : index
    %c24 = arith.constant 24 : index
    %88 = vector.load %arg19[%c0_60, %c24] : memref<16x32xf32, #tpu.memory_space<vmem>>, vector<8x8xf32>
    tpu.vector_store %arg19[%c0_60, %c24], %87 {strides = array<i32>} : memref<16x32xf32, #tpu.memory_space<vmem>>, vector<8x8xf32>,
    %c1_61 = arith.constant 1 : index
    %c0_62 = arith.constant 0 : index
    %89 = arith.index_cast %4 : i32 to index
    %c0_63 = arith.constant 0 : index
    %90 = vector.load %arg16[%c1_61, %c0_62, %89, %c0_63] : memref<2x4x8x8xbf16, #tpu.memory_space<vmem>>, vector<1x1x8x8xbf16>
    %91 = vector.shape_cast %90 : vector<1x1x8x8xbf16> to vector<8x8xbf16>
    %c1_64 = arith.constant 1 : index
    %c0_65 = arith.constant 0 : index
    %c0_66 = arith.constant 0 : index
    %c0_67 = arith.constant 0 : index
    %92 = vector.load %arg17[%c1_64, %c0_65, %c0_66, %c0_67] : memref<2x4x8x8xbf16, #tpu.memory_space<vmem>>, vector<1x1x8x8xbf16>
    %93 = vector.shape_cast %92 : vector<1x1x8x8xbf16> to vector<8x8xbf16>
    %c1_68 = arith.constant 1 : index
    %c0_69 = arith.constant 0 : index
    %c0_70 = arith.constant 0 : index
    %c0_71 = arith.constant 0 : index
    %94 = vector.load %arg18[%c1_68, %c0_69, %c0_70, %c0_71] : memref<2x4x8x8xbf16, #tpu.memory_space<vmem>>, vector<1x1x8x8xbf16>
    %95 = vector.shape_cast %94 : vector<1x1x8x8xbf16> to vector<8x8xbf16>
    %cst_72 = arith.constant dense<0.000000e+00> : vector<8x8xf32>
    %96 = tpu.matmul %91, %93, %cst_72 {dimension_numbers = #tpu.dot_dimension_numbers<[1], [1], [0], [0], [0, 0, 1, 0], [], []>} : vector<8x8xbf16>, vector<8x8xbf16>, vector<8x8xf32> -> vector<8x8xf32>
    %cst_73 = arith.constant dense<0xFF800000> : vector<8xf32>
    %97 = vector.multi_reduction <maximumf>, %96, %cst_73 [1] : vector<8x8xf32> to vector<8xf32>
    %98 = vector.shape_cast %97 : vector<8xf32> to vector<8x1xf32>
    %99 = vector.broadcast %98 : vector<8x1xf32> to vector<8x8xf32>
    %100 = arith.subf %96, %99 : vector<8x8xf32>
    %101 = math.exp %100 : vector<8x8xf32>
    %cst_74 = arith.constant dense<0.000000e+00> : vector<8xf32>
    %102 = vector.multi_reduction <add>, %101, %cst_74 [1] : vector<8x8xf32> to vector<8xf32>
    %103 = vector.shape_cast %102 : vector<8xf32> to vector<8x1xf32>
    %104 = arith.truncf %101 : vector<8x8xf32> to vector<8x8xbf16>
    %cst_75 = arith.constant dense<0.000000e+00> : vector<8x8xf32>
    %105 = tpu.matmul %104, %95, %cst_75 {dimension_numbers = #tpu.dot_dimension_numbers<[1], [0], [0], [1], [0, 0, 1, 1], [], []>} : vector<8x8xbf16>, vector<8x8xbf16>, vector<8x8xf32> -> vector<8x8xf32>
    %106 = tpu.reciprocal %103 {approx = true} : vector<8x1xf32> -> vector<8x1xf32>
    %107 = vector.broadcast %106 : vector<8x1xf32> to vector<8x8xf32>
    %108 = arith.mulf %105, %107 : vector<8x8xf32>
    %c8_76 = arith.constant 8 : index
    %c0_77 = arith.constant 0 : index
    %109 = vector.load %arg19[%c8_76, %c0_77] : memref<16x32xf32, #tpu.memory_space<vmem>>, vector<8x8xf32>
    tpu.vector_store %arg19[%c8_76, %c0_77], %108 {strides = array<i32>} : memref<16x32xf32, #tpu.memory_space<vmem>>, vector<8x8xf32>,
    %c1_78 = arith.constant 1 : index
    %c1_79 = arith.constant 1 : index
    %110 = arith.index_cast %4 : i32 to index
    %c0_80 = arith.constant 0 : index
    %111 = vector.load %arg16[%c1_78, %c1_79, %110, %c0_80] : memref<2x4x8x8xbf16, #tpu.memory_space<vmem>>, vector<1x1x8x8xbf16>
    %112 = vector.shape_cast %111 : vector<1x1x8x8xbf16> to vector<8x8xbf16>
    %c1_81 = arith.constant 1 : index
    %c1_82 = arith.constant 1 : index
    %c0_83 = arith.constant 0 : index
    %c0_84 = arith.constant 0 : index
    %113 = vector.load %arg17[%c1_81, %c1_82, %c0_83, %c0_84] : memref<2x4x8x8xbf16, #tpu.memory_space<vmem>>, vector<1x1x8x8xbf16>
    %114 = vector.shape_cast %113 : vector<1x1x8x8xbf16> to vector<8x8xbf16>
    %c1_85 = arith.constant 1 : index
    %c1_86 = arith.constant 1 : index
    %c0_87 = arith.constant 0 : index
    %c0_88 = arith.constant 0 : index
    %115 = vector.load %arg18[%c1_85, %c1_86, %c0_87, %c0_88] : memref<2x4x8x8xbf16, #tpu.memory_space<vmem>>, vector<1x1x8x8xbf16>
    %116 = vector.shape_cast %115 : vector<1x1x8x8xbf16> to vector<8x8xbf16>
    %cst_89 = arith.constant dense<0.000000e+00> : vector<8x8xf32>
    %117 = tpu.matmul %112, %114, %cst_89 {dimension_numbers = #tpu.dot_dimension_numbers<[1], [1], [0], [0], [0, 0, 1, 0], [], []>} : vector<8x8xbf16>, vector<8x8xbf16>, vector<8x8xf32> -> vector<8x8xf32>
    %cst_90 = arith.constant dense<0xFF800000> : vector<8xf32>
    %118 = vector.multi_reduction <maximumf>, %117, %cst_90 [1] : vector<8x8xf32> to vector<8xf32>
    %119 = vector.shape_cast %118 : vector<8xf32> to vector<8x1xf32>
    %120 = vector.broadcast %119 : vector<8x1xf32> to vector<8x8xf32>
    %121 = arith.subf %117, %120 : vector<8x8xf32>
    %122 = math.exp %121 : vector<8x8xf32>
    %cst_91 = arith.constant dense<0.000000e+00> : vector<8xf32>
    %123 = vector.multi_reduction <add>, %122, %cst_91 [1] : vector<8x8xf32> to vector<8xf32>
    %124 = vector.shape_cast %123 : vector<8xf32> to vector<8x1xf32>
    %125 = arith.truncf %122 : vector<8x8xf32> to vector<8x8xbf16>
    %cst_92 = arith.constant dense<0.000000e+00> : vector<8x8xf32>
    %126 = tpu.matmul %125, %116, %cst_92 {dimension_numbers = #tpu.dot_dimension_numbers<[1], [0], [0], [1], [0, 0, 1, 1], [], []>} : vector<8x8xbf16>, vector<8x8xbf16>, vector<8x8xf32> -> vector<8x8xf32>
    %127 = tpu.reciprocal %124 {approx = true} : vector<8x1xf32> -> vector<8x1xf32>
    %128 = vector.broadcast %127 : vector<8x1xf32> to vector<8x8xf32>
    %129 = arith.mulf %126, %128 : vector<8x8xf32>
    %c8_93 = arith.constant 8 : index
    %c8_94 = arith.constant 8 : index
    %130 = vector.load %arg19[%c8_93, %c8_94] : memref<16x32xf32, #tpu.memory_space<vmem>>, vector<8x8xf32>
    tpu.vector_store %arg19[%c8_93, %c8_94], %129 {strides = array<i32>} : memref<16x32xf32, #tpu.memory_space<vmem>>, vector<8x8xf32>,
    %c1_95 = arith.constant 1 : index
    %c2_96 = arith.constant 2 : index
    %131 = arith.index_cast %4 : i32 to index
    %c0_97 = arith.constant 0 : index
    %132 = vector.load %arg16[%c1_95, %c2_96, %131, %c0_97] : memref<2x4x8x8xbf16, #tpu.memory_space<vmem>>, vector<1x1x8x8xbf16>
    %133 = vector.shape_cast %132 : vector<1x1x8x8xbf16> to vector<8x8xbf16>
    %c1_98 = arith.constant 1 : index
    %c2_99 = arith.constant 2 : index
    %c0_100 = arith.constant 0 : index
    %c0_101 = arith.constant 0 : index
    %134 = vector.load %arg17[%c1_98, %c2_99, %c0_100, %c0_101] : memref<2x4x8x8xbf16, #tpu.memory_space<vmem>>, vector<1x1x8x8xbf16>
    %135 = vector.shape_cast %134 : vector<1x1x8x8xbf16> to vector<8x8xbf16>
    %c1_102 = arith.constant 1 : index
    %c2_103 = arith.constant 2 : index
    %c0_104 = arith.constant 0 : index
    %c0_105 = arith.constant 0 : index
    %136 = vector.load %arg18[%c1_102, %c2_103, %c0_104, %c0_105] : memref<2x4x8x8xbf16, #tpu.memory_space<vmem>>, vector<1x1x8x8xbf16>
    %137 = vector.shape_cast %136 : vector<1x1x8x8xbf16> to vector<8x8xbf16>
    %cst_106 = arith.constant dense<0.000000e+00> : vector<8x8xf32>
    %138 = tpu.matmul %133, %135, %cst_106 {dimension_numbers = #tpu.dot_dimension_numbers<[1], [1], [0], [0], [0, 0, 1, 0], [], []>} : vector<8x8xbf16>, vector<8x8xbf16>, vector<8x8xf32> -> vector<8x8xf32>
    %cst_107 = arith.constant dense<0xFF800000> : vector<8xf32>
    %139 = vector.multi_reduction <maximumf>, %138, %cst_107 [1] : vector<8x8xf32> to vector<8xf32>
    %140 = vector.shape_cast %139 : vector<8xf32> to vector<8x1xf32>
    %141 = vector.broadcast %140 : vector<8x1xf32> to vector<8x8xf32>
    %142 = arith.subf %138, %141 : vector<8x8xf32>
    %143 = math.exp %142 : vector<8x8xf32>
    %cst_108 = arith.constant dense<0.000000e+00> : vector<8xf32>
    %144 = vector.multi_reduction <add>, %143, %cst_108 [1] : vector<8x8xf32> to vector<8xf32>
    %145 = vector.shape_cast %144 : vector<8xf32> to vector<8x1xf32>
    %146 = arith.truncf %143 : vector<8x8xf32> to vector<8x8xbf16>
    %cst_109 = arith.constant dense<0.000000e+00> : vector<8x8xf32>
    %147 = tpu.matmul %146, %137, %cst_109 {dimension_numbers = #tpu.dot_dimension_numbers<[1], [0], [0], [1], [0, 0, 1, 1], [], []>} : vector<8x8xbf16>, vector<8x8xbf16>, vector<8x8xf32> -> vector<8x8xf32>
    %148 = tpu.reciprocal %145 {approx = true} : vector<8x1xf32> -> vector<8x1xf32>
    %149 = vector.broadcast %148 : vector<8x1xf32> to vector<8x8xf32>
    %150 = arith.mulf %147, %149 : vector<8x8xf32>
    %c8_110 = arith.constant 8 : index
    %c16_111 = arith.constant 16 : index
    %151 = vector.load %arg19[%c8_110, %c16_111] : memref<16x32xf32, #tpu.memory_space<vmem>>, vector<8x8xf32>
    tpu.vector_store %arg19[%c8_110, %c16_111], %150 {strides = array<i32>} : memref<16x32xf32, #tpu.memory_space<vmem>>, vector<8x8xf32>,
    %c1_112 = arith.constant 1 : index
    %c3_113 = arith.constant 3 : index
    %152 = arith.index_cast %4 : i32 to index
    %c0_114 = arith.constant 0 : index
    %153 = vector.load %arg16[%c1_112, %c3_113, %152, %c0_114] : memref<2x4x8x8xbf16, #tpu.memory_space<vmem>>, vector<1x1x8x8xbf16>
    %154 = vector.shape_cast %153 : vector<1x1x8x8xbf16> to vector<8x8xbf16>
    %c1_115 = arith.constant 1 : index
    %c3_116 = arith.constant 3 : index
    %c0_117 = arith.constant 0 : index
    %c0_118 = arith.constant 0 : index
    %155 = vector.load %arg17[%c1_115, %c3_116, %c0_117, %c0_118] : memref<2x4x8x8xbf16, #tpu.memory_space<vmem>>, vector<1x1x8x8xbf16>
    %156 = vector.shape_cast %155 : vector<1x1x8x8xbf16> to vector<8x8xbf16>
    %c1_119 = arith.constant 1 : index
    %c3_120 = arith.constant 3 : index
    %c0_121 = arith.constant 0 : index
    %c0_122 = arith.constant 0 : index
    %157 = vector.load %arg18[%c1_119, %c3_120, %c0_121, %c0_122] : memref<2x4x8x8xbf16, #tpu.memory_space<vmem>>, vector<1x1x8x8xbf16>
    %158 = vector.shape_cast %157 : vector<1x1x8x8xbf16> to vector<8x8xbf16>
    %cst_123 = arith.constant dense<0.000000e+00> : vector<8x8xf32>
    %159 = tpu.matmul %154, %156, %cst_123 {dimension_numbers = #tpu.dot_dimension_numbers<[1], [1], [0], [0], [0, 0, 1, 0], [], []>} : vector<8x8xbf16>, vector<8x8xbf16>, vector<8x8xf32> -> vector<8x8xf32>
    %cst_124 = arith.constant dense<0xFF800000> : vector<8xf32>
    %160 = vector.multi_reduction <maximumf>, %159, %cst_124 [1] : vector<8x8xf32> to vector<8xf32>
    %161 = vector.shape_cast %160 : vector<8xf32> to vector<8x1xf32>
    %162 = vector.broadcast %161 : vector<8x1xf32> to vector<8x8xf32>
    %163 = arith.subf %159, %162 : vector<8x8xf32>
    %164 = math.exp %163 : vector<8x8xf32>
    %cst_125 = arith.constant dense<0.000000e+00> : vector<8xf32>
    %165 = vector.multi_reduction <add>, %164, %cst_125 [1] : vector<8x8xf32> to vector<8xf32>
    %166 = vector.shape_cast %165 : vector<8xf32> to vector<8x1xf32>
    %167 = arith.truncf %164 : vector<8x8xf32> to vector<8x8xbf16>
    %cst_126 = arith.constant dense<0.000000e+00> : vector<8x8xf32>
    %168 = tpu.matmul %167, %158, %cst_126 {dimension_numbers = #tpu.dot_dimension_numbers<[1], [0], [0], [1], [0, 0, 1, 1], [], []>} : vector<8x8xbf16>, vector<8x8xbf16>, vector<8x8xf32> -> vector<8x8xf32>
    %169 = tpu.reciprocal %166 {approx = true} : vector<8x1xf32> -> vector<8x1xf32>
    %170 = vector.broadcast %169 : vector<8x1xf32> to vector<8x8xf32>
    %171 = arith.mulf %168, %170 : vector<8x8xf32>
    %c8_127 = arith.constant 8 : index
    %c24_128 = arith.constant 24 : index
    %172 = vector.load %arg19[%c8_127, %c24_128] : memref<16x32xf32, #tpu.memory_space<vmem>>, vector<8x8xf32>
    tpu.vector_store %arg19[%c8_127, %c24_128], %171 {strides = array<i32>} : memref<16x32xf32, #tpu.memory_space<vmem>>, vector<8x8xf32>,
    %c0_129 = arith.constant 0 : index
    %173 = arith.index_cast %4 : i32 to index
    %c0_130 = arith.constant 0 : index
    %174 = vector.load %arg2[%c0_129, %173, %c0_130] : memref<2x8x32xf32, #tpu.memory_space<vmem>>, vector<2x8x32xf32>
    %175 = vector.shape_cast %174 : vector<2x8x32xf32> to vector<16x32xf32>
    %c0_131 = arith.constant 0 : index
    %c0_132 = arith.constant 0 : index
    %176 = vector.load %arg19[%c0_131, %c0_132] : memref<16x32xf32, #tpu.memory_space<vmem>>, vector<16x32xf32>
    %177 = arith.truncf %176 : vector<16x32xf32> to vector<16x32xbf16>
    %c0_133 = arith.constant 0 : index
    %c0_134 = arith.constant 0 : index
    %178 = vector.load %arg5[%c0_133, %c0_134] : memref<32x32xbf16, #tpu.memory_space<vmem>>, vector<32x32xbf16>
    %cst_135 = arith.constant dense<0.000000e+00> : vector<16x32xf32>
    %179 = tpu.matmul %177, %178, %cst_135 {dimension_numbers = #tpu.dot_dimension_numbers<[1], [0], [0], [1], [0, 0, 1, 1], [], []>} : vector<16x32xbf16>, vector<32x32xbf16>, vector<16x32xf32> -> vector<16x32xf32>
    %c0_136 = arith.constant 0 : index
    %c0_137 = arith.constant 0 : index
    %180 = vector.load %arg6[%c0_136, %c0_137] : memref<1x32xf32, #tpu.memory_space<vmem>>, vector<1x32xf32>
    %181 = vector.broadcast %180 : vector<1x32xf32> to vector<16x32xf32>
    %182 = arith.addf %179, %181 : vector<16x32xf32>
    %183 = arith.addf %175, %182 : vector<16x32xf32>
    %c0_138 = arith.constant 0 : index
    %c0_139 = arith.constant 0 : index
    %184 = vector.load %arg11[%c0_138, %c0_139] : memref<1x32xf32, #tpu.memory_space<vmem>>, vector<1x32xf32>
    %c0_140 = arith.constant 0 : index
    %c0_141 = arith.constant 0 : index
    %185 = vector.load %arg12[%c0_140, %c0_141] : memref<1x32xf32, #tpu.memory_space<vmem>>, vector<1x32xf32>
    %cst_142 = arith.constant dense<0.000000e+00> : vector<16xf32>
    %186 = vector.multi_reduction <add>, %183, %cst_142 [1] : vector<16x32xf32> to vector<16xf32>
    %187 = vector.shape_cast %186 : vector<16xf32> to vector<16x1xf32>
    %cst_143 = arith.constant 3.200000e+01 : f32
    %188 = vector.broadcast %cst_143 : f32 to vector<16x1xf32>
    %189 = arith.divf %187, %188 : vector<16x1xf32>
    %190 = vector.broadcast %189 : vector<16x1xf32> to vector<16x32xf32>
    %191 = arith.subf %183, %190 : vector<16x32xf32>
    %192 = arith.mulf %191, %191 : vector<16x32xf32>
    %cst_144 = arith.constant dense<0.000000e+00> : vector<16xf32>
    %193 = vector.multi_reduction <add>, %192, %cst_144 [1] : vector<16x32xf32> to vector<16xf32>
    %194 = vector.shape_cast %193 : vector<16xf32> to vector<16x1xf32>
    %cst_145 = arith.constant 3.200000e+01 : f32
    %195 = vector.broadcast %cst_145 : f32 to vector<16x1xf32>
    %196 = arith.divf %194, %195 : vector<16x1xf32>
    %197 = vector.broadcast %189 : vector<16x1xf32> to vector<16x32xf32>
    %198 = arith.subf %183, %197 : vector<16x32xf32>
    %cst_146 = arith.constant 9.99999974E-6 : f32
    %199 = vector.broadcast %cst_146 : f32 to vector<16x1xf32>
    %200 = arith.addf %196, %199 : vector<16x1xf32>
    %201 = math.rsqrt %200 : vector<16x1xf32>
    %202 = vector.broadcast %201 : vector<16x1xf32> to vector<16x32xf32>
    %203 = arith.mulf %198, %202 : vector<16x32xf32>
    %204 = vector.broadcast %184 : vector<1x32xf32> to vector<16x32xf32>
    %205 = arith.mulf %203, %204 : vector<16x32xf32>
    %206 = vector.broadcast %185 : vector<1x32xf32> to vector<16x32xf32>
    %207 = arith.addf %205, %206 : vector<16x32xf32>
    %208 = arith.truncf %207 : vector<16x32xf32> to vector<16x32xbf16>
    %c0_147 = arith.constant 0 : index
    %c0_148 = arith.constant 0 : index
    %209 = vector.load %arg7[%c0_147, %c0_148] : memref<32x64xbf16, #tpu.memory_space<vmem>>, vector<32x64xbf16>
    %cst_149 = arith.constant dense<0.000000e+00> : vector<16x64xf32>
    %210 = tpu.matmul %208, %209, %cst_149 {dimension_numbers = #tpu.dot_dimension_numbers<[1], [0], [0], [1], [0, 0, 1, 1], [], []>} : vector<16x32xbf16>, vector<32x64xbf16>, vector<16x64xf32> -> vector<16x64xf32>
    %c0_150 = arith.constant 0 : index
    %c0_151 = arith.constant 0 : index
    %211 = vector.load %arg8[%c0_150, %c0_151] : memref<1x64xf32, #tpu.memory_space<vmem>>, vector<1x64xf32>
    %212 = vector.broadcast %211 : vector<1x64xf32> to vector<16x64xf32>
    %213 = arith.addf %210, %212 : vector<16x64xf32>
    %cst_152 = arith.constant 0.000000e+00 : f32
    %214 = vector.broadcast %cst_152 : f32 to vector<16x64xf32>
    %215 = arith.maximumf %213, %214 : vector<16x64xf32>
    %216 = arith.truncf %215 : vector<16x64xf32> to vector<16x64xbf16>
    %c0_153 = arith.constant 0 : index
    %c0_154 = arith.constant 0 : index
    %217 = vector.load %arg9[%c0_153, %c0_154] : memref<64x32xbf16, #tpu.memory_space<vmem>>, vector<64x32xbf16>
    %cst_155 = arith.constant dense<0.000000e+00> : vector<16x32xf32>
    %218 = tpu.matmul %216, %217, %cst_155 {dimension_numbers = #tpu.dot_dimension_numbers<[1], [0], [0], [1], [0, 0, 1, 1], [], []>} : vector<16x64xbf16>, vector<64x32xbf16>, vector<16x32xf32> -> vector<16x32xf32>
    %c0_156 = arith.constant 0 : index
    %c0_157 = arith.constant 0 : index
    %219 = vector.load %arg10[%c0_156, %c0_157] : memref<1x32xf32, #tpu.memory_space<vmem>>, vector<1x32xf32>
    %220 = vector.broadcast %219 : vector<1x32xf32> to vector<16x32xf32>
    %221 = arith.addf %218, %220 : vector<16x32xf32>
    %222 = arith.addf %207, %221 : vector<16x32xf32>
    %c0_158 = arith.constant 0 : index
    %c0_159 = arith.constant 0 : index
    %223 = vector.load %arg13[%c0_158, %c0_159] : memref<1x32xf32, #tpu.memory_space<vmem>>, vector<1x32xf32>
    %c0_160 = arith.constant 0 : index
    %c0_161 = arith.constant 0 : index
    %224 = vector.load %arg14[%c0_160, %c0_161] : memref<1x32xf32, #tpu.memory_space<vmem>>, vector<1x32xf32>
    %cst_162 = arith.constant dense<0.000000e+00> : vector<16xf32>
    %225 = vector.multi_reduction <add>, %222, %cst_162 [1] : vector<16x32xf32> to vector<16xf32>
    %226 = vector.shape_cast %225 : vector<16xf32> to vector<16x1xf32>
    %cst_163 = arith.constant 3.200000e+01 : f32
    %227 = vector.broadcast %cst_163 : f32 to vector<16x1xf32>
    %228 = arith.divf %226, %227 : vector<16x1xf32>
    %229 = vector.broadcast %228 : vector<16x1xf32> to vector<16x32xf32>
    %230 = arith.subf %222, %229 : vector<16x32xf32>
    %231 = arith.mulf %230, %230 : vector<16x32xf32>
    %cst_164 = arith.constant dense<0.000000e+00> : vector<16xf32>
    %232 = vector.multi_reduction <add>, %231, %cst_164 [1] : vector<16x32xf32> to vector<16xf32>
    %233 = vector.shape_cast %232 : vector<16xf32> to vector<16x1xf32>
    %cst_165 = arith.constant 3.200000e+01 : f32
    %234 = vector.broadcast %cst_165 : f32 to vector<16x1xf32>
    %235 = arith.divf %233, %234 : vector<16x1xf32>
    %236 = vector.broadcast %228 : vector<16x1xf32> to vector<16x32xf32>
    %237 = arith.subf %222, %236 : vector<16x32xf32>
    %cst_166 = arith.constant 9.99999974E-6 : f32
    %238 = vector.broadcast %cst_166 : f32 to vector<16x1xf32>
    %239 = arith.addf %235, %238 : vector<16x1xf32>
    %240 = math.rsqrt %239 : vector<16x1xf32>
    %241 = vector.broadcast %240 : vector<16x1xf32> to vector<16x32xf32>
    %242 = arith.mulf %237, %241 : vector<16x32xf32>
    %243 = vector.broadcast %223 : vector<1x32xf32> to vector<16x32xf32>
    %244 = arith.mulf %242, %243 : vector<16x32xf32>
    %245 = vector.broadcast %224 : vector<1x32xf32> to vector<16x32xf32>
    %246 = arith.addf %244, %245 : vector<16x32xf32>
    %247 = vector.shape_cast %246 : vector<16x32xf32> to vector<2x8x32xf32>
    %c0_167 = arith.constant 0 : index
    %c0_168 = arith.constant 0 : index
    %c0_169 = arith.constant 0 : index
    %248 = vector.load %arg15[%c0_167, %c0_168, %c0_169] : memref<2x8x32xf32, #tpu.memory_space<vmem>>, vector<2x8x32xf32>
    tpu.vector_store %arg15[%c0_167, %c0_168, %c0_169], %247 {strides = array<i32>} : memref<2x8x32xf32, #tpu.memory_space<vmem>>, vector<2x8x32xf32>,
    return
  }
  func.func @transform_0(%arg0: i32, %arg1: i32) -> (i32, i32, i32) {
    %c0_i32 = arith.constant 0 : i32
    %c0_i32_0 = arith.constant 0 : i32
    %c0_i32_1 = arith.constant 0 : i32
    return %arg0, %c0_i32, %c0_i32_0 : i32, i32, i32
  }
  func.func @transform_1(%arg0: i32, %arg1: i32) -> (i32, i32) {
    %c0_i32 = arith.constant 0 : i32
    %c0_i32_0 = arith.constant 0 : i32
    %c0_i32_1 = arith.constant 0 : i32
    return %c0_i32, %c0_i32_0 : i32, i32
  }
  func.func @transform_2(%arg0: i32, %arg1: i32) -> (i32, i32) {
    %c0_i32 = arith.constant 0 : i32
    %c0_i32_0 = arith.constant 0 : i32
    %c0_i32_1 = arith.constant 0 : i32
    return %c0_i32, %c0_i32_0 : i32, i32
  }
  func.func @transform_3(%arg0: i32, %arg1: i32) -> (i32, i32) {
    %c0_i32 = arith.constant 0 : i32
    %c0_i32_0 = arith.constant 0 : i32
    %c0_i32_1 = arith.constant 0 : i32
    return %c0_i32, %c0_i32_0 : i32, i32
  }
  func.func @transform_4(%arg0: i32, %arg1: i32) -> (i32, i32) {
    %c0_i32 = arith.constant 0 : i32
    %c0_i32_0 = arith.constant 0 : i32
    %c0_i32_1 = arith.constant 0 : i32
    return %c0_i32, %c0_i32_0 : i32, i32
  }
  func.func @transform_5(%arg0: i32, %arg1: i32) -> (i32, i32) {
    %c0_i32 = arith.constant 0 : i32
    %c0_i32_0 = arith.constant 0 : i32
    %c0_i32_1 = arith.constant 0 : i32
    return %c0_i32, %c0_i32_0 : i32, i32
  }
  func.func @transform_6(%arg0: i32, %arg1: i32) -> (i32, i32) {
    %c0_i32 = arith.constant 0 : i32
    %c0_i32_0 = arith.constant 0 : i32
    %c0_i32_1 = arith.constant 0 : i32
    return %c0_i32, %c0_i32_0 : i32, i32
  }
  func.func @transform_7(%arg0: i32, %arg1: i32) -> (i32, i32) {
    %c0_i32 = arith.constant 0 : i32
    %c0_i32_0 = arith.constant 0 : i32
    %c0_i32_1 = arith.constant 0 : i32
    return %c0_i32, %c0_i32_0 : i32, i32
  }
  func.func @transform_8(%arg0: i32, %arg1: i32) -> (i32, i32) {
    %c0_i32 = arith.constant 0 : i32
    %c0_i32_0 = arith.constant 0 : i32
    %c0_i32_1 = arith.constant 0 : i32
    return %c0_i32, %c0_i32_0 : i32, i32
  }
  func.func @transform_9(%arg0: i32, %arg1: i32) -> (i32, i32) {
    %c0_i32 = arith.constant 0 : i32
    %c0_i32_0 = arith.constant 0 : i32
    %c0_i32_1 = arith.constant 0 : i32
    return %c0_i32, %c0_i32_0 : i32, i32
  }
  func.func @transform_10(%arg0: i32, %arg1: i32) -> (i32, i32) {
    %c0_i32 = arith.constant 0 : i32
    %c0_i32_0 = arith.constant 0 : i32
    %c0_i32_1 = arith.constant 0 : i32
    return %c0_i32, %c0_i32_0 : i32, i32
  }
  func.func @transform_11(%arg0: i32, %arg1: i32) -> (i32, i32) {
    %c0_i32 = arith.constant 0 : i32
    %c0_i32_0 = arith.constant 0 : i32
    %c0_i32_1 = arith.constant 0 : i32
    return %c0_i32, %c0_i32_0 : i32, i32
  }
  func.func @transform_12(%arg0: i32, %arg1: i32) -> (i32, i32) {
    %c0_i32 = arith.constant 0 : i32
    %c0_i32_0 = arith.constant 0 : i32
    %c0_i32_1 = arith.constant 0 : i32
    return %c0_i32, %c0_i32_0 : i32, i32
  }
  func.func @transform_13(%arg0: i32, %arg1: i32) -> (i32, i32, i32) {
    %c0_i32 = arith.constant 0 : i32
    %c0_i32_0 = arith.constant 0 : i32
    return %arg0, %arg1, %c0_i32 : i32, i32, i32
  }
}

module attributes {stable_mosaic.version = 11 : i64} {
  func.func @attention_block_kernel(%arg0: i32, %arg1: i32, %arg2: memref<2x8x32xf32, #tpu.memory_space<vmem>>, %arg3: memref<32x96xbf16, #tpu.memory_space<vmem>>, %arg4: memref<1x96xf32, #tpu.memory_space<vmem>>, %arg5: memref<32x32xbf16, #tpu.memory_space<vmem>>, %arg6: memref<1x32xf32, #tpu.memory_space<vmem>>, %arg7: memref<32x64xbf16, #tpu.memory_space<vmem>>, %arg8: memref<1x64xf32, #tpu.memory_space<vmem>>, %arg9: memref<64x32xbf16, #tpu.memory_space<vmem>>, %arg10: memref<1x32xf32, #tpu.memory_space<vmem>>, %arg11: memref<1x32xf32, #tpu.memory_space<vmem>>, %arg12: memref<1x32xf32, #tpu.memory_space<vmem>>, %arg13: memref<1x32xf32, #tpu.memory_space<vmem>>, %arg14: memref<1x32xf32, #tpu.memory_space<vmem>>, %arg15: memref<2x8x32xf32, #tpu.memory_space<vmem>>, %arg16: memref<2x4x8x8xbf16, #tpu.memory_space<vmem>>, %arg17: memref<2x4x8x8xbf16, #tpu.memory_space<vmem>>, %arg18: memref<2x4x8x8xbf16, #tpu.memory_space<vmem>>, %arg19: memref<16x32xf32, #tpu.memory_space<vmem>>) attributes {dimension_semantics = [#tpu.dimension_semantics<parallel>, #tpu.dimension_semantics<arbitrary>], iteration_bounds = array<i64: 1, 1>, scalar_prefetch = 0 : i64, scratch_operands = 4 : i64, tpu.core_type = #tpu.core_type<tc>, window_params = [{transform_indices = @transform_0, window_bounds = array<i64: 2, 8, 32>}, {pipeline_mode = #tpu.pipeline_mode<synchronous>, transform_indices = @transform_1, window_bounds = array<i64: 32, 96>}, {pipeline_mode = #tpu.pipeline_mode<synchronous>, transform_indices = @transform_2, window_bounds = array<i64: 1, 96>}, {pipeline_mode = #tpu.pipeline_mode<synchronous>, transform_indices = @transform_3, window_bounds = array<i64: 32, 32>}, {pipeline_mode = #tpu.pipeline_mode<synchronous>, transform_indices = @transform_4, window_bounds = array<i64: 1, 32>}, {pipeline_mode = #tpu.pipeline_mode<synchronous>, transform_indices = @transform_5, window_bounds = array<i64: 32, 64>}, {pipeline_mode = #tpu.pipeline_mode<synchronous>, transform_indices = @transform_6, window_bounds = array<i64: 1, 64>}, {pipeline_mode = #tpu.pipeline_mode<synchronous>, transform_indices = @transform_7, window_bounds = array<i64: 64, 32>}, {pipeline_mode = #tpu.pipeline_mode<synchronous>, transform_indices = @transform_8, window_bounds = array<i64: 1, 32>}, {pipeline_mode = #tpu.pipeline_mode<synchronous>, transform_indices = @transform_9, window_bounds = array<i64: 1, 32>}, {pipeline_mode = #tpu.pipeline_mode<synchronous>, transform_indices = @transform_10, window_bounds = array<i64: 1, 32>}, {pipeline_mode = #tpu.pipeline_mode<synchronous>, transform_indices = @transform_11, window_bounds = array<i64: 1, 32>}, {pipeline_mode = #tpu.pipeline_mode<synchronous>, transform_indices = @transform_12, window_bounds = array<i64: 1, 32>}, {transform_indices = @transform_13, window_bounds = array<i64: 2, 8, 32>}]} {
    %c0_i32 = arith.constant 0 : i32
    %0 = arith.cmpi eq, %arg1, %c0_i32 : i32
    %1 = arith.extui %0 : i1 to i32
    %c0_i32_0 = arith.constant 0 : i32
    %2 = arith.cmpi ne, %1, %c0_i32_0 : i32
    scf.if %2 {
      %c0_170 = arith.constant 0 : index
      %c0_171 = arith.constant 0 : index
      %c0_172 = arith.constant 0 : index
      %249 = vector.load %arg2[%c0_170, %c0_171, %c0_172] : memref<2x8x32xf32, #tpu.memory_space<vmem>>, vector<2x8x32xf32>
      %250 = vector.shape_cast %249 : vector<2x8x32xf32> to vector<16x32xf32>
      %251 = arith.truncf %250 : vector<16x32xf32> to vector<16x32xbf16>
      %c0_173 = arith.constant 0 : index
      %c0_174 = arith.constant 0 : index
      %252 = vector.load %arg3[%c0_173, %c0_174] : memref<32x96xbf16, #tpu.memory_space<vmem>>, vector<32x32xbf16>
      %cst_175 = arith.constant dense<0.000000e+00> : vector<16x32xf32>
      %253 = tpu.matmul %251, %252, %cst_175 {dimension_numbers = #tpu.dot_dimension_numbers<[1], [0], [0], [1], [0, 0, 1, 1], [], []>} : vector<16x32xbf16>, vector<32x32xbf16>, vector<16x32xf32> -> vector<16x32xf32>
      %c0_176 = arith.constant 0 : index
      %c0_177 = arith.constant 0 : index
      %254 = vector.load %arg4[%c0_176, %c0_177] : memref<1x96xf32, #tpu.memory_space<vmem>>, vector<1x32xf32>
      %255 = vector.broadcast %254 : vector<1x32xf32> to vector<16x32xf32>
      %256 = arith.addf %253, %255 : vector<16x32xf32>
      %257 = arith.truncf %256 : vector<16x32xf32> to vector<16x32xbf16>
      %258 = vector.shape_cast %257 : vector<16x32xbf16> to vector<2x8x32xbf16>
      %259 = vector.extract_strided_slice %258 {offsets = [0, 0, 0], sizes = [2, 8, 8], strides = [1, 1, 1]} : vector<2x8x32xbf16> to vector<2x8x8xbf16>
      %c0_178 = arith.constant 0 : index
      %c0_179 = arith.constant 0 : index
      %c0_180 = arith.constant 0 : index
      %c0_181 = arith.constant 0 : index
      %260 = vector.load %arg16[%c0_178, %c0_179, %c0_180, %c0_181] : memref<2x4x8x8xbf16, #tpu.memory_space<vmem>>, vector<2x1x8x8xbf16>
      %261 = vector.shape_cast %260 : vector<2x1x8x8xbf16> to vector<2x8x8xbf16>
      %262 = vector.shape_cast %259 : vector<2x8x8xbf16> to vector<2x1x8x8xbf16>
      tpu.vector_store %arg16[%c0_178, %c0_179, %c0_180, %c0_181], %262 {strides = array<i32>} : memref<2x4x8x8xbf16, #tpu.memory_space<vmem>>, vector<2x1x8x8xbf16>,
      %263 = vector.extract_strided_slice %258 {offsets = [0, 0, 8], sizes = [2, 8, 8], strides = [1, 1, 1]} : vector<2x8x32xbf16> to vector<2x8x8xbf16>
      %c0_182 = arith.constant 0 : index
      %c1_183 = arith.constant 1 : index
      %c0_184 = arith.constant 0 : index
      %c0_185 = arith.constant 0 : index
      %264 = vector.load %arg16[%c0_182, %c1_183, %c0_184, %c0_185] : memref<2x4x8x8xbf16, #tpu.memory_space<vmem>>, vector<2x1x8x8xbf16>
      %265 = vector.shape_cast %264 : vector<2x1x8x8xbf16> to vector<2x8x8xbf16>
      %266 = vector.shape_cast %263 : vector<2x8x8xbf16> to vector<2x1x8x8xbf16>
      tpu.vector_store %arg16[%c0_182, %c1_183, %c0_184, %c0_185], %266 {strides = array<i32>} : memref<2x4x8x8xbf16, #tpu.memory_space<vmem>>, vector<2x1x8x8xbf16>,
      %267 = vector.extract_strided_slice %258 {offsets = [0, 0, 16], sizes = [2, 8, 8], strides = [1, 1, 1]} : vector<2x8x32xbf16> to vector<2x8x8xbf16>
      %c0_186 = arith.constant 0 : index
      %c2_187 = arith.constant 2 : index
      %c0_188 = arith.constant 0 : index
      %c0_189 = arith.constant 0 : index
      %268 = vector.load %arg16[%c0_186, %c2_187, %c0_188, %c0_189] : memref<2x4x8x8xbf16, #tpu.memory_space<vmem>>, vector<2x1x8x8xbf16>
      %269 = vector.shape_cast %268 : vector<2x1x8x8xbf16> to vector<2x8x8xbf16>
      %270 = vector.shape_cast %267 : vector<2x8x8xbf16> to vector<2x1x8x8xbf16>
      tpu.vector_store %arg16[%c0_186, %c2_187, %c0_188, %c0_189], %270 {strides = array<i32>} : memref<2x4x8x8xbf16, #tpu.memory_space<vmem>>, vector<2x1x8x8xbf16>,
      %271 = vector.extract_strided_slice %258 {offsets = [0, 0, 24], sizes = [2, 8, 8], strides = [1, 1, 1]} : vector<2x8x32xbf16> to vector<2x8x8xbf16>
      %c0_190 = arith.constant 0 : index
      %c3_191 = arith.constant 3 : index
      %c0_192 = arith.constant 0 : index
      %c0_193 = arith.constant 0 : index
      %272 = vector.load %arg16[%c0_190, %c3_191, %c0_192, %c0_193] : memref<2x4x8x8xbf16, #tpu.memory_space<vmem>>, vector<2x1x8x8xbf16>
      %273 = vector.shape_cast %272 : vector<2x1x8x8xbf16> to vector<2x8x8xbf16>
      %274 = vector.shape_cast %271 : vector<2x8x8xbf16> to vector<2x1x8x8xbf16>
      tpu.vector_store %arg16[%c0_190, %c3_191, %c0_192, %c0_193], %274 {strides = array<i32>} : memref<2x4x8x8xbf16, #tpu.memory_space<vmem>>, vector<2x1x8x8xbf16>,
      %c0_194 = arith.constant 0 : index
      %c32 = arith.constant 32 : index
      %275 = vector.load %arg3[%c0_194, %c32] : memref<32x96xbf16, #tpu.memory_space<vmem>>, vector<32x32xbf16>
      %cst_195 = arith.constant dense<0.000000e+00> : vector<16x32xf32>
      %276 = tpu.matmul %251, %275, %cst_195 {dimension_numbers = #tpu.dot_dimension_numbers<[1], [0], [0], [1], [0, 0, 1, 1], [], []>} : vector<16x32xbf16>, vector<32x32xbf16>, vector<16x32xf32> -> vector<16x32xf32>
      %c0_196 = arith.constant 0 : index
      %c32_197 = arith.constant 32 : index
      %277 = vector.load %arg4[%c0_196, %c32_197] : memref<1x96xf32, #tpu.memory_space<vmem>>, vector<1x32xf32>
      %278 = vector.broadcast %277 : vector<1x32xf32> to vector<16x32xf32>
      %279 = arith.addf %276, %278 : vector<16x32xf32>
      %280 = arith.truncf %279 : vector<16x32xf32> to vector<16x32xbf16>
      %281 = vector.shape_cast %280 : vector<16x32xbf16> to vector<2x8x32xbf16>
      %282 = vector.extract_strided_slice %281 {offsets = [0, 0, 0], sizes = [2, 8, 8], strides = [1, 1, 1]} : vector<2x8x32xbf16> to vector<2x8x8xbf16>
      %c0_198 = arith.constant 0 : index
      %c0_199 = arith.constant 0 : index
      %c0_200 = arith.constant 0 : index
      %c0_201 = arith.constant 0 : index
      %283 = vector.load %arg17[%c0_198, %c0_199, %c0_200, %c0_201] : memref<2x4x8x8xbf16, #tpu.memory_space<vmem>>, vector<2x1x8x8xbf16>
      %284 = vector.shape_cast %283 : vector<2x1x8x8xbf16> to vector<2x8x8xbf16>
      %285 = vector.shape_cast %282 : vector<2x8x8xbf16> to vector<2x1x8x8xbf16>
      tpu.vector_store %arg17[%c0_198, %c0_199, %c0_200, %c0_201], %285 {strides = array<i32>} : memref<2x4x8x8xbf16, #tpu.memory_space<vmem>>, vector<2x1x8x8xbf16>,
      %286 = vector.extract_strided_slice %281 {offsets = [0, 0, 8], sizes = [2, 8, 8], strides = [1, 1, 1]} : vector<2x8x32xbf16> to vector<2x8x8xbf16>
      %c0_202 = arith.constant 0 : index
      %c1_203 = arith.constant 1 : index
      %c0_204 = arith.constant 0 : index
      %c0_205 = arith.constant 0 : index
      %287 = vector.load %arg17[%c0_202, %c1_203, %c0_204, %c0_205] : memref<2x4x8x8xbf16, #tpu.memory_space<vmem>>, vector<2x1x8x8xbf16>
      %288 = vector.shape_cast %287 : vector<2x1x8x8xbf16> to vector<2x8x8xbf16>
      %289 = vector.shape_cast %286 : vector<2x8x8xbf16> to vector<2x1x8x8xbf16>
      tpu.vector_store %arg17[%c0_202, %c1_203, %c0_204, %c0_205], %289 {strides = array<i32>} : memref<2x4x8x8xbf16, #tpu.memory_space<vmem>>, vector<2x1x8x8xbf16>,
      %290 = vector.extract_strided_slice %281 {offsets = [0, 0, 16], sizes = [2, 8, 8], strides = [1, 1, 1]} : vector<2x8x32xbf16> to vector<2x8x8xbf16>
      %c0_206 = arith.constant 0 : index
      %c2_207 = arith.constant 2 : index
      %c0_208 = arith.constant 0 : index
      %c0_209 = arith.constant 0 : index
      %291 = vector.load %arg17[%c0_206, %c2_207, %c0_208, %c0_209] : memref<2x4x8x8xbf16, #tpu.memory_space<vmem>>, vector<2x1x8x8xbf16>
      %292 = vector.shape_cast %291 : vector<2x1x8x8xbf16> to vector<2x8x8xbf16>
      %293 = vector.shape_cast %290 : vector<2x8x8xbf16> to vector<2x1x8x8xbf16>
      tpu.vector_store %arg17[%c0_206, %c2_207, %c0_208, %c0_209], %293 {strides = array<i32>} : memref<2x4x8x8xbf16, #tpu.memory_space<vmem>>, vector<2x1x8x8xbf16>,
      %294 = vector.extract_strided_slice %281 {offsets = [0, 0, 24], sizes = [2, 8, 8], strides = [1, 1, 1]} : vector<2x8x32xbf16> to vector<2x8x8xbf16>
      %c0_210 = arith.constant 0 : index
      %c3_211 = arith.constant 3 : index
      %c0_212 = arith.constant 0 : index
      %c0_213 = arith.constant 0 : index
      %295 = vector.load %arg17[%c0_210, %c3_211, %c0_212, %c0_213] : memref<2x4x8x8xbf16, #tpu.memory_space<vmem>>, vector<2x1x8x8xbf16>
      %296 = vector.shape_cast %295 : vector<2x1x8x8xbf16> to vector<2x8x8xbf16>
      %297 = vector.shape_cast %294 : vector<2x8x8xbf16> to vector<2x1x8x8xbf16>
      tpu.vector_store %arg17[%c0_210, %c3_211, %c0_212, %c0_213], %297 {strides = array<i32>} : memref<2x4x8x8xbf16, #tpu.memory_space<vmem>>, vector<2x1x8x8xbf16>,
      %c0_214 = arith.constant 0 : index
      %c64 = arith.constant 64 : index
      %298 = vector.load %arg3[%c0_214, %c64] : memref<32x96xbf16, #tpu.memory_space<vmem>>, vector<32x32xbf16>
      %cst_215 = arith.constant dense<0.000000e+00> : vector<16x32xf32>
      %299 = tpu.matmul %251, %298, %cst_215 {dimension_numbers = #tpu.dot_dimension_numbers<[1], [0], [0], [1], [0, 0, 1, 1], [], []>} : vector<16x32xbf16>, vector<32x32xbf16>, vector<16x32xf32> -> vector<16x32xf32>
      %c0_216 = arith.constant 0 : index
      %c64_217 = arith.constant 64 : index
      %300 = vector.load %arg4[%c0_216, %c64_217] : memref<1x96xf32, #tpu.memory_space<vmem>>, vector<1x32xf32>
      %301 = vector.broadcast %300 : vector<1x32xf32> to vector<16x32xf32>
      %302 = arith.addf %299, %301 : vector<16x32xf32>
      %303 = arith.truncf %302 : vector<16x32xf32> to vector<16x32xbf16>
      %304 = vector.shape_cast %303 : vector<16x32xbf16> to vector<2x8x32xbf16>
      %305 = vector.extract_strided_slice %304 {offsets = [0, 0, 0], sizes = [2, 8, 8], strides = [1, 1, 1]} : vector<2x8x32xbf16> to vector<2x8x8xbf16>
      %c0_218 = arith.constant 0 : index
      %c0_219 = arith.constant 0 : index
      %c0_220 = arith.constant 0 : index
      %c0_221 = arith.constant 0 : index
      %306 = vector.load %arg18[%c0_218, %c0_219, %c0_220, %c0_221] : memref<2x4x8x8xbf16, #tpu.memory_space<vmem>>, vector<2x1x8x8xbf16>
      %307 = vector.shape_cast %306 : vector<2x1x8x8xbf16> to vector<2x8x8xbf16>
      %308 = vector.shape_cast %305 : vector<2x8x8xbf16> to vector<2x1x8x8xbf16>
      tpu.vector_store %arg18[%c0_218, %c0_219, %c0_220, %c0_221], %308 {strides = array<i32>} : memref<2x4x8x8xbf16, #tpu.memory_space<vmem>>, vector<2x1x8x8xbf16>,
      %309 = vector.extract_strided_slice %304 {offsets = [0, 0, 8], sizes = [2, 8, 8], strides = [1, 1, 1]} : vector<2x8x32xbf16> to vector<2x8x8xbf16>
      %c0_222 = arith.constant 0 : index
      %c1_223 = arith.constant 1 : index
      %c0_224 = arith.constant 0 : index
      %c0_225 = arith.constant 0 : index
      %310 = vector.load %arg18[%c0_222, %c1_223, %c0_224, %c0_225] : memref<2x4x8x8xbf16, #tpu.memory_space<vmem>>, vector<2x1x8x8xbf16>
      %311 = vector.shape_cast %310 : vector<2x1x8x8xbf16> to vector<2x8x8xbf16>
      %312 = vector.shape_cast %309 : vector<2x8x8xbf16> to vector<2x1x8x8xbf16>
      tpu.vector_store %arg18[%c0_222, %c1_223, %c0_224, %c0_225], %312 {strides = array<i32>} : memref<2x4x8x8xbf16, #tpu.memory_space<vmem>>, vector<2x1x8x8xbf16>,
      %313 = vector.extract_strided_slice %304 {offsets = [0, 0, 16], sizes = [2, 8, 8], strides = [1, 1, 1]} : vector<2x8x32xbf16> to vector<2x8x8xbf16>
      %c0_226 = arith.constant 0 : index
      %c2_227 = arith.constant 2 : index
      %c0_228 = arith.constant 0 : index
      %c0_229 = arith.constant 0 : index
      %314 = vector.load %arg18[%c0_226, %c2_227, %c0_228, %c0_229] : memref<2x4x8x8xbf16, #tpu.memory_space<vmem>>, vector<2x1x8x8xbf16>
      %315 = vector.shape_cast %314 : vector<2x1x8x8xbf16> to vector<2x8x8xbf16>
      %316 = vector.shape_cast %313 : vector<2x8x8xbf16> to vector<2x1x8x8xbf16>
      tpu.vector_store %arg18[%c0_226, %c2_227, %c0_228, %c0_229], %316 {strides = array<i32>} : memref<2x4x8x8xbf16, #tpu.memory_space<vmem>>, vector<2x1x8x8xbf16>,
      %317 = vector.extract_strided_slice %304 {offsets = [0, 0, 24], sizes = [2, 8, 8], strides = [1, 1, 1]} : vector<2x8x32xbf16> to vector<2x8x8xbf16>
      %c0_230 = arith.constant 0 : index
      %c3_231 = arith.constant 3 : index
      %c0_232 = arith.constant 0 : index
      %c0_233 = arith.constant 0 : index
      %318 = vector.load %arg18[%c0_230, %c3_231, %c0_232, %c0_233] : memref<2x4x8x8xbf16, #tpu.memory_space<vmem>>, vector<2x1x8x8xbf16>
      %319 = vector.shape_cast %318 : vector<2x1x8x8xbf16> to vector<2x8x8xbf16>
      %320 = vector.shape_cast %317 : vector<2x8x8xbf16> to vector<2x1x8x8xbf16>
      tpu.vector_store %arg18[%c0_230, %c3_231, %c0_232, %c0_233], %320 {strides = array<i32>} : memref<2x4x8x8xbf16, #tpu.memory_space<vmem>>, vector<2x1x8x8xbf16>,
    } else {
    }
    %c8_i32 = arith.constant 8 : i32
    %3 = arith.muli %arg1, %c8_i32 : i32
    %4 = tpu.assume_multiple %3, 8 : i32
    %c0 = arith.constant 0 : index
    %c0_1 = arith.constant 0 : index
    %5 = arith.index_cast %4 : i32 to index
    %c0_2 = arith.constant 0 : index
    %6 = vector.load %arg16[%c0, %c0_1, %5, %c0_2] : memref<2x4x8x8xbf16, #tpu.memory_space<vmem>>, vector<1x1x8x8xbf16>
    %7 = vector.shape_cast %6 : vector<1x1x8x8xbf16> to vector<8x8xbf16>
    %c0_3 = arith.constant 0 : index
    %c0_4 = arith.constant 0 : index
    %c0_5 = arith.constant 0 : index
    %c0_6 = arith.constant 0 : index
    %8 = vector.load %arg17[%c0_3, %c0_4, %c0_5, %c0_6] : memref<2x4x8x8xbf16, #tpu.memory_space<vmem>>, vector<1x1x8x8xbf16>
    %9 = vector.shape_cast %8 : vector<1x1x8x8xbf16> to vector<8x8xbf16>
    %c0_7 = arith.constant 0 : index
    %c0_8 = arith.constant 0 : index
    %c0_9 = arith.constant 0 : index
    %c0_10 = arith.constant 0 : index
    %10 = vector.load %arg18[%c0_7, %c0_8, %c0_9, %c0_10] : memref<2x4x8x8xbf16, #tpu.memory_space<vmem>>, vector<1x1x8x8xbf16>
    %11 = vector.shape_cast %10 : vector<1x1x8x8xbf16> to vector<8x8xbf16>
    %cst = arith.constant dense<0.000000e+00> : vector<8x8xf32>
    %12 = tpu.matmul %7, %9, %cst {dimension_numbers = #tpu.dot_dimension_numbers<[1], [1], [0], [0], [0, 0, 1, 0], [], []>} : vector<8x8xbf16>, vector<8x8xbf16>, vector<8x8xf32> -> vector<8x8xf32>
    %cst_11 = arith.constant dense<0xFF800000> : vector<8xf32>
    %13 = vector.multi_reduction <maximumf>, %12, %cst_11 [1] : vector<8x8xf32> to vector<8xf32>
    %14 = vector.shape_cast %13 : vector<8xf32> to vector<8x1xf32>
    %15 = vector.broadcast %14 : vector<8x1xf32> to vector<8x8xf32>
    %16 = arith.subf %12, %15 : vector<8x8xf32>
    %17 = math.exp %16 : vector<8x8xf32>
    %cst_12 = arith.constant dense<0.000000e+00> : vector<8xf32>
    %18 = vector.multi_reduction <add>, %17, %cst_12 [1] : vector<8x8xf32> to vector<8xf32>
    %19 = vector.shape_cast %18 : vector<8xf32> to vector<8x1xf32>
    %20 = arith.truncf %17 : vector<8x8xf32> to vector<8x8xbf16>
    %cst_13 = arith.constant dense<0.000000e+00> : vector<8x8xf32>
    %21 = tpu.matmul %20, %11, %cst_13 {dimension_numbers = #tpu.dot_dimension_numbers<[1], [0], [0], [1], [0, 0, 1, 1], [], []>} : vector<8x8xbf16>, vector<8x8xbf16>, vector<8x8xf32> -> vector<8x8xf32>
    %22 = tpu.reciprocal %19 {approx = true} : vector<8x1xf32> -> vector<8x1xf32>
    %23 = vector.broadcast %22 : vector<8x1xf32> to vector<8x8xf32>
    %24 = arith.mulf %21, %23 : vector<8x8xf32>
    %c0_14 = arith.constant 0 : index
    %c0_15 = arith.constant 0 : index
    %25 = vector.load %arg19[%c0_14, %c0_15] : memref<16x32xf32, #tpu.memory_space<vmem>>, vector<8x8xf32>
    tpu.vector_store %arg19[%c0_14, %c0_15], %24 {strides = array<i32>} : memref<16x32xf32, #tpu.memory_space<vmem>>, vector<8x8xf32>,
    %c0_16 = arith.constant 0 : index
    %c1 = arith.constant 1 : index
    %26 = arith.index_cast %4 : i32 to index
    %c0_17 = arith.constant 0 : index
    %27 = vector.load %arg16[%c0_16, %c1, %26, %c0_17] : memref<2x4x8x8xbf16, #tpu.memory_space<vmem>>, vector<1x1x8x8xbf16>
    %28 = vector.shape_cast %27 : vector<1x1x8x8xbf16> to vector<8x8xbf16>
    %c0_18 = arith.constant 0 : index
    %c1_19 = arith.constant 1 : index
    %c0_20 = arith.constant 0 : index
    %c0_21 = arith.constant 0 : index
    %29 = vector.load %arg17[%c0_18, %c1_19, %c0_20, %c0_21] : memref<2x4x8x8xbf16, #tpu.memory_space<vmem>>, vector<1x1x8x8xbf16>
    %30 = vector.shape_cast %29 : vector<1x1x8x8xbf16> to vector<8x8xbf16>
    %c0_22 = arith.constant 0 : index
    %c1_23 = arith.constant 1 : index
    %c0_24 = arith.constant 0 : index
    %c0_25 = arith.constant 0 : index
    %31 = vector.load %arg18[%c0_22, %c1_23, %c0_24, %c0_25] : memref<2x4x8x8xbf16, #tpu.memory_space<vmem>>, vector<1x1x8x8xbf16>
    %32 = vector.shape_cast %31 : vector<1x1x8x8xbf16> to vector<8x8xbf16>
    %cst_26 = arith.constant dense<0.000000e+00> : vector<8x8xf32>
    %33 = tpu.matmul %28, %30, %cst_26 {dimension_numbers = #tpu.dot_dimension_numbers<[1], [1], [0], [0], [0, 0, 1, 0], [], []>} : vector<8x8xbf16>, vector<8x8xbf16>, vector<8x8xf32> -> vector<8x8xf32>
    %cst_27 = arith.constant dense<0xFF800000> : vector<8xf32>
    %34 = vector.multi_reduction <maximumf>, %33, %cst_27 [1] : vector<8x8xf32> to vector<8xf32>
    %35 = vector.shape_cast %34 : vector<8xf32> to vector<8x1xf32>
    %36 = vector.broadcast %35 : vector<8x1xf32> to vector<8x8xf32>
    %37 = arith.subf %33, %36 : vector<8x8xf32>
    %38 = math.exp %37 : vector<8x8xf32>
    %cst_28 = arith.constant dense<0.000000e+00> : vector<8xf32>
    %39 = vector.multi_reduction <add>, %38, %cst_28 [1] : vector<8x8xf32> to vector<8xf32>
    %40 = vector.shape_cast %39 : vector<8xf32> to vector<8x1xf32>
    %41 = arith.truncf %38 : vector<8x8xf32> to vector<8x8xbf16>
    %cst_29 = arith.constant dense<0.000000e+00> : vector<8x8xf32>
    %42 = tpu.matmul %41, %32, %cst_29 {dimension_numbers = #tpu.dot_dimension_numbers<[1], [0], [0], [1], [0, 0, 1, 1], [], []>} : vector<8x8xbf16>, vector<8x8xbf16>, vector<8x8xf32> -> vector<8x8xf32>
    %43 = tpu.reciprocal %40 {approx = true} : vector<8x1xf32> -> vector<8x1xf32>
    %44 = vector.broadcast %43 : vector<8x1xf32> to vector<8x8xf32>
    %45 = arith.mulf %42, %44 : vector<8x8xf32>
    %c0_30 = arith.constant 0 : index
    %c8 = arith.constant 8 : index
    %46 = vector.load %arg19[%c0_30, %c8] : memref<16x32xf32, #tpu.memory_space<vmem>>, vector<8x8xf32>
    tpu.vector_store %arg19[%c0_30, %c8], %45 {strides = array<i32>} : memref<16x32xf32, #tpu.memory_space<vmem>>, vector<8x8xf32>,
    %c0_31 = arith.constant 0 : index
    %c2 = arith.constant 2 : index
    %47 = arith.index_cast %4 : i32 to index
    %c0_32 = arith.constant 0 : index
    %48 = vector.load %arg16[%c0_31, %c2, %47, %c0_32] : memref<2x4x8x8xbf16, #tpu.memory_space<vmem>>, vector<1x1x8x8xbf16>
    %49 = vector.shape_cast %48 : vector<1x1x8x8xbf16> to vector<8x8xbf16>
    %c0_33 = arith.constant 0 : index
    %c2_34 = arith.constant 2 : index
    %c0_35 = arith.constant 0 : index
    %c0_36 = arith.constant 0 : index
    %50 = vector.load %arg17[%c0_33, %c2_34, %c0_35, %c0_36] : memref<2x4x8x8xbf16, #tpu.memory_space<vmem>>, vector<1x1x8x8xbf16>
    %51 = vector.shape_cast %50 : vector<1x1x8x8xbf16> to vector<8x8xbf16>
    %c0_37 = arith.constant 0 : index
    %c2_38 = arith.constant 2 : index
    %c0_39 = arith.constant 0 : index
    %c0_40 = arith.constant 0 : index
    %52 = vector.load %arg18[%c0_37, %c2_38, %c0_39, %c0_40] : memref<2x4x8x8xbf16, #tpu.memory_space<vmem>>, vector<1x1x8x8xbf16>
    %53 = vector.shape_cast %52 : vector<1x1x8x8xbf16> to vector<8x8xbf16>
    %cst_41 = arith.constant dense<0.000000e+00> : vector<8x8xf32>
    %54 = tpu.matmul %49, %51, %cst_41 {dimension_numbers = #tpu.dot_dimension_numbers<[1], [1], [0], [0], [0, 0, 1, 0], [], []>} : vector<8x8xbf16>, vector<8x8xbf16>, vector<8x8xf32> -> vector<8x8xf32>
    %cst_42 = arith.constant dense<0xFF800000> : vector<8xf32>
    %55 = vector.multi_reduction <maximumf>, %54, %cst_42 [1] : vector<8x8xf32> to vector<8xf32>
    %56 = vector.shape_cast %55 : vector<8xf32> to vector<8x1xf32>
    %57 = vector.broadcast %56 : vector<8x1xf32> to vector<8x8xf32>
    %58 = arith.subf %54, %57 : vector<8x8xf32>
    %59 = math.exp %58 : vector<8x8xf32>
    %cst_43 = arith.constant dense<0.000000e+00> : vector<8xf32>
    %60 = vector.multi_reduction <add>, %59, %cst_43 [1] : vector<8x8xf32> to vector<8xf32>
    %61 = vector.shape_cast %60 : vector<8xf32> to vector<8x1xf32>
    %62 = arith.truncf %59 : vector<8x8xf32> to vector<8x8xbf16>
    %cst_44 = arith.constant dense<0.000000e+00> : vector<8x8xf32>
    %63 = tpu.matmul %62, %53, %cst_44 {dimension_numbers = #tpu.dot_dimension_numbers<[1], [0], [0], [1], [0, 0, 1, 1], [], []>} : vector<8x8xbf16>, vector<8x8xbf16>, vector<8x8xf32> -> vector<8x8xf32>
    %64 = tpu.reciprocal %61 {approx = true} : vector<8x1xf32> -> vector<8x1xf32>
    %65 = vector.broadcast %64 : vector<8x1xf32> to vector<8x8xf32>
    %66 = arith.mulf %63, %65 : vector<8x8xf32>
    %c0_45 = arith.constant 0 : index
    %c16 = arith.constant 16 : index
    %67 = vector.load %arg19[%c0_45, %c16] : memref<16x32xf32, #tpu.memory_space<vmem>>, vector<8x8xf32>
    tpu.vector_store %arg19[%c0_45, %c16], %66 {strides = array<i32>} : memref<16x32xf32, #tpu.memory_space<vmem>>, vector<8x8xf32>,
    %c0_46 = arith.constant 0 : index
    %c3 = arith.constant 3 : index
    %68 = arith.index_cast %4 : i32 to index
    %c0_47 = arith.constant 0 : index
    %69 = vector.load %arg16[%c0_46, %c3, %68, %c0_47] : memref<2x4x8x8xbf16, #tpu.memory_space<vmem>>, vector<1x1x8x8xbf16>
    %70 = vector.shape_cast %69 : vector<1x1x8x8xbf16> to vector<8x8xbf16>
    %c0_48 = arith.constant 0 : index
    %c3_49 = arith.constant 3 : index
    %c0_50 = arith.constant 0 : index
    %c0_51 = arith.constant 0 : index
    %71 = vector.load %arg17[%c0_48, %c3_49, %c0_50, %c0_51] : memref<2x4x8x8xbf16, #tpu.memory_space<vmem>>, vector<1x1x8x8xbf16>
    %72 = vector.shape_cast %71 : vector<1x1x8x8xbf16> to vector<8x8xbf16>
    %c0_52 = arith.constant 0 : index
    %c3_53 = arith.constant 3 : index
    %c0_54 = arith.constant 0 : index
    %c0_55 = arith.constant 0 : index
    %73 = vector.load %arg18[%c0_52, %c3_53, %c0_54, %c0_55] : memref<2x4x8x8xbf16, #tpu.memory_space<vmem>>, vector<1x1x8x8xbf16>
    %74 = vector.shape_cast %73 : vector<1x1x8x8xbf16> to vector<8x8xbf16>
    %cst_56 = arith.constant dense<0.000000e+00> : vector<8x8xf32>
    %75 = tpu.matmul %70, %72, %cst_56 {dimension_numbers = #tpu.dot_dimension_numbers<[1], [1], [0], [0], [0, 0, 1, 0], [], []>} : vector<8x8xbf16>, vector<8x8xbf16>, vector<8x8xf32> -> vector<8x8xf32>
    %cst_57 = arith.constant dense<0xFF800000> : vector<8xf32>
    %76 = vector.multi_reduction <maximumf>, %75, %cst_57 [1] : vector<8x8xf32> to vector<8xf32>
    %77 = vector.shape_cast %76 : vector<8xf32> to vector<8x1xf32>
    %78 = vector.broadcast %77 : vector<8x1xf32> to vector<8x8xf32>
    %79 = arith.subf %75, %78 : vector<8x8xf32>
    %80 = math.exp %79 : vector<8x8xf32>
    %cst_58 = arith.constant dense<0.000000e+00> : vector<8xf32>
    %81 = vector.multi_reduction <add>, %80, %cst_58 [1] : vector<8x8xf32> to vector<8xf32>
    %82 = vector.shape_cast %81 : vector<8xf32> to vector<8x1xf32>
    %83 = arith.truncf %80 : vector<8x8xf32> to vector<8x8xbf16>
    %cst_59 = arith.constant dense<0.000000e+00> : vector<8x8xf32>
    %84 = tpu.matmul %83, %74, %cst_59 {dimension_numbers = #tpu.dot_dimension_numbers<[1], [0], [0], [1], [0, 0, 1, 1], [], []>} : vector<8x8xbf16>, vector<8x8xbf16>, vector<8x8xf32> -> vector<8x8xf32>
    %85 = tpu.reciprocal %82 {approx = true} : vector<8x1xf32> -> vector<8x1xf32>
    %86 = vector.broadcast %85 : vector<8x1xf32> to vector<8x8xf32>
    %87 = arith.mulf %84, %86 : vector<8x8xf32>
    %c0_60 = arith.constant 0 : index
    %c24 = arith.constant 24 : index
    %88 = vector.load %arg19[%c0_60, %c24] : memref<16x32xf32, #tpu.memory_space<vmem>>, vector<8x8xf32>
    tpu.vector_store %arg19[%c0_60, %c24], %87 {strides = array<i32>} : memref<16x32xf32, #tpu.memory_space<vmem>>, vector<8x8xf32>,
    %c1_61 = arith.constant 1 : index
    %c0_62 = arith.constant 0 : index
    %89 = arith.index_cast %4 : i32 to index
    %c0_63 = arith.constant 0 : index
    %90 = vector.load %arg16[%c1_61, %c0_62, %89, %c0_63] : memref<2x4x8x8xbf16, #tpu.memory_space<vmem>>, vector<1x1x8x8xbf16>
    %91 = vector.shape_cast %90 : vector<1x1x8x8xbf16> to vector<8x8xbf16>
    %c1_64 = arith.constant 1 : index
    %c0_65 = arith.constant 0 : index
    %c0_66 = arith.constant 0 : index
    %c0_67 = arith.constant 0 : index
    %92 = vector.load %arg17[%c1_64, %c0_65, %c0_66, %c0_67] : memref<2x4x8x8xbf16, #tpu.memory_space<vmem>>, vector<1x1x8x8xbf16>
    %93 = vector.shape_cast %92 : vector<1x1x8x8xbf16> to vector<8x8xbf16>
    %c1_68 = arith.constant 1 : index
    %c0_69 = arith.constant 0 : index
    %c0_70 = arith.constant 0 : index
    %c0_71 = arith.constant 0 : index
    %94 = vector.load %arg18[%c1_68, %c0_69, %c0_70, %c0_71] : memref<2x4x8x8xbf16, #tpu.memory_space<vmem>>, vector<1x1x8x8xbf16>
    %95 = vector.shape_cast %94 : vector<1x1x8x8xbf16> to vector<8x8xbf16>
    %cst_72 = arith.constant dense<0.000000e+00> : vector<8x8xf32>
    %96 = tpu.matmul %91, %93, %cst_72 {dimension_numbers = #tpu.dot_dimension_numbers<[1], [1], [0], [0], [0, 0, 1, 0], [], []>} : vector<8x8xbf16>, vector<8x8xbf16>, vector<8x8xf32> -> vector<8x8xf32>
    %cst_73 = arith.constant dense<0xFF800000> : vector<8xf32>
    %97 = vector.multi_reduction <maximumf>, %96, %cst_73 [1] : vector<8x8xf32> to vector<8xf32>
    %98 = vector.shape_cast %97 : vector<8xf32> to vector<8x1xf32>
    %99 = vector.broadcast %98 : vector<8x1xf32> to vector<8x8xf32>
    %100 = arith.subf %96, %99 : vector<8x8xf32>
    %101 = math.exp %100 : vector<8x8xf32>
    %cst_74 = arith.constant dense<0.000000e+00> : vector<8xf32>
    %102 = vector.multi_reduction <add>, %101, %cst_74 [1] : vector<8x8xf32> to vector<8xf32>
    %103 = vector.shape_cast %102 : vector<8xf32> to vector<8x1xf32>
    %104 = arith.truncf %101 : vector<8x8xf32> to vector<8x8xbf16>
    %cst_75 = arith.constant dense<0.000000e+00> : vector<8x8xf32>
    %105 = tpu.matmul %104, %95, %cst_75 {dimension_numbers = #tpu.dot_dimension_numbers<[1], [0], [0], [1], [0, 0, 1, 1], [], []>} : vector<8x8xbf16>, vector<8x8xbf16>, vector<8x8xf32> -> vector<8x8xf32>
    %106 = tpu.reciprocal %103 {approx = true} : vector<8x1xf32> -> vector<8x1xf32>
    %107 = vector.broadcast %106 : vector<8x1xf32> to vector<8x8xf32>
    %108 = arith.mulf %105, %107 : vector<8x8xf32>
    %c8_76 = arith.constant 8 : index
    %c0_77 = arith.constant 0 : index
    %109 = vector.load %arg19[%c8_76, %c0_77] : memref<16x32xf32, #tpu.memory_space<vmem>>, vector<8x8xf32>
    tpu.vector_store %arg19[%c8_76, %c0_77], %108 {strides = array<i32>} : memref<16x32xf32, #tpu.memory_space<vmem>>, vector<8x8xf32>,
    %c1_78 = arith.constant 1 : index
    %c1_79 = arith.constant 1 : index
    %110 = arith.index_cast %4 : i32 to index
    %c0_80 = arith.constant 0 : index
    %111 = vector.load %arg16[%c1_78, %c1_79, %110, %c0_80] : memref<2x4x8x8xbf16, #tpu.memory_space<vmem>>, vector<1x1x8x8xbf16>
    %112 = vector.shape_cast %111 : vector<1x1x8x8xbf16> to vector<8x8xbf16>
    %c1_81 = arith.constant 1 : index
    %c1_82 = arith.constant 1 : index
    %c0_83 = arith.constant 0 : index
    %c0_84 = arith.constant 0 : index
    %113 = vector.load %arg17[%c1_81, %c1_82, %c0_83, %c0_84] : memref<2x4x8x8xbf16, #tpu.memory_space<vmem>>, vector<1x1x8x8xbf16>
    %114 = vector.shape_cast %113 : vector<1x1x8x8xbf16> to vector<8x8xbf16>
    %c1_85 = arith.constant 1 : index
    %c1_86 = arith.constant 1 : index
    %c0_87 = arith.constant 0 : index
    %c0_88 = arith.constant 0 : index
    %115 = vector.load %arg18[%c1_85, %c1_86, %c0_87, %c0_88] : memref<2x4x8x8xbf16, #tpu.memory_space<vmem>>, vector<1x1x8x8xbf16>
    %116 = vector.shape_cast %115 : vector<1x1x8x8xbf16> to vector<8x8xbf16>
    %cst_89 = arith.constant dense<0.000000e+00> : vector<8x8xf32>
    %117 = tpu.matmul %112, %114, %cst_89 {dimension_numbers = #tpu.dot_dimension_numbers<[1], [1], [0], [0], [0, 0, 1, 0], [], []>} : vector<8x8xbf16>, vector<8x8xbf16>, vector<8x8xf32> -> vector<8x8xf32>
    %cst_90 = arith.constant dense<0xFF800000> : vector<8xf32>
    %118 = vector.multi_reduction <maximumf>, %117, %cst_90 [1] : vector<8x8xf32> to vector<8xf32>
    %119 = vector.shape_cast %118 : vector<8xf32> to vector<8x1xf32>
    %120 = vector.broadcast %119 : vector<8x1xf32> to vector<8x8xf32>
    %121 = arith.subf %117, %120 : vector<8x8xf32>
    %122 = math.exp %121 : vector<8x8xf32>
    %cst_91 = arith.constant dense<0.000000e+00> : vector<8xf32>
    %123 = vector.multi_reduction <add>, %122, %cst_91 [1] : vector<8x8xf32> to vector<8xf32>
    %124 = vector.shape_cast %123 : vector<8xf32> to vector<8x1xf32>
    %125 = arith.truncf %122 : vector<8x8xf32> to vector<8x8xbf16>
    %cst_92 = arith.constant dense<0.000000e+00> : vector<8x8xf32>
    %126 = tpu.matmul %125, %116, %cst_92 {dimension_numbers = #tpu.dot_dimension_numbers<[1], [0], [0], [1], [0, 0, 1, 1], [], []>} : vector<8x8xbf16>, vector<8x8xbf16>, vector<8x8xf32> -> vector<8x8xf32>
    %127 = tpu.reciprocal %124 {approx = true} : vector<8x1xf32> -> vector<8x1xf32>
    %128 = vector.broadcast %127 : vector<8x1xf32> to vector<8x8xf32>
    %129 = arith.mulf %126, %128 : vector<8x8xf32>
    %c8_93 = arith.constant 8 : index
    %c8_94 = arith.constant 8 : index
    %130 = vector.load %arg19[%c8_93, %c8_94] : memref<16x32xf32, #tpu.memory_space<vmem>>, vector<8x8xf32>
    tpu.vector_store %arg19[%c8_93, %c8_94], %129 {strides = array<i32>} : memref<16x32xf32, #tpu.memory_space<vmem>>, vector<8x8xf32>,
    %c1_95 = arith.constant 1 : index
    %c2_96 = arith.constant 2 : index
    %131 = arith.index_cast %4 : i32 to index
    %c0_97 = arith.constant 0 : index
    %132 = vector.load %arg16[%c1_95, %c2_96, %131, %c0_97] : memref<2x4x8x8xbf16, #tpu.memory_space<vmem>>, vector<1x1x8x8xbf16>
    %133 = vector.shape_cast %132 : vector<1x1x8x8xbf16> to vector<8x8xbf16>
    %c1_98 = arith.constant 1 : index
    %c2_99 = arith.constant 2 : index
    %c0_100 = arith.constant 0 : index
    %c0_101 = arith.constant 0 : index
    %134 = vector.load %arg17[%c1_98, %c2_99, %c0_100, %c0_101] : memref<2x4x8x8xbf16, #tpu.memory_space<vmem>>, vector<1x1x8x8xbf16>
    %135 = vector.shape_cast %134 : vector<1x1x8x8xbf16> to vector<8x8xbf16>
    %c1_102 = arith.constant 1 : index
    %c2_103 = arith.constant 2 : index
    %c0_104 = arith.constant 0 : index
    %c0_105 = arith.constant 0 : index
    %136 = vector.load %arg18[%c1_102, %c2_103, %c0_104, %c0_105] : memref<2x4x8x8xbf16, #tpu.memory_space<vmem>>, vector<1x1x8x8xbf16>
    %137 = vector.shape_cast %136 : vector<1x1x8x8xbf16> to vector<8x8xbf16>
    %cst_106 = arith.constant dense<0.000000e+00> : vector<8x8xf32>
    %138 = tpu.matmul %133, %135, %cst_106 {dimension_numbers = #tpu.dot_dimension_numbers<[1], [1], [0], [0], [0, 0, 1, 0], [], []>} : vector<8x8xbf16>, vector<8x8xbf16>, vector<8x8xf32> -> vector<8x8xf32>
    %cst_107 = arith.constant dense<0xFF800000> : vector<8xf32>
    %139 = vector.multi_reduction <maximumf>, %138, %cst_107 [1] : vector<8x8xf32> to vector<8xf32>
    %140 = vector.shape_cast %139 : vector<8xf32> to vector<8x1xf32>
    %141 = vector.broadcast %140 : vector<8x1xf32> to vector<8x8xf32>
    %142 = arith.subf %138, %141 : vector<8x8xf32>
    %143 = math.exp %142 : vector<8x8xf32>
    %cst_108 = arith.constant dense<0.000000e+00> : vector<8xf32>
    %144 = vector.multi_reduction <add>, %143, %cst_108 [1] : vector<8x8xf32> to vector<8xf32>
    %145 = vector.shape_cast %144 : vector<8xf32> to vector<8x1xf32>
    %146 = arith.truncf %143 : vector<8x8xf32> to vector<8x8xbf16>
    %cst_109 = arith.constant dense<0.000000e+00> : vector<8x8xf32>
    %147 = tpu.matmul %146, %137, %cst_109 {dimension_numbers = #tpu.dot_dimension_numbers<[1], [0], [0], [1], [0, 0, 1, 1], [], []>} : vector<8x8xbf16>, vector<8x8xbf16>, vector<8x8xf32> -> vector<8x8xf32>
    %148 = tpu.reciprocal %145 {approx = true} : vector<8x1xf32> -> vector<8x1xf32>
    %149 = vector.broadcast %148 : vector<8x1xf32> to vector<8x8xf32>
    %150 = arith.mulf %147, %149 : vector<8x8xf32>
    %c8_110 = arith.constant 8 : index
    %c16_111 = arith.constant 16 : index
    %151 = vector.load %arg19[%c8_110, %c16_111] : memref<16x32xf32, #tpu.memory_space<vmem>>, vector<8x8xf32>
    tpu.vector_store %arg19[%c8_110, %c16_111], %150 {strides = array<i32>} : memref<16x32xf32, #tpu.memory_space<vmem>>, vector<8x8xf32>,
    %c1_112 = arith.constant 1 : index
    %c3_113 = arith.constant 3 : index
    %152 = arith.index_cast %4 : i32 to index
    %c0_114 = arith.constant 0 : index
    %153 = vector.load %arg16[%c1_112, %c3_113, %152, %c0_114] : memref<2x4x8x8xbf16, #tpu.memory_space<vmem>>, vector<1x1x8x8xbf16>
    %154 = vector.shape_cast %153 : vector<1x1x8x8xbf16> to vector<8x8xbf16>
    %c1_115 = arith.constant 1 : index
    %c3_116 = arith.constant 3 : index
    %c0_117 = arith.constant 0 : index
    %c0_118 = arith.constant 0 : index
    %155 = vector.load %arg17[%c1_115, %c3_116, %c0_117, %c0_118] : memref<2x4x8x8xbf16, #tpu.memory_space<vmem>>, vector<1x1x8x8xbf16>
    %156 = vector.shape_cast %155 : vector<1x1x8x8xbf16> to vector<8x8xbf16>
    %c1_119 = arith.constant 1 : index
    %c3_120 = arith.constant 3 : index
    %c0_121 = arith.constant 0 : index
    %c0_122 = arith.constant 0 : index
    %157 = vector.load %arg18[%c1_119, %c3_120, %c0_121, %c0_122] : memref<2x4x8x8xbf16, #tpu.memory_space<vmem>>, vector<1x1x8x8xbf16>
    %158 = vector.shape_cast %157 : vector<1x1x8x8xbf16> to vector<8x8xbf16>
    %cst_123 = arith.constant dense<0.000000e+00> : vector<8x8xf32>
    %159 = tpu.matmul %154, %156, %cst_123 {dimension_numbers = #tpu.dot_dimension_numbers<[1], [1], [0], [0], [0, 0, 1, 0], [], []>} : vector<8x8xbf16>, vector<8x8xbf16>, vector<8x8xf32> -> vector<8x8xf32>
    %cst_124 = arith.constant dense<0xFF800000> : vector<8xf32>
    %160 = vector.multi_reduction <maximumf>, %159, %cst_124 [1] : vector<8x8xf32> to vector<8xf32>
    %161 = vector.shape_cast %160 : vector<8xf32> to vector<8x1xf32>
    %162 = vector.broadcast %161 : vector<8x1xf32> to vector<8x8xf32>
    %163 = arith.subf %159, %162 : vector<8x8xf32>
    %164 = math.exp %163 : vector<8x8xf32>
    %cst_125 = arith.constant dense<0.000000e+00> : vector<8xf32>
    %165 = vector.multi_reduction <add>, %164, %cst_125 [1] : vector<8x8xf32> to vector<8xf32>
    %166 = vector.shape_cast %165 : vector<8xf32> to vector<8x1xf32>
    %167 = arith.truncf %164 : vector<8x8xf32> to vector<8x8xbf16>
    %cst_126 = arith.constant dense<0.000000e+00> : vector<8x8xf32>
    %168 = tpu.matmul %167, %158, %cst_126 {dimension_numbers = #tpu.dot_dimension_numbers<[1], [0], [0], [1], [0, 0, 1, 1], [], []>} : vector<8x8xbf16>, vector<8x8xbf16>, vector<8x8xf32> -> vector<8x8xf32>
    %169 = tpu.reciprocal %166 {approx = true} : vector<8x1xf32> -> vector<8x1xf32>
    %170 = vector.broadcast %169 : vector<8x1xf32> to vector<8x8xf32>
    %171 = arith.mulf %168, %170 : vector<8x8xf32>
    %c8_127 = arith.constant 8 : index
    %c24_128 = arith.constant 24 : index
    %172 = vector.load %arg19[%c8_127, %c24_128] : memref<16x32xf32, #tpu.memory_space<vmem>>, vector<8x8xf32>
    tpu.vector_store %arg19[%c8_127, %c24_128], %171 {strides = array<i32>} : memref<16x32xf32, #tpu.memory_space<vmem>>, vector<8x8xf32>,
    %c0_129 = arith.constant 0 : index
    %173 = arith.index_cast %4 : i32 to index
    %c0_130 = arith.constant 0 : index
    %174 = vector.load %arg2[%c0_129, %173, %c0_130] : memref<2x8x32xf32, #tpu.memory_space<vmem>>, vector<2x8x32xf32>
    %175 = vector.shape_cast %174 : vector<2x8x32xf32> to vector<16x32xf32>
    %c0_131 = arith.constant 0 : index
    %c0_132 = arith.constant 0 : index
    %176 = vector.load %arg19[%c0_131, %c0_132] : memref<16x32xf32, #tpu.memory_space<vmem>>, vector<16x32xf32>
    %177 = arith.truncf %176 : vector<16x32xf32> to vector<16x32xbf16>
    %c0_133 = arith.constant 0 : index
    %c0_134 = arith.constant 0 : index
    %178 = vector.load %arg5[%c0_133, %c0_134] : memref<32x32xbf16, #tpu.memory_space<vmem>>, vector<32x32xbf16>
    %cst_135 = arith.constant dense<0.000000e+00> : vector<16x32xf32>
    %179 = tpu.matmul %177, %178, %cst_135 {dimension_numbers = #tpu.dot_dimension_numbers<[1], [0], [0], [1], [0, 0, 1, 1], [], []>} : vector<16x32xbf16>, vector<32x32xbf16>, vector<16x32xf32> -> vector<16x32xf32>
    %c0_136 = arith.constant 0 : index
    %c0_137 = arith.constant 0 : index
    %180 = vector.load %arg6[%c0_136, %c0_137] : memref<1x32xf32, #tpu.memory_space<vmem>>, vector<1x32xf32>
    %181 = vector.broadcast %180 : vector<1x32xf32> to vector<16x32xf32>
    %182 = arith.addf %179, %181 : vector<16x32xf32>
    %183 = arith.addf %175, %182 : vector<16x32xf32>
    %c0_138 = arith.constant 0 : index
    %c0_139 = arith.constant 0 : index
    %184 = vector.load %arg11[%c0_138, %c0_139] : memref<1x32xf32, #tpu.memory_space<vmem>>, vector<1x32xf32>
    %c0_140 = arith.constant 0 : index
    %c0_141 = arith.constant 0 : index
    %185 = vector.load %arg12[%c0_140, %c0_141] : memref<1x32xf32, #tpu.memory_space<vmem>>, vector<1x32xf32>
    %cst_142 = arith.constant dense<0.000000e+00> : vector<16xf32>
    %186 = vector.multi_reduction <add>, %183, %cst_142 [1] : vector<16x32xf32> to vector<16xf32>
    %187 = vector.shape_cast %186 : vector<16xf32> to vector<16x1xf32>
    %cst_143 = arith.constant 3.200000e+01 : f32
    %188 = vector.broadcast %cst_143 : f32 to vector<16x1xf32>
    %189 = arith.divf %187, %188 : vector<16x1xf32>
    %190 = vector.broadcast %189 : vector<16x1xf32> to vector<16x32xf32>
    %191 = arith.subf %183, %190 : vector<16x32xf32>
    %192 = arith.mulf %191, %191 : vector<16x32xf32>
    %cst_144 = arith.constant dense<0.000000e+00> : vector<16xf32>
    %193 = vector.multi_reduction <add>, %192, %cst_144 [1] : vector<16x32xf32> to vector<16xf32>
    %194 = vector.shape_cast %193 : vector<16xf32> to vector<16x1xf32>
    %cst_145 = arith.constant 3.200000e+01 : f32
    %195 = vector.broadcast %cst_145 : f32 to vector<16x1xf32>
    %196 = arith.divf %194, %195 : vector<16x1xf32>
    %197 = vector.broadcast %189 : vector<16x1xf32> to vector<16x32xf32>
    %198 = arith.subf %183, %197 : vector<16x32xf32>
    %cst_146 = arith.constant 9.99999974E-6 : f32
    %199 = vector.broadcast %cst_146 : f32 to vector<16x1xf32>
    %200 = arith.addf %196, %199 : vector<16x1xf32>
    %201 = math.rsqrt %200 : vector<16x1xf32>
    %202 = vector.broadcast %201 : vector<16x1xf32> to vector<16x32xf32>
    %203 = arith.mulf %198, %202 : vector<16x32xf32>
    %204 = vector.broadcast %184 : vector<1x32xf32> to vector<16x32xf32>
    %205 = arith.mulf %203, %204 : vector<16x32xf32>
    %206 = vector.broadcast %185 : vector<1x32xf32> to vector<16x32xf32>
    %207 = arith.addf %205, %206 : vector<16x32xf32>
    %208 = arith.truncf %207 : vector<16x32xf32> to vector<16x32xbf16>
    %c0_147 = arith.constant 0 : index
    %c0_148 = arith.constant 0 : index
    %209 = vector.load %arg7[%c0_147, %c0_148] : memref<32x64xbf16, #tpu.memory_space<vmem>>, vector<32x64xbf16>
    %cst_149 = arith.constant dense<0.000000e+00> : vector<16x64xf32>
    %210 = tpu.matmul %208, %209, %cst_149 {dimension_numbers = #tpu.dot_dimension_numbers<[1], [0], [0], [1], [0, 0, 1, 1], [], []>} : vector<16x32xbf16>, vector<32x64xbf16>, vector<16x64xf32> -> vector<16x64xf32>
    %c0_150 = arith.constant 0 : index
    %c0_151 = arith.constant 0 : index
    %211 = vector.load %arg8[%c0_150, %c0_151] : memref<1x64xf32, #tpu.memory_space<vmem>>, vector<1x64xf32>
    %212 = vector.broadcast %211 : vector<1x64xf32> to vector<16x64xf32>
    %213 = arith.addf %210, %212 : vector<16x64xf32>
    %cst_152 = arith.constant 0.000000e+00 : f32
    %214 = vector.broadcast %cst_152 : f32 to vector<16x64xf32>
    %215 = arith.maximumf %213, %214 : vector<16x64xf32>
    %216 = arith.truncf %215 : vector<16x64xf32> to vector<16x64xbf16>
    %c0_153 = arith.constant 0 : index
    %c0_154 = arith.constant 0 : index
    %217 = vector.load %arg9[%c0_153, %c0_154] : memref<64x32xbf16, #tpu.memory_space<vmem>>, vector<64x32xbf16>
    %cst_155 = arith.constant dense<0.000000e+00> : vector<16x32xf32>
    %218 = tpu.matmul %216, %217, %cst_155 {dimension_numbers = #tpu.dot_dimension_numbers<[1], [0], [0], [1], [0, 0, 1, 1], [], []>} : vector<16x64xbf16>, vector<64x32xbf16>, vector<16x32xf32> -> vector<16x32xf32>
    %c0_156 = arith.constant 0 : index
    %c0_157 = arith.constant 0 : index
    %219 = vector.load %arg10[%c0_156, %c0_157] : memref<1x32xf32, #tpu.memory_space<vmem>>, vector<1x32xf32>
    %220 = vector.broadcast %219 : vector<1x32xf32> to vector<16x32xf32>
    %221 = arith.addf %218, %220 : vector<16x32xf32>
    %222 = arith.addf %207, %221 : vector<16x32xf32>
    %c0_158 = arith.constant 0 : index
    %c0_159 = arith.constant 0 : index
    %223 = vector.load %arg13[%c0_158, %c0_159] : memref<1x32xf32, #tpu.memory_space<vmem>>, vector<1x32xf32>
    %c0_160 = arith.constant 0 : index
    %c0_161 = arith.constant 0 : index
    %224 = vector.load %arg14[%c0_160, %c0_161] : memref<1x32xf32, #tpu.memory_space<vmem>>, vector<1x32xf32>
    %cst_162 = arith.constant dense<0.000000e+00> : vector<16xf32>
    %225 = vector.multi_reduction <add>, %222, %cst_162 [1] : vector<16x32xf32> to vector<16xf32>
    %226 = vector.shape_cast %225 : vector<16xf32> to vector<16x1xf32>
    %cst_163 = arith.constant 3.200000e+01 : f32
    %227 = vector.broadcast %cst_163 : f32 to vector<16x1xf32>
    %228 = arith.divf %226, %227 : vector<16x1xf32>
    %229 = vector.broadcast %228 : vector<16x1xf32> to vector<16x32xf32>
    %230 = arith.subf %222, %229 : vector<16x32xf32>
    %231 = arith.mulf %230, %230 : vector<16x32xf32>
    %cst_164 = arith.constant dense<0.000000e+00> : vector<16xf32>
    %232 = vector.multi_reduction <add>, %231, %cst_164 [1] : vector<16x32xf32> to vector<16xf32>
    %233 = vector.shape_cast %232 : vector<16xf32> to vector<16x1xf32>
    %cst_165 = arith.constant 3.200000e+01 : f32
    %234 = vector.broadcast %cst_165 : f32 to vector<16x1xf32>
    %235 = arith.divf %233, %234 : vector<16x1xf32>
    %236 = vector.broadcast %228 : vector<16x1xf32> to vector<16x32xf32>
    %237 = arith.subf %222, %236 : vector<16x32xf32>
    %cst_166 = arith.constant 9.99999974E-6 : f32
    %238 = vector.broadcast %cst_166 : f32 to vector<16x1xf32>
    %239 = arith.addf %235, %238 : vector<16x1xf32>
    %240 = math.rsqrt %239 : vector<16x1xf32>
    %241 = vector.broadcast %240 : vector<16x1xf32> to vector<16x32xf32>
    %242 = arith.mulf %237, %241 : vector<16x32xf32>
    %243 = vector.broadcast %223 : vector<1x32xf32> to vector<16x32xf32>
    %244 = arith.mulf %242, %243 : vector<16x32xf32>
    %245 = vector.broadcast %224 : vector<1x32xf32> to vector<16x32xf32>
    %246 = arith.addf %244, %245 : vector<16x32xf32>
    %247 = vector.shape_cast %246 : vector<16x32xf32> to vector<2x8x32xf32>
    %c0_167 = arith.constant 0 : index
    %c0_168 = arith.constant 0 : index
    %c0_169 = arith.constant 0 : index
    %248 = vector.load %arg15[%c0_167, %c0_168, %c0_169] : memref<2x8x32xf32, #tpu.memory_space<vmem>>, vector<2x8x32xf32>
    tpu.vector_store %arg15[%c0_167, %c0_168, %c0_169], %247 {strides = array<i32>} : memref<2x8x32xf32, #tpu.memory_space<vmem>>, vector<2x8x32xf32>,
    return
  }
  func.func @transform_0(%arg0: i32, %arg1: i32) -> (i32, i32, i32) {
    %c0_i32 = arith.constant 0 : i32
    %c0_i32_0 = arith.constant 0 : i32
    %c0_i32_1 = arith.constant 0 : i32
    return %arg0, %c0_i32, %c0_i32_0 : i32, i32, i32
  }
  func.func @transform_1(%arg0: i32, %arg1: i32) -> (i32, i32) {
    %c0_i32 = arith.constant 0 : i32
    %c0_i32_0 = arith.constant 0 : i32
    %c0_i32_1 = arith.constant 0 : i32
    return %c0_i32, %c0_i32_0 : i32, i32
  }
  func.func @transform_2(%arg0: i32, %arg1: i32) -> (i32, i32) {
    %c0_i32 = arith.constant 0 : i32
    %c0_i32_0 = arith.constant 0 : i32
    %c0_i32_1 = arith.constant 0 : i32
    return %c0_i32, %c0_i32_0 : i32, i32
  }
  func.func @transform_3(%arg0: i32, %arg1: i32) -> (i32, i32) {
    %c0_i32 = arith.constant 0 : i32
    %c0_i32_0 = arith.constant 0 : i32
    %c0_i32_1 = arith.constant 0 : i32
    return %c0_i32, %c0_i32_0 : i32, i32
  }
  func.func @transform_4(%arg0: i32, %arg1: i32) -> (i32, i32) {
    %c0_i32 = arith.constant 0 : i32
    %c0_i32_0 = arith.constant 0 : i32
    %c0_i32_1 = arith.constant 0 : i32
    return %c0_i32, %c0_i32_0 : i32, i32
  }
  func.func @transform_5(%arg0: i32, %arg1: i32) -> (i32, i32) {
    %c0_i32 = arith.constant 0 : i32
    %c0_i32_0 = arith.constant 0 : i32
    %c0_i32_1 = arith.constant 0 : i32
    return %c0_i32, %c0_i32_0 : i32, i32
  }
  func.func @transform_6(%arg0: i32, %arg1: i32) -> (i32, i32) {
    %c0_i32 = arith.constant 0 : i32
    %c0_i32_0 = arith.constant 0 : i32
    %c0_i32_1 = arith.constant 0 : i32
    return %c0_i32, %c0_i32_0 : i32, i32
  }
  func.func @transform_7(%arg0: i32, %arg1: i32) -> (i32, i32) {
    %c0_i32 = arith.constant 0 : i32
    %c0_i32_0 = arith.constant 0 : i32
    %c0_i32_1 = arith.constant 0 : i32
    return %c0_i32, %c0_i32_0 : i32, i32
  }
  func.func @transform_8(%arg0: i32, %arg1: i32) -> (i32, i32) {
    %c0_i32 = arith.constant 0 : i32
    %c0_i32_0 = arith.constant 0 : i32
    %c0_i32_1 = arith.constant 0 : i32
    return %c0_i32, %c0_i32_0 : i32, i32
  }
  func.func @transform_9(%arg0: i32, %arg1: i32) -> (i32, i32) {
    %c0_i32 = arith.constant 0 : i32
    %c0_i32_0 = arith.constant 0 : i32
    %c0_i32_1 = arith.constant 0 : i32
    return %c0_i32, %c0_i32_0 : i32, i32
  }
  func.func @transform_10(%arg0: i32, %arg1: i32) -> (i32, i32) {
    %c0_i32 = arith.constant 0 : i32
    %c0_i32_0 = arith.constant 0 : i32
    %c0_i32_1 = arith.constant 0 : i32
    return %c0_i32, %c0_i32_0 : i32, i32
  }
  func.func @transform_11(%arg0: i32, %arg1: i32) -> (i32, i32) {
    %c0_i32 = arith.constant 0 : i32
    %c0_i32_0 = arith.constant 0 : i32
    %c0_i32_1 = arith.constant 0 : i32
    return %c0_i32, %c0_i32_0 : i32, i32
  }
  func.func @transform_12(%arg0: i32, %arg1: i32) -> (i32, i32) {
    %c0_i32 = arith.constant 0 : i32
    %c0_i32_0 = arith.constant 0 : i32
    %c0_i32_1 = arith.constant 0 : i32
    return %c0_i32, %c0_i32_0 : i32, i32
  }
  func.func @transform_13(%arg0: i32, %arg1: i32) -> (i32, i32, i32) {
    %c0_i32 = arith.constant 0 : i32
    %c0_i32_0 = arith.constant 0 : i32
    return %arg0, %arg1, %c0_i32 : i32, i32, i32
  }
}

</mosaic_0001>

<bundles_post_ra>
// kernel: tpu_custom_call.1
= control target key start
LH: loop header
LB: loop body
LE: loop exit
PB: predicated region body
PF: predicated region fallthrough
CT: control target
= control target key end

     0   :  { %18 = vsyncpa [#allocation7], 0  ;;  %s3019_s0 = inlined_call_operand.hbm [shape: f32[2,8,32], index: 0, kind: input, shape index: {}]   ;;  %s3020_s1 = inlined_call_operand.hbm [shape: bf16[32,96], index: 1, kind: input, shape index: {}]   ;;  %s3021_s2 = inlined_call_operand.hbm [shape: f32[1,96], index: 2, kind: input, shape index: {}]   ;;  %s3022_s3 = inlined_call_operand.hbm [shape: bf16[32,32], index: 3, kind: input, shape index: {}]   ;;  %s3023_s4 = inlined_call_operand.hbm [shape: f32[1,32], index: 4, kind: input, shape index: {}]   ;;  %s3024_s5 = inlined_call_operand.hbm [shape: bf16[32,64], index: 5, kind: input, shape index: {}]   ;;  %s3025_s6 = inlined_call_operand.hbm [shape: f32[1,64], index: 6, kind: input, shape index: {}]   ;;  %s3026_s7 = inlined_call_operand.hbm [shape: bf16[64,32], index: 7, kind: input, shape index: {}]   ;;  %s3027_s8 = inlined_call_operand.hbm [shape: f32[1,32], index: 8, kind: input, shape index: {}]   ;;  %s3028_s9 = inlined_call_operand.hbm [shape: f32[1,32], index: 9, kind: input, shape index: {}]   ;;  %s3029_s10 = inlined_call_operand.hbm [shape: f32[1,32], index: 10, kind: input, shape index: {}]   ;;  %s3030_s11 = inlined_call_operand.hbm [shape: f32[1,32], index: 11, kind: input, shape index: {}]   ;;  %s3031_s12 = inlined_call_operand.hbm [shape: f32[1,32], index: 12, kind: input, shape index: {}]   ;;  %s3032_s13 = inlined_call_operand.hbm [shape: f32[2,8,32], index: 13, kind: output, shape index: {}]  }
   0x1   :  { %19 = vsyncpa [#allocation10], 0 }
   0x2   :  { %20 = vsyncpa [#allocation13], 0 }
   0x3   :  { %21 = vsyncpa [#allocation16], 0 }
   0x4   :  { %22 = vsyncpa [#allocation19], 0 }
   0x5   :  { %23 = vsyncpa [#allocation22], 0 }
   0x6   :  { %24 = vsyncpa [#allocation25], 0 }
   0x7   :  { %25 = vsyncpa [#allocation8], 0  ;;  %s2498_s25 = smov [#allocation9]   ;;  %s2174_s29 = scalar_lea.hbm %s3020_s1, 256 }
   0x8   :  { %s43_s26 = sshll.u32 %s2498_s25, 4  ;;  %p2175_p0 = scmp.ne.s32.totalorder %s3020_s1, %s2174_s29  ;;  %s44_s26 = int_to_ptr.vmem [resolvable:$true] %s43_s26 }
   0x9   :  { %p2178_p1 = scmp.lt.u32.totalorder %s2174_s29, %s3020_s1 }
   0xb   :  { %p2180_p2 = pnand %p2178_p1, %p2175_p0 }
   0xd   :  { %2183 = shalt.err (!%p2180_p2)
}
   0xe   :  { %s2184_s17 = scalar_lea.vmem %s44_s26, 256  ;;  %p2189_p4 = scmp.lt.s32.totalorder %s44_s26, %s44_s26 }
   0xf   :  { %p2185_p3 = scmp.ne.s32.totalorder %s44_s26, %s2184_s17  ;;  %p2190_p5 = scmp.lt.s32.totalorder %s2184_s17, %s2184_s17 }
  0x11   :  { %p2191_p6 = por %p2190_p5, %p2189_p4 }
  0x13   :  { %p2192_p7 = pnand %p2191_p6, %p2185_p3 }
  0x15   :  { %2195 = shalt.err (!%p2192_p7)
}
  0x16   :  { %s2499_s18 = smov 64   ;;  %s2500_s19 = smov 4  }
  0x17   :  { %49 = dma.hbm_to_vmem [thread:$0]  %s3020_s1, 256, %s44_s26, [#allocation10], %s2499_s18, %s2499_s18, %s2500_s19  }
  0x18   :  { %s2501_s22 = smov [#allocation12]   ;;  %s2502_s24 = smov [#allocation15]  }
  0x19   :  { %s65_s23 = sshll.u32 %s2501_s22, 4  ;;  %s87_s25 = sshll.u32 %s2502_s24, 4  ;;  %s66_s23 = int_to_ptr.vmem [resolvable:$true] %s65_s23  ;;  %s88_s25 = int_to_ptr.vmem [resolvable:$true] %s87_s25 }
  0x1a   :  { %s2196_s29 = scalar_lea.hbm %s3022_s3, 256 }
  0x1b   :  { %p2197_p8 = scmp.ne.s32.totalorder %s3022_s3, %s2196_s29  ;;  %p2200_p9 = scmp.lt.u32.totalorder %s2196_s29, %s3022_s3 }
  0x1d   :  { %p2202_p10 = pnand %p2200_p9, %p2197_p8 }
  0x1f   :  { %2205 = shalt.err (!%p2202_p10)
}
  0x20   :  { %s2206_s1 = scalar_lea.vmem %s66_s23, 256  ;;  %p2211_p12 = scmp.lt.s32.totalorder %s66_s23, %s66_s23 }
  0x21   :  { %p2207_p11 = scmp.ne.s32.totalorder %s66_s23, %s2206_s1  ;;  %p2212_p13 = scmp.lt.s32.totalorder %s2206_s1, %s2206_s1 }
  0x23   :  { %p2213_p0 = por %p2212_p13, %p2211_p12 }
  0x25   :  { %p2214_p1 = pnand %p2213_p0, %p2207_p11 }
  0x27   :  { %2217 = shalt.err (!%p2214_p1)
}
  0x28   :  { %71 = dma.hbm_to_vmem [thread:$0]  %s3022_s3, 256, %s66_s23, [#allocation13], %s2499_s18, %s2499_s18, %s2500_s19  }
  0x29   :  { %s2218_s22 = scalar_lea.hbm %s3024_s5, 256 }
  0x2a   :  { %p2219_p2 = scmp.ne.s32.totalorder %s3024_s5, %s2218_s22  ;;  %p2222_p3 = scmp.lt.u32.totalorder %s2218_s22, %s3024_s5 }
  0x2c   :  { %p2224_p4 = pnand %p2222_p3, %p2219_p2 }
  0x2e   :  { %2227 = shalt.err (!%p2224_p4)
}
  0x2f   :  { %s2228_s30 = scalar_lea.vmem %s88_s25, 256  ;;  %p2233_p6 = scmp.lt.s32.totalorder %s88_s25, %s88_s25 }
  0x30   :  { %p2229_p5 = scmp.ne.s32.totalorder %s88_s25, %s2228_s30  ;;  %p2234_p7 = scmp.lt.s32.totalorder %s2228_s30, %s2228_s30 }
  0x32   :  { %p2235_p8 = por %p2234_p7, %p2233_p6 }
  0x34   :  { %p2236_p9 = pnand %p2235_p8, %p2229_p5 }
  0x36   :  { %2239 = shalt.err (!%p2236_p9)
}
  0x37   :  { %93 = dma.hbm_to_vmem [thread:$0]  %s3024_s5, 256, %s88_s25, [#allocation16], %s2499_s18, %s2499_s18, %s2500_s19  }
  0x38   :  { %s2503_s14 = smov [#allocation18]   ;;  %s2504_s16 = smov [#allocation21]  }
  0x39   :  { %s109_s15 = sshll.u32 %s2503_s14, 4  ;;  %s132_s1 = sshll.u32 %s2504_s16, 4  ;;  %s110_s15 = int_to_ptr.vmem [resolvable:$true] %s109_s15  ;;  %s133_s1 = int_to_ptr.vmem [resolvable:$true] %s132_s1 }
  0x3a   :  { %s2240_s20 = scalar_lea.hbm %s3026_s7, 512 }
  0x3b   :  { %p2241_p10 = scmp.ne.s32.totalorder %s3026_s7, %s2240_s20  ;;  %p2244_p11 = scmp.lt.u32.totalorder %s2240_s20, %s3026_s7 }
  0x3d   :  { %p2246_p12 = pnand %p2244_p11, %p2241_p10 }
  0x3f   :  { %2249 = shalt.err (!%p2246_p12)
}
  0x40   :  { %s2250_s5 = scalar_lea.vmem %s110_s15, 512  ;;  %p2255_p0 = scmp.lt.s32.totalorder %s110_s15, %s110_s15 }
  0x41   :  { %p2251_p13 = scmp.ne.s32.totalorder %s110_s15, %s2250_s5  ;;  %p2256_p1 = scmp.lt.s32.totalorder %s2250_s5, %s2250_s5 }
  0x43   :  { %p2257_p2 = por %p2256_p1, %p2255_p0 }
  0x45   :  { %p2258_p3 = pnand %p2257_p2, %p2251_p13 }
  0x47   :  { %2261 = shalt.err (!%p2258_p3)
}
  0x48   :  { %115 = dma.hbm_to_vmem [thread:$0]  %s3026_s7, 512, %s110_s15, [#allocation19], %s2499_s18, %s2499_s18, %s2500_s19  }
  0x49   :  { %s2262_s3 = scalar_lea.hbm %s3028_s9, 16 }
  0x4a   :  { %p2263_p4 = scmp.ne.s32.totalorder %s3028_s9, %s2262_s3  ;;  %p2266_p5 = scmp.lt.u32.totalorder %s2262_s3, %s3028_s9 }
  0x4c   :  { %p2268_p6 = pnand %p2266_p5, %p2263_p4 }
  0x4e   :  { %2271 = shalt.err (!%p2268_p6)
}
  0x4f   :  { %s2272_s17 = scalar_lea.vmem %s133_s1, 16  ;;  %s2276_s20 = scalar_lea.vmem %s133_s1, 32 }
  0x50   :  { %p2273_p7 = scmp.ne.s32.totalorder %s133_s1, %s2272_s17  ;;  %p2277_p8 = scmp.lt.s32.totalorder %s133_s1, %s133_s1 }
  0x51   :  { %p2278_p9 = scmp.lt.s32.totalorder %s2276_s20, %s2272_s17 }
  0x53   :  { %p2279_p10 = por %p2278_p9, %p2277_p8 }
  0x55   :  { %p2280_p11 = pnand %p2279_p10, %p2273_p7 }
  0x57   :  { %2283 = shalt.err (!%p2280_p11)
}
  0x58   :  { %135 = dma.hbm_to_vmem [thread:$0]  %s3028_s9, 16, %s133_s1, [#allocation22]  }
  0x59   :  { %s2505_s15 = smov [#allocation24]   ;;  %s2506_s22 = smov [#allocation6]  }
  0x5a   :  { %s152_s21 = sshll.u32 %s2505_s15, 4  ;;  %s31_s24 = sshll.u32 %s2506_s22, 4  ;;  %s153_s21 = int_to_ptr.vmem [resolvable:$true] %s152_s21  ;;  %s32_s24 = int_to_ptr.vmem [resolvable:$true] %s31_s24 }
  0x5b   :  { %s2284_s25 = scalar_lea.hbm %s3030_s11, 16 }
  0x5c   :  { %p2285_p12 = scmp.ne.s32.totalorder %s3030_s11, %s2284_s25  ;;  %p2288_p13 = scmp.lt.u32.totalorder %s2284_s25, %s3030_s11 }
  0x5e   :  { %p2290_p0 = pnand %p2288_p13, %p2285_p12 }
  0x60   :  { %2293 = shalt.err (!%p2290_p0)
}
  0x61   :  { %s2294_s9 = scalar_lea.vmem %s153_s21, 16  ;;  %s2298_s1 = scalar_lea.vmem %s153_s21, 32 }
  0x62   :  { %p2295_p1 = scmp.ne.s32.totalorder %s153_s21, %s2294_s9  ;;  %p2299_p2 = scmp.lt.s32.totalorder %s153_s21, %s153_s21 }
  0x63   :  { %p2300_p3 = scmp.lt.s32.totalorder %s2298_s1, %s2294_s9 }
  0x65   :  { %p2301_p4 = por %p2300_p3, %p2299_p2 }
  0x67   :  { %p2302_p5 = pnand %p2301_p4, %p2295_p1 }
  0x69   :  { %2305 = shalt.err (!%p2302_p5)
}
  0x6a   :  { %155 = dma.hbm_to_vmem [thread:$0]  %s3030_s11, 16, %s153_s21, [#allocation25]  }
  0x6b   :  { %s2306_s17 = scalar_lea.hbm %s3019_s0, 256 }
  0x6c   :  { %p2307_p6 = scmp.ne.s32.totalorder %s3019_s0, %s2306_s17  ;;  %p2310_p7 = scmp.lt.u32.totalorder %s2306_s17, %s3019_s0 }
  0x6e   :  { %p2312_p8 = pnand %p2310_p7, %p2307_p6 }
  0x70   :  { %2315 = shalt.err (!%p2312_p8)
}
  0x71   :  { %s2316_s22 = scalar_lea.vmem %s32_s24, 256  ;;  %p2321_p10 = scmp.lt.s32.totalorder %s32_s24, %s32_s24 }
  0x72   :  { %p2317_p9 = scmp.ne.s32.totalorder %s32_s24, %s2316_s22  ;;  %p2322_p11 = scmp.lt.s32.totalorder %s2316_s22, %s2316_s22 }
  0x74   :  { %p2323_p12 = por %p2322_p11, %p2321_p10 }
  0x76   :  { %p2324_p13 = pnand %p2323_p12, %p2317_p9 }
  0x78   :  { %2327 = shalt.err (!%p2324_p13)
}
  0x79   :  { %s2507_s11 = smov 128   ;;  %s2508_s21 = smov 8  }
  0x7a   :  { %37 = dma.hbm_to_vmem [thread:$0]  %s3019_s0, 256, %s32_s24, [#allocation7], %s2507_s11, %s2507_s11, %s2508_s21  }
  0x7b   :  { %s2509_s25 = smov [#allocation11]   ;;  %s2510_s29 = smov [#allocation14]  }
  0x7c   :  { %s56_s28 = sshll.u32 %s2509_s25, 4  ;;  %s78_s30 = sshll.u32 %s2510_s29, 4  ;;  %s57_s28 = int_to_ptr.vmem [resolvable:$true] %s56_s28  ;;  %s79_s30 = int_to_ptr.vmem [resolvable:$true] %s78_s30 }
  0x7d   :  { %s2328_s1 = scalar_lea.hbm %s3021_s2, 16 }
  0x7e   :  { %p2329_p0 = scmp.ne.s32.totalorder %s3021_s2, %s2328_s1  ;;  %p2332_p1 = scmp.lt.u32.totalorder %s2328_s1, %s3021_s2 }
  0x80   :  { %p2334_p2 = pnand %p2332_p1, %p2329_p0 }
  0x82   :  { %2337 = shalt.err (!%p2334_p2)
}
  0x83   :  { %s2338_s0 = scalar_lea.vmem %s57_s28, 16  ;;  %s2342_s24 = scalar_lea.vmem %s57_s28, 32 }
  0x84   :  { %p2339_p3 = scmp.ne.s32.totalorder %s57_s28, %s2338_s0  ;;  %p2343_p4 = scmp.lt.s32.totalorder %s57_s28, %s57_s28 }
  0x85   :  { %p2344_p5 = scmp.lt.s32.totalorder %s2342_s24, %s2338_s0 }
  0x87   :  { %p2345_p6 = por %p2344_p5, %p2343_p4 }
  0x89   :  { %p2346_p7 = pnand %p2345_p6, %p2339_p3 }
  0x8b   :  { %2349 = shalt.err (!%p2346_p7)
}
  0x8c   :  { %59 = dma.hbm_to_vmem [thread:$0]  %s3021_s2, 16, %s57_s28, [#allocation10]  }
  0x8d   :  { %s2350_s15 = scalar_lea.hbm %s3023_s4, 16 }
  0x8e   :  { %p2351_p8 = scmp.ne.s32.totalorder %s3023_s4, %s2350_s15  ;;  %p2354_p9 = scmp.lt.u32.totalorder %s2350_s15, %s3023_s4 }
  0x90   :  { %p2356_p10 = pnand %p2354_p9, %p2351_p8 }
  0x92   :  { %2359 = shalt.err (!%p2356_p10)
}
  0x93   :  { %s2360_s29 = scalar_lea.vmem %s79_s30, 16  ;;  %s2364_s3 = scalar_lea.vmem %s79_s30, 32 }
  0x94   :  { %p2361_p11 = scmp.ne.s32.totalorder %s79_s30, %s2360_s29  ;;  %p2365_p12 = scmp.lt.s32.totalorder %s79_s30, %s79_s30 }
  0x95   :  { %p2366_p13 = scmp.lt.s32.totalorder %s2364_s3, %s2360_s29 }
  0x97   :  { %p2367_p0 = por %p2366_p13, %p2365_p12 }
  0x99   :  { %p2368_p1 = pnand %p2367_p0, %p2361_p11 }
  0x9b   :  { %2371 = shalt.err (!%p2368_p1)
}
  0x9c   :  { %81 = dma.hbm_to_vmem [thread:$0]  %s3023_s4, 16, %s79_s30, [#allocation13]  }
  0x9d   :  { %s2511_s9 = smov [#allocation17]   ;;  %s2512_s23 = smov [#allocation20]  }
  0x9e   :  { %s100_s1 = sshll.u32 %s2511_s9, 4  ;;  %s122_s14 = sshll.u32 %s2512_s23, 4  ;;  %s101_s1 = int_to_ptr.vmem [resolvable:$true] %s100_s1  ;;  %s123_s14 = int_to_ptr.vmem [resolvable:$true] %s122_s14 }
  0x9f   :  { %s2372_s0 = scalar_lea.hbm %s3025_s6, 16 }
  0xa0   :  { %p2373_p2 = scmp.ne.s32.totalorder %s3025_s6, %s2372_s0  ;;  %p2376_p3 = scmp.lt.u32.totalorder %s2372_s0, %s3025_s6 }
  0xa2   :  { %p2378_p4 = pnand %p2376_p3, %p2373_p2 }
  0xa4   :  { %2381 = shalt.err (!%p2378_p4)
}
  0xa5   :  { %s2382_s4 = scalar_lea.vmem %s101_s1, 16  ;;  %s2386_s30 = scalar_lea.vmem %s101_s1, 32 }
  0xa6   :  { %p2383_p5 = scmp.ne.s32.totalorder %s101_s1, %s2382_s4  ;;  %p2387_p6 = scmp.lt.s32.totalorder %s101_s1, %s101_s1 }
  0xa7   :  { %p2388_p7 = scmp.lt.s32.totalorder %s2386_s30, %s2382_s4 }
  0xa9   :  { %p2389_p8 = por %p2388_p7, %p2387_p6 }
  0xab   :  { %p2390_p9 = pnand %p2389_p8, %p2383_p5 }
  0xad   :  { %2393 = shalt.err (!%p2390_p9)
}
  0xae   :  { %103 = dma.hbm_to_vmem [thread:$0]  %s3025_s6, 16, %s101_s1, [#allocation16]  }
  0xaf   :  { %s2394_s5 = scalar_lea.hbm %s3027_s8, 16 }
  0xb0   :  { %p2395_p10 = scmp.ne.s32.totalorder %s3027_s8, %s2394_s5  ;;  %p2398_p11 = scmp.lt.u32.totalorder %s2394_s5, %s3027_s8 }
  0xb2   :  { %p2400_p12 = pnand %p2398_p11, %p2395_p10 }
  0xb4   :  { %2403 = shalt.err (!%p2400_p12)
}
  0xb5   :  { %s2404_s28 = scalar_lea.vmem %s123_s14, 16  ;;  %s2408_s9 = scalar_lea.vmem %s123_s14, 32 }
  0xb6   :  { %p2405_p13 = scmp.ne.s32.totalorder %s123_s14, %s2404_s28  ;;  %p2409_p0 = scmp.lt.s32.totalorder %s123_s14, %s123_s14 }
  0xb7   :  { %p2410_p1 = scmp.lt.s32.totalorder %s2408_s9, %s2404_s28 }
  0xb9   :  { %p2411_p2 = por %p2410_p1, %p2409_p0 }
  0xbb   :  { %p2412_p3 = pnand %p2411_p2, %p2405_p13 }
  0xbd   :  { %2415 = shalt.err (!%p2412_p3)
}
  0xbe   :  { %125 = dma.hbm_to_vmem [thread:$0]  %s3027_s8, 16, %s123_s14, [#allocation19]  }
  0xbf   :  { %s2513_s23 = smov [#allocation23]   ;;  %s2514_s26 = smov [#allocation26]  }
  0xc0   :  { %s142_s16 = sshll.u32 %s2513_s23, 4  ;;  %s162_s0 = sshll.u32 %s2514_s26, 4  ;;  %s143_s16 = int_to_ptr.vmem [resolvable:$true] %s142_s16  ;;  %s163_s0 = int_to_ptr.vmem [resolvable:$true] %s162_s0 }
  0xc1   :  { %s2416_s20 = scalar_lea.hbm %s3029_s10, 16 }
  0xc2   :  { %p2417_p4 = scmp.ne.s32.totalorder %s3029_s10, %s2416_s20  ;;  %p2420_p5 = scmp.lt.u32.totalorder %s2416_s20, %s3029_s10 }
  0xc4   :  { %p2422_p6 = pnand %p2420_p5, %p2417_p4 }
  0xc6   :  { %2425 = shalt.err (!%p2422_p6)
}
  0xc7   :  { %s2426_s8 = scalar_lea.vmem %s143_s16, 16  ;;  %s2430_s14 = scalar_lea.vmem %s143_s16, 32 }
  0xc8   :  { %p2427_p7 = scmp.ne.s32.totalorder %s143_s16, %s2426_s8  ;;  %p2431_p8 = scmp.lt.s32.totalorder %s143_s16, %s143_s16 }
  0xc9   :  { %p2432_p9 = scmp.lt.s32.totalorder %s2430_s14, %s2426_s8 }
  0xcb   :  { %p2433_p10 = por %p2432_p9, %p2431_p8 }
  0xcd   :  { %p2434_p11 = pnand %p2433_p10, %p2427_p7 }
  0xcf   :  { %2437 = shalt.err (!%p2434_p11)
}
  0xd0   :  { %145 = dma.hbm_to_vmem [thread:$0]  %s3029_s10, 16, %s143_s16, [#allocation22]  }
  0xd1   :  { %s2438_s25 = scalar_lea.hbm %s3031_s12, 16 }
  0xd2   :  { %p2439_p12 = scmp.ne.s32.totalorder %s3031_s12, %s2438_s25  ;;  %p2442_p13 = scmp.lt.u32.totalorder %s2438_s25, %s3031_s12 }
  0xd4   :  { %p2444_p0 = pnand %p2442_p13, %p2439_p12 }
  0xd6   :  { %2447 = shalt.err (!%p2444_p0)
}
  0xd7   :  { %s2448_s9 = scalar_lea.vmem %s163_s0, 16  ;;  %s2452_s6 = scalar_lea.vmem %s163_s0, 32 }
  0xd8   :  { %p2449_p1 = scmp.ne.s32.totalorder %s163_s0, %s2448_s9  ;;  %p2453_p2 = scmp.lt.s32.totalorder %s163_s0, %s163_s0 }
  0xd9   :  { %p2454_p3 = scmp.lt.s32.totalorder %s2452_s6, %s2448_s9 }
  0xdb   :  { %p2455_p4 = por %p2454_p3, %p2453_p2 }
  0xdd   :  { %p2456_p5 = pnand %p2455_p4, %p2449_p1 }
  0xdf   :  { %2459 = shalt.err (!%p2456_p5)
}
  0xe0   :  { %165 = dma.hbm_to_vmem [thread:$0]  %s3031_s12, 16, %s163_s0, [#allocation25]  }
  0xe1   :  { %2482 = dma.done.wait [#allocation7], 256  }
  0xe2   :  { %2483 = vsyncadd [#allocation7], 4294967040 }
  0xe3   :  { %2484 = dma.done.wait [#allocation10], 272  }
  0xe4   :  { %2485 = vsyncadd [#allocation10], 4294967024 }
  0xe5   :  { %2486 = dma.done.wait [#allocation13], 272  }
  0xe6   :  { %2487 = vsyncadd [#allocation13], 4294967024 }
  0xe7   :  { %2488 = dma.done.wait [#allocation16], 272  }
  0xe8   :  { %2489 = vsyncadd [#allocation16], 4294967024 }
  0xe9   :  { %2490 = dma.done.wait [#allocation19], 528  }
  0xea   :  { %2491 = vsyncadd [#allocation19], 4294966768 }
  0xeb   :  { %2492 = dma.done.wait [#allocation22], 32  }
  0xec   :  { %2493 = vsyncadd [#allocation22], 4294967264 }
  0xed   :  { %2494 = dma.done.wait [#allocation25], 32  }
  0xee   :  { %2495 = vsyncadd [#allocation25], 4294967264  ;;  %v2515_v0 = vmov 0.0   ;;  %vm2516_vm0 = vmmov 0   ;;  %v2120_v1 = vld [vmem:[#allocation9] sm:$0xff]   ;;  %v2121_v2 = vld [vmem:[#allocation9 + $0x8] sm:$0xff]  }
  0xef   :  { %1946 = vmatprep.subr.bf16.mxu0 %v2515_v0  ;;  %1950 = vmatprep.mubr.msk.bf16.mxu0 %vm2516_vm0, %v2515_v0  ;;  %s2517_s12 = smov 96   ;;  %v2122_v3 = vld [vmem:[#allocation9] sm:$0xff]   ;;  %v2123_v4 = vld [vmem:[#allocation9 + $0x8] sm:$0xff]   ;;  %v2771_v5 = vld [vmem:[#allocation6] sm:$0xff]  ;;  %vm236_vm1 = vcmask 261120   ;;  %vm289_vm2 = vcmask 60416  }
  0xf0   :  { %1954 = vmatprep.subr.bf16.mxu1 %v2515_v0  ;;  %1958 = vmatprep.mubr.msk.bf16.mxu1 %vm2516_vm0, %v2515_v0  ;;  %v2773_v6 = vld [vmem:[#allocation6 + $0x8] sm:$0xff]  ;;  %v2775_v7 = vld [vmem:[#allocation11] ss:$0 sm:$0xff]  ;;  %s2518_s23 = smov 120   ;;  %s2519_s16 = smov 112   ;;  %v2124_v19 = vld [vmem:[#allocation9 + $0x8] sm:$0xff]  }
  0xf1   :  { %339 = vrot.lane.b32.xlu0 %v2120_v1, %s2517_s12  ;;  %1947 = vmatpush3.bf16.msra.mxu0 %v2122_v3  ;;  %v2781_v8 = vpack.c.bf16 %v2773_v6, %v2771_v5  ;;  %s2520_s26 = smov 104   ;;  %vm541_vm3 = vcmask 64512   ;;  %v2125_v33 = vld [vmem:[#allocation9] sm:$0xff]   ;;  %vm601_vm4 = vcmask 1043456   ;;  %s2522_s0 = smov 24   ;;  %vm764_vm5 = vcmask 130112  }
  0xf2   :  { %1948 = vmatprep.subr.bf16.mxu0 %v2515_v0  ;;  %345 = vrot.lane.b32.xlu1 %v2775_v7, %s2517_s12  ;;  %vm882_vm6 = vcmask 195712   ;;  %vm1000_vm7 = vcmask 261312   ;;  %vm1697_vm8 = vcmask 523264   ;;  %s2523_s24 = smov [#allocation27]  }
  0xf3   :  { %s1795_s17 = sshll.u32 %s2523_s24, 4  ;;  %s1796_s17 = int_to_ptr.vmem [resolvable:$true] %s1795_s17 }
  0xf4   :  { %s2460_s20 = scalar_lea.vmem %s1796_s17, 256  ;;  %p2465_p7 = scmp.lt.s32.totalorder %s1796_s17, %s1796_s17 }
  0xf5   :  { %341 = vrot.lane.b32.xlu0 %v2121_v2, %s2517_s12  ;;  %1949 = vmatpush3.bf16.msra.mxu0 %v2123_v4  ;;  %p2461_p6 = scmp.ne.s32.totalorder %s1796_s17, %s2460_s20  ;;  %p2466_p8 = scmp.lt.s32.totalorder %s2460_s20, %s2460_s20 }
  0xf6   :  { %1962 = vmatprep.subr.bf16.mxu0 %v2515_v0 }
  0xf7   :  { %p2467_p9 = por %p2466_p8, %p2465_p7 }
  0xf8   :  { %1951 = vmatmul.mubr.msk.bf16.vlgmr.msra.gmra.mrb[0].mxu0 %vm236_vm1, %v2781_v8 }
  0xf9   :  { %1966 = vmatprep.mubr.msk.bf16.mxu0 %vm2516_vm0, %v2515_v0  ;;  %p2468_p10 = pnand %p2467_p9, %p2461_p6 }
 0x163   :  { %v340_v9 = vpop.permute.xlu0 %339 }
 0x164   :  { %1955 = vmatpush3.bf16.msra.mxu1 %v340_v9  ;;  %v346_v20 = vpop.permute.xlu1 %345 }
 0x165   :  { %1956 = vmatprep.subr.bf16.mxu1 %v2515_v0 }
 0x167   :  { %v342_v10 = vpop.permute.xlu0 %341 }
 0x168   :  { %1957 = vmatpush3.bf16.msra.mxu1 %v342_v10 }
 0x169   :  { %1970 = vmatprep.subr.bf16.mxu1 %v2515_v0 }
 0x16b   :  { %1959 = vmatmul.mubr.msk.bf16.vlgmr.msra.gmra.mrb[0].mxu1 %vm236_vm1, %v2781_v8 }
 0x16c   :  { %1972 = vmatprep.mubr.msk.bf16.mxu1 %vm2516_vm0, %v2515_v0 }
 0x1cb   :  { %v274_v11 = vpop.f32.mrb[0].mxu0 }
 0x1cc   :  { %v275_v12 = vadd.f32 %v2775_v7, %v274_v11  ;;  %v1952_v13 = vpop.f32.mrb[1].mxu0 }
 0x1cd   :  { %v277_v14 = vpop.f32.mrb[2].mxu0 }
 0x1ce   :  { %v1888_v15 = vpack.c.bf16 %v275_v12, %v275_v12  ;;  %v278_v16 = vadd.f32 %v2775_v7, %v277_v14  ;;  %v1953_v17 = vpop.f32.mrb[3].mxu0 }
 0x1d0   :  { %290 = vst.msk [vmem:[#allocation2] sm:$0xf] %vm289_vm2, %v1888_v15  ;;  %292 = vrot.lane.b32.xlu0 %v1888_v15, %s2518_s23  ;;  %v1889_v18 = vpack.c.bf16 %v278_v16, %v278_v16 }
 0x1d2   :  { %291 = vst.msk [vmem:[#allocation2 + $0x10] sm:$0xf] %vm289_vm2, %v1889_v18 }
 0x1d4   :  { %301 = vrot.lane.b32.xlu0 %v1888_v15, %s2519_s16 }
 0x1d7   :  { %v538_v36 = vld [vmem:[#allocation2] sm:$0xf] }
 0x1d8   :  { %310 = vrot.lane.b32.xlu0 %v1888_v15, %s2520_s26 }
 0x1d9   :  { %v1005_v59 = vld [vmem:[#allocation2 + $0x10] sm:$0xf] }
 0x1dc   :  { %448 = vrot.lane.b32.xlu0 %v2124_v19, %s2499_s18 }
 0x1e0   :  { %294 = vrot.lane.b32.xlu0 %v1889_v18, %s2518_s23 }
 0x1e4   :  { %303 = vrot.lane.b32.xlu0 %v1889_v18, %s2519_s16 }
 0x1e8   :  { %312 = vrot.lane.b32.xlu0 %v1889_v18, %s2520_s26 }
 0x23e   :  { %v382_v21 = vpop.f32.mrb[0].mxu1 }
 0x23f   :  { %v383_v22 = vadd.f32 %v382_v21, %v346_v20  ;;  %v1960_v23 = vpop.f32.mrb[1].mxu1 }
 0x240   :  { %v385_v24 = vpop.f32.mrb[2].mxu1 }
 0x241   :  { %v1890_v25 = vpack.c.bf16 %v383_v22, %v383_v22  ;;  %v386_v26 = vadd.f32 %v385_v24, %v346_v20  ;;  %v1961_v27 = vpop.f32.mrb[3].mxu1 }
 0x242   :  { %v293_v29 = vpop.permute.xlu0 %292 }
 0x243   :  { %397 = vst.msk [vmem:[#allocation3] sm:$0xf] %vm289_vm2, %v1890_v25  ;;  %v1891_v28 = vpack.c.bf16 %v386_v26, %v386_v26  ;;  %399 = vrot.lane.b32.xlu1 %v1890_v25, %s2518_s23  ;;  %299 = vst.msk [vmem:[#allocation2 + $0x4] sm:$0xf] %vm289_vm2, %v293_v29 }
 0x245   :  { %398 = vst.msk [vmem:[#allocation3 + $0x10] sm:$0xf] %vm289_vm2, %v1891_v28 }
 0x246   :  { %v302_v30 = vpop.permute.xlu0 %301 }
 0x247   :  { %408 = vrot.lane.b32.xlu1 %v1890_v25, %s2519_s16  ;;  %308 = vst.msk [vmem:[#allocation2 + $0x8] sm:$0xf] %vm289_vm2, %v302_v30 }
 0x24a   :  { %v539_v31 = vld [vmem:[#allocation3] sm:$0xf]  ;;  %v311_v34 = vpop.permute.xlu0 %310  ;;  %v651_v48 = vld [vmem:[#allocation2 + $0x4] sm:$0xf] }
 0x24b   :  { %417 = vrot.lane.b32.xlu1 %v1890_v25, %s2520_s26  ;;  %v546_v32 = vsel %vm541_vm3, %v539_v31, 0  ;;  %317 = vst.msk [vmem:[#allocation2 + $0xc] sm:$0xf] %vm289_vm2, %v311_v34 }
 0x24c   :  { %1971 = vmatpush3.bf16.xpose.msra.mxu1 %v546_v32  ;;  %v1007_v55 = vld [vmem:[#allocation3 + $0x10] sm:$0xf] }
 0x24d   :  { %1982 = vmatprep.subr.bf16.mxu1 %v2515_v0  ;;  %v1014_v57 = vsel %vm541_vm3, %v1007_v55, 0 }
 0x24e   :  { %v449_v35 = vpop.permute.xlu0 %448  ;;  %v769_v53 = vld [vmem:[#allocation2 + $0x8] sm:$0xf] }
 0x24f   :  { %446 = vrot.lane.b32.xlu1 %v2125_v33, %s2499_s18 }
 0x252   :  { %v295_v37 = vpop.permute.xlu0 %294  ;;  %v887_v56 = vld [vmem:[#allocation2 + $0xc] sm:$0xf] }
 0x253   :  { %401 = vrot.lane.b32.xlu1 %v1891_v28, %s2518_s23  ;;  %1973 = vmatmul.mubr.msk.bf16.vlgmr.msra.gmra.mrb[4].mxu1 %vm541_vm3, %v538_v36  ;;  %300 = vst.msk [vmem:[#allocation2 + $0x14] sm:$0xf] %vm289_vm2, %v295_v37 }
 0x254   :  { %1984 = vmatprep.mubr.msk.bf16.mxu1 %vm2516_vm0, %v2515_v0 }
 0x256   :  { %v304_v38 = vpop.permute.xlu0 %303 }
 0x257   :  { %410 = vrot.lane.b32.xlu1 %v1891_v28, %s2519_s16  ;;  %309 = vst.msk [vmem:[#allocation2 + $0x18] sm:$0xf] %vm289_vm2, %v304_v38 }
 0x25a   :  { %v313_v39 = vpop.permute.xlu0 %312  ;;  %v1118_v62 = vld [vmem:[#allocation2 + $0x14] sm:$0xf] }
 0x25b   :  { %419 = vrot.lane.b32.xlu1 %v1891_v28, %s2520_s26  ;;  %318 = vst.msk [vmem:[#allocation2 + $0x1c] sm:$0xf] %vm289_vm2, %v313_v39 }
 0x25e   :  { %v1235_v2 = vld [vmem:[#allocation2 + $0x18] sm:$0xf] }
 0x25f   :  { %452 = vrot.lane.b32.xlu1 %v2775_v7, %s2499_s18  ;;  %s2521_s18 = smov 16  }
 0x262   :  { %v1352_v4 = vld [vmem:[#allocation2 + $0x1c] sm:$0xf] }
 0x2b5   :  { %v400_v40 = vpop.permute.xlu1 %399 }
 0x2b6   :  { %406 = vst.msk [vmem:[#allocation3 + $0x4] sm:$0xf] %vm289_vm2, %v400_v40 }
 0x2b9   :  { %v409_v41 = vpop.permute.xlu1 %408 }
 0x2ba   :  { %415 = vst.msk [vmem:[#allocation3 + $0x8] sm:$0xf] %vm289_vm2, %v409_v41 }
 0x2bd   :  { %v418_v42 = vpop.permute.xlu1 %417  ;;  %v653_v43 = vld [vmem:[#allocation3 + $0x4] sm:$0xf] }
 0x2be   :  { %424 = vst.msk [vmem:[#allocation3 + $0xc] sm:$0xf] %vm289_vm2, %v418_v42  ;;  %v660_v44 = vsel %vm541_vm3, %v653_v43, 0 }
 0x2bf   :  { %1983 = vmatpush3.bf16.xpose.msra.mxu1 %v660_v44 }
 0x2c0   :  { %1994 = vmatprep.subr.bf16.mxu1 %v2515_v0 }
 0x2c1   :  { %v447_v45 = vpop.permute.xlu1 %446  ;;  %v771_v46 = vld [vmem:[#allocation3 + $0x8] sm:$0xf] }
 0x2c2   :  { %1963 = vmatpush3.bf16.msra.mxu0 %v447_v45  ;;  %v778_v49 = vsel %vm541_vm3, %v771_v46, 0 }
 0x2c3   :  { %1964 = vmatprep.subr.bf16.mxu0 %v2515_v0 }
 0x2c5   :  { %v402_v47 = vpop.permute.xlu1 %401  ;;  %v889_v51 = vld [vmem:[#allocation3 + $0xc] sm:$0xf] }
 0x2c6   :  { %407 = vst.msk [vmem:[#allocation3 + $0x14] sm:$0xf] %vm289_vm2, %v402_v47  ;;  %1965 = vmatpush3.bf16.msra.mxu0 %v449_v35  ;;  %1985 = vmatmul.mubr.msk.bf16.vlgmr.msra.gmra.mrb[8].mxu1 %vm541_vm3, %v651_v48  ;;  %v896_v54 = vsel %vm541_vm3, %v889_v51, 0 }
 0x2c7   :  { %1995 = vmatpush3.bf16.xpose.msra.mxu1 %v778_v49  ;;  %1996 = vmatprep.mubr.msk.bf16.mxu1 %vm2516_vm0, %v2515_v0 }
 0x2c8   :  { %2006 = vmatprep.subr.bf16.mxu1 %v2515_v0  ;;  %1976 = vmatprep.subr.bf16.mxu0 %v2515_v0 }
 0x2c9   :  { %v411_v50 = vpop.permute.xlu1 %410  ;;  %1967 = vmatmul.mubr.msk.bf16.vlgmr.msra.gmra.mrb[4].mxu0 %vm236_vm1, %v2781_v8 }
 0x2ca   :  { %416 = vst.msk [vmem:[#allocation3 + $0x18] sm:$0xf] %vm289_vm2, %v411_v50  ;;  %1978 = vmatprep.mubr.msk.bf16.mxu0 %vm2516_vm0, %v2515_v0 }
 0x2cd   :  { %v420_v52 = vpop.permute.xlu1 %419  ;;  %v1120_v58 = vld [vmem:[#allocation3 + $0x14] sm:$0xf] }
 0x2ce   :  { %425 = vst.msk [vmem:[#allocation3 + $0x1c] sm:$0xf] %vm289_vm2, %v420_v52  ;;  %1997 = vmatmul.mubr.msk.bf16.vlgmr.msra.gmra.mrb[12].mxu1 %vm541_vm3, %v769_v53  ;;  %v1127_v60 = vsel %vm541_vm3, %v1120_v58, 0 }
 0x2cf   :  { %2007 = vmatpush3.bf16.xpose.msra.mxu1 %v896_v54  ;;  %2008 = vmatprep.mubr.msk.bf16.mxu1 %vm2516_vm0, %v2515_v0 }
 0x2d0   :  { %2018 = vmatprep.subr.bf16.mxu1 %v2515_v0 }
 0x2d1   :  { %v1237_v61 = vld [vmem:[#allocation3 + $0x18] sm:$0xf]  ;;  %v453_v13 = vpop.permute.xlu1 %452 }
 0x2d2   :  { %v1244_v63 = vsel %vm541_vm3, %v1237_v61, 0 }
 0x2d5   :  { %v1354_v1 = vld [vmem:[#allocation3 + $0x1c] sm:$0xf] }
 0x2d6   :  { %2009 = vmatmul.mubr.msk.bf16.vlgmr.msra.gmra.mrb[16].mxu1 %vm541_vm3, %v887_v56  ;;  %v1361_v3 = vsel %vm541_vm3, %v1354_v1, 0 }
 0x2d7   :  { %2019 = vmatpush3.bf16.xpose.msra.mxu1 %v1014_v57  ;;  %2020 = vmatprep.mubr.msk.bf16.mxu1 %vm2516_vm0, %v2515_v0 }
 0x2d8   :  { %2030 = vmatprep.subr.bf16.mxu1 %v2515_v0 }
 0x2de   :  { %2021 = vmatmul.mubr.msk.bf16.vlgmr.msra.gmra.mrb[20].mxu1 %vm541_vm3, %v1005_v59 }
 0x2df   :  { %2031 = vmatpush3.bf16.xpose.msra.mxu1 %v1127_v60  ;;  %2032 = vmatprep.mubr.msk.bf16.mxu1 %vm2516_vm0, %v2515_v0 }
 0x2e0   :  { %2042 = vmatprep.subr.bf16.mxu1 %v2515_v0 }
 0x2e6   :  { %2033 = vmatmul.mubr.msk.bf16.vlgmr.msra.gmra.mrb[24].mxu1 %vm541_vm3, %v1118_v62 }
 0x2e7   :  { %2043 = vmatpush3.bf16.xpose.msra.mxu1 %v1244_v63  ;;  %2044 = vmatprep.mubr.msk.bf16.mxu1 %vm2516_vm0, %v2515_v0 }
 0x2e8   :  { %2054 = vmatprep.subr.bf16.mxu1 %v2515_v0 }
 0x2ee   :  { %2045 = vmatmul.mubr.msk.bf16.vlgmr.msra.gmra.mrb[28].mxu1 %vm541_vm3, %v1235_v2 }
 0x2ef   :  { %2055 = vmatpush3.bf16.xpose.msra.mxu1 %v1361_v3  ;;  %2056 = vmatprep.mubr.msk.bf16.mxu1 %vm2516_vm0, %v2515_v0 }
 0x2f0   :  { %2066 = vmatprep.subr.bf16.mxu1 %v2515_v0 }
 0x2f6   :  { %2057 = vmatmul.mubr.msk.bf16.vlgmr.msra.gmra.mrb[32].mxu1 %vm541_vm3, %v1352_v4 }
 0x2f7   :  { %2070 = vmatprep.mubr.msk.bf16.mxu1 %vm2516_vm0, %v2515_v0 }
 0x326   :  { %v2874_v7 = vpop.f32.mrb[4].mxu1 }
 0x327   :  { %v1974_v8 = vpop.f32.mrb[5].mxu1  ;;  %v588_v42 = vsel %vm541_vm3, %v2874_v7, -inf }
 0x328   :  { %v585_v9 = vpop.f32.mrb[6].mxu1 }
 0x329   :  { %v1975_v10 = vpop.f32.mrb[7].mxu1 }
 0x399   :  { %v2876_v11 = vpop.f32.mrb[8].mxu1 }
 0x39a   :  { %v1986_v12 = vpop.f32.mrb[9].mxu1  ;;  %v702_v48 = vsel %vm541_vm3, %v2876_v11, -inf }
 0x39b   :  { %v699_v14 = vpop.f32.mrb[10].mxu1 }
 0x39c   :  { %v489_v15 = vpop.f32.mrb[4].mxu0  ;;  %v1987_v16 = vpop.f32.mrb[11].mxu1 }
 0x39d   :  { %v490_v17 = vadd.f32 %v489_v15, %v453_v13  ;;  %v1968_v18 = vpop.f32.mrb[5].mxu0 }
 0x39e   :  { %v492_v19 = vpop.f32.mrb[6].mxu0 }
 0x39f   :  { %v1892_v20 = vpack.c.bf16 %v490_v17, %v490_v17  ;;  %v493_v21 = vadd.f32 %v492_v19, %v453_v13  ;;  %v1969_v22 = vpop.f32.mrb[7].mxu0 }
 0x3a1   :  { %504 = vst.msk [vmem:[#allocation4] sm:$0xf] %vm289_vm2, %v1892_v20  ;;  %v1893_v23 = vpack.c.bf16 %v493_v21, %v493_v21  ;;  %v2879_v24 = vpop.f32.mrb[12].mxu1  ;;  %515 = vrot.lane.b32.xlu0 %v1892_v20, %s2519_s16  ;;  %506 = vrot.lane.b32.xlu1 %v1892_v20, %s2518_s23 }
 0x3a2   :  { %v1998_v25 = vpop.f32.mrb[13].mxu1  ;;  %v820_v46 = vsel %vm541_vm3, %v2879_v24, -inf }
 0x3a3   :  { %505 = vst.msk [vmem:[#allocation4 + $0x10] sm:$0xf] %vm289_vm2, %v1893_v23  ;;  %v817_v26 = vpop.f32.mrb[14].mxu1 }
 0x3a4   :  { %v1999_v27 = vpop.f32.mrb[15].mxu1 }
 0x3a8   :  { %v540_v28 = vld [vmem:[#allocation4] sm:$0xf] }
 0x3a9   :  { %v2884_v29 = vpop.f32.mrb[16].mxu1  ;;  %v603_v30 = vsel %vm601_vm4, %v540_v28, 0 }
 0x3aa   :  { %v2010_v31 = vpop.f32.mrb[17].mxu1  ;;  %1977 = vmatpush3.bf16.msra.mxu0 %v603_v30  ;;  %v938_v49 = vsel %vm541_vm3, %v2884_v29, -inf  ;;  %v1009_v30 = vld [vmem:[#allocation4 + $0x10] sm:$0xf] }
 0x3ab   :  { %v935_v32 = vpop.f32.mrb[18].mxu1  ;;  %1988 = vmatprep.subr.bf16.mxu0 %v2515_v0 }
 0x3ac   :  { %v2011_v33 = vpop.f32.mrb[19].mxu1  ;;  %v1070_v32 = vsel %vm601_vm4, %v1009_v30, 0 }
 0x3b1   :  { %v2888_v34 = vpop.f32.mrb[20].mxu1 }
 0x3b2   :  { %v2022_v35 = vpop.f32.mrb[21].mxu1  ;;  %v1056_v55 = vsel %vm541_vm3, %v2888_v34, -inf }
 0x3b3   :  { %v1053_v36 = vpop.f32.mrb[22].mxu1 }
 0x3b4   :  { %v2023_v37 = vpop.f32.mrb[23].mxu1 }
 0x3b9   :  { %v2890_v38 = vpop.f32.mrb[24].mxu1 }
 0x3ba   :  { %v2034_v39 = vpop.f32.mrb[25].mxu1  ;;  %v1169_v54 = vsel %vm541_vm3, %v2890_v38, -inf }
 0x3bb   :  { %v1166_v40 = vpop.f32.mrb[26].mxu1 }
 0x3bc   :  { %v2035_v41 = vpop.f32.mrb[27].mxu1 }
 0x3c0   :  { %589 = vmax.xlane.f32.xlu0 %v588_v42 }
 0x3c1   :  { %v2894_v43 = vpop.f32.mrb[28].mxu1 }
 0x3c2   :  { %v2046_v44 = vpop.f32.mrb[29].mxu1  ;;  %v1286_v57 = vsel %vm541_vm3, %v2894_v43, -inf }
 0x3c3   :  { %v1283_v45 = vpop.f32.mrb[30].mxu1 }
 0x3c4   :  { %v2047_v47 = vpop.f32.mrb[31].mxu1  ;;  %821 = vmax.xlane.f32.xlu0 %v820_v46 }
 0x3c5   :  { %703 = vmax.xlane.f32.xlu1 %v702_v48 }
 0x3c8   :  { %939 = vmax.xlane.f32.xlu0 %v938_v49 }
 0x3c9   :  { %v2902_v50 = vpop.f32.mrb[32].mxu1 }
 0x3ca   :  { %v2058_v51 = vpop.f32.mrb[33].mxu1  ;;  %v1403_v56 = vsel %vm541_vm3, %v2902_v50, -inf }
 0x3cb   :  { %v1400_v52 = vpop.f32.mrb[34].mxu1 }
 0x3cc   :  { %v2059_v53 = vpop.f32.mrb[35].mxu1 }
 0x3d6   :  { %508 = vrot.lane.b32.xlu1 %v1893_v23, %s2518_s23 }
 0x3de   :  { %524 = vrot.lane.b32.xlu0 %v1892_v20, %s2520_s26 }
 0x3fa   :  { %1170 = vmax.xlane.f32.xlu1 %v1169_v54 }
 0x3fd   :  { %1057 = vmax.xlane.f32.xlu0 %v1056_v55 }
 0x3fe   :  { %1404 = vmax.xlane.f32.xlu1 %v1403_v56 }
 0x401   :  { %1287 = vmax.xlane.f32.xlu0 %v1286_v57 }
 0x40f   :  { %526 = vrot.lane.b32.xlu1 %v1893_v23, %s2520_s26 }
 0x413   :  { %v516_v58 = vpop.permute.xlu0 %515  ;;  %v507_v59 = vpop.permute.xlu1 %506 }
 0x414   :  { %522 = vst.msk [vmem:[#allocation4 + $0x8] sm:$0xf] %vm289_vm2, %v516_v58  ;;  %513 = vst.msk [vmem:[#allocation4 + $0x4] sm:$0xf] %vm289_vm2, %v507_v59 }
 0x417   :  { %517 = vrot.lane.b32.xlu0 %v1893_v23, %s2519_s16 }
 0x41b   :  { %v655_v15 = vld [vmem:[#allocation4 + $0x4] sm:$0xf]  ;;  %v773_v20 = vld [vmem:[#allocation4 + $0x8] sm:$0xf] }
 0x44d   :  { %v590_v60 = vpop.xlane.xlu0 %589 }
 0x44e   :  { %v591_v61 = vsub.f32 %v2874_v7, %v590_v60 }
 0x450   :  { %v592_v62 = vmul.f32 1.442695, %v591_v61 }
 0x451   :  { %v822_v63 = vpop.xlane.xlu0 %821 }
 0x452   :  { %2134 = vpow2.f32 %v592_v62  ;;  %v823_v1 = vsub.f32 %v2879_v24, %v822_v63  ;;  %v704_v2 = vpop.xlane.xlu1 %703  ;;  %v834_v24 = vsel %vm601_vm4, %v773_v20, 0 }
 0x453   :  { %v705_v3 = vsub.f32 %v2876_v11, %v704_v2  ;;  %v716_v11 = vsel %vm601_vm4, %v655_v15, 0 }
 0x454   :  { %v824_v4 = vmul.f32 1.442695, %v823_v1 }
 0x455   :  { %v706_v8 = vmul.f32 1.442695, %v705_v3  ;;  %v940_v9 = vpop.xlane.xlu0 %939 }
 0x456   :  { %v941_v10 = vsub.f32 %v2884_v29, %v940_v9  ;;  %v509_v12 = vpop.permute.xlu1 %508 }
 0x457   :  { %2136 = vpow2.f32 %v706_v8  ;;  %514 = vst.msk [vmem:[#allocation4 + $0x14] sm:$0xf] %vm289_vm2, %v509_v12 }
 0x458   :  { %2138 = vpow2.f32 %v824_v4  ;;  %v942_v13 = vmul.f32 1.442695, %v941_v10 }
 0x459   :  { %v525_v7 = vpop.permute.xlu0 %524 }
 0x45a   :  { %531 = vst.msk [vmem:[#allocation4 + $0xc] sm:$0xf] %vm289_vm2, %v525_v7  ;;  %2140 = vpow2.f32 %v942_v13 }
 0x45c   :  { %v2135_v14 = vpop.eup %2134 }
 0x45d   :  { %v597_v16 = vpack.c.bf16 %v2135_v14, %v2135_v14  ;;  %v594_v28 = vsel %vm541_vm3, %v2135_v14, 0.0 }
 0x45f   :  { %1979 = vmatmul.mubr.msk.bf16.vlgmr.msra.gmra.mrb[8].mxu0 %vm541_vm3, %v597_v16 }
 0x460   :  { %1989 = vmatpush3.bf16.msra.mxu0 %v716_v11  ;;  %1990 = vmatprep.mubr.msk.bf16.mxu0 %vm2516_vm0, %v2515_v0 }
 0x461   :  { %v2137_v17 = vpop.eup %2136  ;;  %2000 = vmatprep.subr.bf16.mxu0 %v2515_v0  ;;  %v891_v26 = vld [vmem:[#allocation4 + $0xc] sm:$0xf] }
 0x462   :  { %v708_v18 = vsel %vm541_vm3, %v2137_v17, 0.0  ;;  %v2139_v19 = vpop.eup %2138  ;;  %v711_v21 = vpack.c.bf16 %v2137_v17, %v2137_v17  ;;  %v952_v29 = vsel %vm601_vm4, %v891_v26, 0 }
 0x463   :  { %709 = vadd.xlane.f32.xlu1 %v708_v18  ;;  %v826_v22 = vsel %vm541_vm3, %v2139_v19, 0.0  ;;  %v829_v27 = vpack.c.bf16 %v2139_v19, %v2139_v19 }
 0x464   :  { %v2141_v23 = vpop.eup %2140 }
 0x465   :  { %v944_v25 = vsel %vm541_vm3, %v2141_v23, 0.0  ;;  %v947_v31 = vpack.c.bf16 %v2141_v23, %v2141_v23 }
 0x467   :  { %1991 = vmatmul.mubr.msk.bf16.vlgmr.msra.gmra.mrb[12].mxu0 %vm541_vm3, %v711_v21  ;;  %827 = vadd.xlane.f32.xlu1 %v826_v22 }
 0x468   :  { %2001 = vmatpush3.bf16.msra.mxu0 %v834_v24  ;;  %2002 = vmatprep.mubr.msk.bf16.mxu0 %vm2516_vm0, %v2515_v0 }
 0x469   :  { %2012 = vmatprep.subr.bf16.mxu0 %v2515_v0 }
 0x46b   :  { %945 = vadd.xlane.f32.xlu1 %v944_v25 }
 0x46f   :  { %2003 = vmatmul.mubr.msk.bf16.vlgmr.msra.gmra.mrb[16].mxu0 %vm541_vm3, %v829_v27  ;;  %595 = vadd.xlane.f32.xlu1 %v594_v28 }
 0x470   :  { %2013 = vmatpush3.bf16.msra.mxu0 %v952_v29  ;;  %2014 = vmatprep.mubr.msk.bf16.mxu0 %vm2516_vm0, %v2515_v0 }
 0x471   :  { %2024 = vmatprep.subr.bf16.mxu0 %v2515_v0 }
 0x477   :  { %2015 = vmatmul.mubr.msk.bf16.vlgmr.msra.gmra.mrb[20].mxu0 %vm541_vm3, %v947_v31 }
 0x478   :  { %2025 = vmatpush3.bf16.msra.mxu0 %v1070_v32  ;;  %2026 = vmatprep.mubr.msk.bf16.mxu0 %vm2516_vm0, %v2515_v0 }
 0x479   :  { %2036 = vmatprep.subr.bf16.mxu0 %v2515_v0 }
 0x487   :  { %v1171_v33 = vpop.xlane.xlu1 %1170 }
 0x488   :  { %v1172_v35 = vsub.f32 %v2890_v38, %v1171_v33 }
 0x48a   :  { %v1173_v36 = vmul.f32 1.442695, %v1172_v35  ;;  %v1058_v37 = vpop.xlane.xlu0 %1057 }
 0x48b   :  { %v1059_v39 = vsub.f32 %v2888_v34, %v1058_v37  ;;  %v1405_v40 = vpop.xlane.xlu1 %1404 }
 0x48c   :  { %2142 = vpow2.f32 %v1173_v36  ;;  %v1406_v42 = vsub.f32 %v2902_v50, %v1405_v40  ;;  %v1122_v50 = vld [vmem:[#allocation4 + $0x14] sm:$0xf] }
 0x48d   :  { %v1060_v41 = vmul.f32 1.442695, %v1059_v39 }
 0x48e   :  { %v1288_v44 = vpop.xlane.xlu0 %1287  ;;  %v1407_v47 = vmul.f32 1.442695, %v1406_v42 }
 0x48f   :  { %2144 = vpow2.f32 %v1060_v41  ;;  %v1289_v45 = vsub.f32 %v2894_v43, %v1288_v44  ;;  %v527_v46 = vpop.permute.xlu1 %526  ;;  %v1183_v43 = vsel %vm601_vm4, %v1122_v50, 0 }
 0x490   :  { %532 = vst.msk [vmem:[#allocation4 + $0x1c] sm:$0xf] %vm289_vm2, %v527_v46 }
 0x491   :  { %v1290_v48 = vmul.f32 1.442695, %v1289_v45 }
 0x492   :  { %v518_v49 = vpop.permute.xlu0 %517 }
 0x493   :  { %2146 = vpow2.f32 %v1290_v48  ;;  %523 = vst.msk [vmem:[#allocation4 + $0x18] sm:$0xf] %vm289_vm2, %v518_v49 }
 0x494   :  { %2148 = vpow2.f32 %v1407_v47 }
 0x496   :  { %v2143_v34 = vpop.eup %2142 }
 0x497   :  { %v1175_v38 = vsel %vm541_vm3, %v2143_v34, 0.0  ;;  %v1178_v58 = vpack.c.bf16 %v2143_v34, %v2143_v34  ;;  %v1356_v61 = vld [vmem:[#allocation4 + $0x1c] sm:$0xf] }
 0x498   :  { %1176 = vadd.xlane.f32.xlu0 %v1175_v38  ;;  %v1417_v63 = vsel %vm601_vm4, %v1356_v61, 0  ;;  %v2126_v38 = vld [vmem:[#allocation12] sm:$0xff]  }
 0x499   :  { %v2145_v51 = vpop.eup %2144  ;;  %2067 = vmatpush3.bf16.msra.mxu1 %v2126_v38 }
 0x49a   :  { %v1065_v52 = vpack.c.bf16 %v2145_v51, %v2145_v51  ;;  %v1239_v56 = vld [vmem:[#allocation4 + $0x18] sm:$0xf]  ;;  %v1062_v60 = vsel %vm541_vm3, %v2145_v51, 0.0  ;;  %2068 = vmatprep.subr.bf16.mxu1 %v2515_v0 }
 0x49b   :  { %v1300_v59 = vsel %vm601_vm4, %v1239_v56, 0 }
 0x49c   :  { %2027 = vmatmul.mubr.msk.bf16.vlgmr.msra.gmra.mrb[24].mxu0 %vm541_vm3, %v1065_v52  ;;  %v2127_v52 = vld [vmem:[#allocation12 + $0x8] sm:$0xff]  }
 0x49d   :  { %v2147_v53 = vpop.eup %2146  ;;  %2037 = vmatpush3.bf16.msra.mxu0 %v1183_v43  ;;  %2038 = vmatprep.mubr.msk.bf16.mxu0 %vm2516_vm0, %v2515_v0 }
 0x49e   :  { %v1292_v54 = vsel %vm541_vm3, %v2147_v53, 0.0  ;;  %2048 = vmatprep.subr.bf16.mxu0 %v2515_v0  ;;  %v2149_v55 = vpop.eup %2148  ;;  %v1295_v62 = vpack.c.bf16 %v2147_v53, %v2147_v53  ;;  %2069 = vmatpush3.bf16.msra.mxu1 %v2127_v52  ;;  %v2133_v52 = vld [vmem:[#allocation18 + $0x18] sm:$0xff]  }
 0x49f   :  { %1293 = vadd.xlane.f32.xlu0 %v1292_v54  ;;  %v1409_v57 = vsel %vm541_vm3, %v2149_v55, 0.0  ;;  %v1412_v1 = vpack.c.bf16 %v2149_v55, %v2149_v55  ;;  %2082 = vmatprep.subr.bf16.mxu1 %v2515_v0 }
 0x4a3   :  { %1410 = vadd.xlane.f32.xlu0 %v1409_v57 }
 0x4a4   :  { %2039 = vmatmul.mubr.msk.bf16.vlgmr.msra.gmra.mrb[28].mxu0 %vm541_vm3, %v1178_v58 }
 0x4a5   :  { %2049 = vmatpush3.bf16.msra.mxu0 %v1300_v59  ;;  %2050 = vmatprep.mubr.msk.bf16.mxu0 %vm2516_vm0, %v2515_v0 }
 0x4a6   :  { %2060 = vmatprep.subr.bf16.mxu0 %v2515_v0 }
 0x4a7   :  { %1063 = vadd.xlane.f32.xlu0 %v1062_v60 }
 0x4ac   :  { %2051 = vmatmul.mubr.msk.bf16.vlgmr.msra.gmra.mrb[32].mxu0 %vm541_vm3, %v1295_v62 }
 0x4ad   :  { %2061 = vmatpush3.bf16.msra.mxu0 %v1417_v63  ;;  %2062 = vmatprep.mubr.msk.bf16.mxu0 %vm2516_vm0, %v2515_v0 }
 0x4ae   :  { %2074 = vmatprep.subr.bf16.mxu0 %v2515_v0 }
 0x4b4   :  { %2063 = vmatmul.mubr.msk.bf16.vlgmr.msra.gmra.mrb[36].mxu0 %vm541_vm3, %v1412_v1 }
 0x4b5   :  { %2078 = vmatprep.mubr.msk.bf16.mxu0 %vm2516_vm0, %v2515_v0 }
 0x4f0   :  { %v710_v2 = vpop.xlane.xlu1 %709 }
 0x4f4   :  { %v828_v3 = vpop.xlane.xlu1 %827 }
 0x4f8   :  { %v946_v4 = vpop.xlane.xlu1 %945 }
 0x4fc   :  { %v596_v8 = vpop.xlane.xlu1 %595 }
 0x4fd   :  { %2150 = vrcp.f32 %v596_v8 }
 0x4fe   :  { %2152 = vrcp.f32 %v710_v2 }
 0x4ff   :  { %2154 = vrcp.f32 %v828_v3 }
 0x500   :  { %2156 = vrcp.f32 %v946_v4 }
 0x507   :  { %v2151_v9 = vpop.eup %2150 }
 0x508   :  { %v2153_v15 = vpop.eup %2152 }
 0x509   :  { %v2155_v20 = vpop.eup %2154 }
 0x50a   :  { %v2157_v26 = vpop.eup %2156 }
 0x525   :  { %v1177_v32 = vpop.xlane.xlu0 %1176 }
 0x52c   :  { %v1294_v33 = vpop.xlane.xlu0 %1293 }
 0x530   :  { %v1411_v35 = vpop.xlane.xlu0 %1410 }
 0x532   :  { %v639_v10 = vpop.f32.mrb[8].mxu0 }
 0x533   :  { %v646_v12 = vmul.f32 %v2151_v9, %v639_v10  ;;  %v1980_v13 = vpop.f32.mrb[9].mxu0 }
 0x534   :  { %v642_v7 = vpop.f32.mrb[10].mxu0  ;;  %v1064_v36 = vpop.xlane.xlu0 %1063 }
 0x535   :  { %647 = vst.msk [vmem:[#allocation5] sm:$0xff] %vm541_vm3, %v646_v12  ;;  %v1981_v14 = vpop.f32.mrb[11].mxu0  ;;  %2158 = vrcp.f32 %v1064_v36  ;;  %v1870_v12 = vld [vmem:[#allocation14] ss:$0 sm:$0xff] }
 0x536   :  { %2160 = vrcp.f32 %v1177_v32  ;;  %v2131_v32 = vld [vmem:[#allocation18 + $0x8] sm:$0xff]  }
 0x537   :  { %2162 = vrcp.f32 %v1294_v33 }
 0x538   :  { %2164 = vrcp.f32 %v1411_v35 }
 0x53a   :  { %v752_v16 = vpop.f32.mrb[12].mxu0 }
 0x53b   :  { %v759_v11 = vmul.f32 %v2153_v15, %v752_v16  ;;  %v1992_v17 = vpop.f32.mrb[13].mxu0 }
 0x53c   :  { %v755_v18 = vpop.f32.mrb[14].mxu0 }
 0x53d   :  { %761 = vrot.lane.b32.xlu1 %v759_v11, %s2508_s21  ;;  %v1993_v19 = vpop.f32.mrb[15].mxu0 }
 0x53f   :  { %v2159_v37 = vpop.eup %2158 }
 0x540   :  { %v2161_v45 = vpop.eup %2160 }
 0x541   :  { %v2163_v51 = vpop.eup %2162 }
 0x542   :  { %v870_v21 = vpop.f32.mrb[16].mxu0  ;;  %v2165_v56 = vpop.eup %2164 }
 0x543   :  { %v877_v22 = vmul.f32 %v2155_v20, %v870_v21  ;;  %v2004_v23 = vpop.f32.mrb[17].mxu0 }
 0x544   :  { %v873_v24 = vpop.f32.mrb[18].mxu0 }
 0x545   :  { %879 = vrot.lane.b32.xlu1 %v877_v22, %s2521_s18  ;;  %v2005_v25 = vpop.f32.mrb[19].mxu0 }
 0x54a   :  { %v988_v27 = vpop.f32.mrb[20].mxu0 }
 0x54b   :  { %v995_v28 = vmul.f32 %v2157_v26, %v988_v27  ;;  %v2016_v29 = vpop.f32.mrb[21].mxu0 }
 0x54c   :  { %v991_v30 = vpop.f32.mrb[22].mxu0 }
 0x54d   :  { %v2017_v31 = vpop.f32.mrb[23].mxu0  ;;  %v2128_v30 = vld [vmem:[#allocation15] sm:$0xff]  }
 0x54e   :  { %2075 = vmatpush3.bf16.msra.mxu0 %v2128_v30  ;;  %v2130_v31 = vld [vmem:[#allocation18] sm:$0xff]   ;;  %v1887_v30 = vld [vmem:[#allocation26] ss:$0 sm:$0xff] }
 0x54f   :  { %2076 = vmatprep.subr.bf16.mxu0 %v2515_v0 }
 0x56f   :  { %v1106_v39 = vpop.f32.mrb[24].mxu0 }
 0x570   :  { %v1113_v40 = vmul.f32 %v2159_v37, %v1106_v39  ;;  %v2028_v41 = vpop.f32.mrb[25].mxu0 }
 0x571   :  { %v1109_v42 = vpop.f32.mrb[26].mxu0 }
 0x572   :  { %1114 = vst.msk [vmem:[#allocation5 + $0x8] sm:$0xff] %vm541_vm3, %v1113_v40  ;;  %v2029_v44 = vpop.f32.mrb[27].mxu0 }
 0x573   :  { %v1874_v44 = vld [vmem:[#allocation21] ss:$0 sm:$0xff] }
 0x577   :  { %v1219_v46 = vpop.f32.mrb[28].mxu0 }
 0x578   :  { %v1226_v47 = vmul.f32 %v2161_v45, %v1219_v46  ;;  %v2040_v48 = vpop.f32.mrb[29].mxu0 }
 0x579   :  { %v1222_v49 = vpop.f32.mrb[30].mxu0  ;;  %v1875_v48 = vld [vmem:[#allocation23] ss:$0 sm:$0xff] }
 0x57a   :  { %1228 = vrot.lane.b32.xlu0 %v1226_v47, %s2508_s21  ;;  %v2041_v34 = vpop.f32.mrb[31].mxu0 }
 0x57e   :  { %997 = vrot.lane.b32.xlu0 %v995_v28, %s2522_s0 }
 0x57f   :  { %v1336_v50 = vpop.f32.mrb[32].mxu0 }
 0x580   :  { %v1343_v43 = vmul.f32 %v2163_v51, %v1336_v50  ;;  %v2052_v53 = vpop.f32.mrb[33].mxu0  ;;  %v2132_v50 = vld [vmem:[#allocation18 + $0x10] sm:$0xff]  }
 0x581   :  { %v1339_v54 = vpop.f32.mrb[34].mxu0 }
 0x582   :  { %1345 = vrot.lane.b32.xlu1 %v1343_v43, %s2521_s18  ;;  %v2053_v55 = vpop.f32.mrb[35].mxu0  ;;  %v1876_v43 = vld [vmem:[#allocation17] ss:$0 sm:$0xff] }
 0x587   :  { %v1453_v57 = vpop.f32.mrb[36].mxu0 }
 0x588   :  { %v1460_v58 = vmul.f32 %v2165_v56, %v1453_v57  ;;  %v2064_v59 = vpop.f32.mrb[37].mxu0 }
 0x589   :  { %v1456_v60 = vpop.f32.mrb[38].mxu0 }
 0x58a   :  { %1462 = vrot.lane.b32.xlu1 %v1460_v58, %s2522_s0  ;;  %v2065_v61 = vpop.f32.mrb[39].mxu0 }
 0x5af   :  { %v762_v62 = vpop.permute.xlu1 %761 }
 0x5b0   :  { %765 = vst.msk [vmem:[#allocation5] sm:$0xff] %vm764_vm5, %v762_v62  ;;  %v1880_v62 = vld [vmem:[#allocation20] ss:$0 sm:$0xff] }
 0x5b7   :  { %v880_v63 = vpop.permute.xlu1 %879 }
 0x5b8   :  { %883 = vst.msk [vmem:[#allocation5] sm:$0xff] %vm882_vm6, %v880_v63 }
 0x5ec   :  { %v1229_v1 = vpop.permute.xlu0 %1228 }
 0x5ed   :  { %1231 = vst.msk [vmem:[#allocation5 + $0x8] sm:$0xff] %vm764_vm5, %v1229_v1 }
 0x5f0   :  { %v998_v2 = vpop.permute.xlu0 %997 }
 0x5f1   :  { %1001 = vst.msk [vmem:[#allocation5] sm:$0xff] %vm1000_vm7, %v998_v2 }
 0x5f4   :  { %v1346_v3 = vpop.permute.xlu1 %1345 }
 0x5f5   :  { %1348 = vst.msk [vmem:[#allocation5 + $0x8] sm:$0xff] %vm882_vm6, %v1346_v3 }
 0x5f8   :  { %v1469_v8 = vld [vmem:[#allocation5] sm:$0xff] }
 0x5fc   :  { %v1463_v4 = vpop.permute.xlu1 %1462 }
 0x5fd   :  { %1465 = vst.msk [vmem:[#allocation5 + $0x8] sm:$0xff] %vm1000_vm7, %v1463_v4 }
 0x604   :  { %v1470_v9 = vld [vmem:[#allocation5 + $0x8] sm:$0xff] }
 0x605   :  { %v1471_v10 = vpack.c.bf16 %v1470_v9, %v1469_v8 }
 0x607   :  { %2071 = vmatmul.mubr.msk.bf16.vlgmr.msra.gmra.mrb[36].mxu1 %vm236_vm1, %v1471_v10 }
 0x608   :  { %2090 = vmatprep.mubr.msk.bf16.mxu1 %vm2516_vm0, %v2515_v0  ;;  %2083 = vmatpush3.bf16.msra.mxu1 %v2130_v31 }
 0x609   :  { %2084 = vmatprep.subr.bf16.mxu1 %v2515_v0 }
 0x60c   :  { %2085 = vmatpush3.bf16.msra.mxu1 %v2131_v32 }
 0x60d   :  { %2086 = vmatprep.subr.bf16.mxu1 %v2515_v0 }
 0x610   :  { %2087 = vmatpush3.bf16.msra.mxu1 %v2132_v50 }
 0x611   :  { %2088 = vmatprep.subr.bf16.mxu1 %v2515_v0 }
 0x614   :  { %2089 = vmatpush3.bf16.msra.mxu1 %v2133_v52 }
 0x6da   :  { %v1533_v13 = vpop.f32.mrb[36].mxu1 }
 0x6db   :  { %v1534_v7 = vadd.f32 %v1870_v12, %v1533_v13  ;;  %v2072_v14 = vpop.f32.mrb[37].mxu1 }
 0x6dc   :  { %v1536_v15 = vpop.f32.mrb[38].mxu1 }
 0x6dd   :  { %v1537_v16 = vadd.f32 %v1870_v12, %v1536_v15  ;;  %v2073_v11 = vpop.f32.mrb[39].mxu1  ;;  %v1540_v17 = vadd.f32 %v1534_v7, %v2771_v5 }
 0x6df   :  { %v1544_v18 = vsel %vm236_vm1, %v1540_v17, 0.0  ;;  %v1541_v19 = vadd.f32 %v1537_v16, %v2773_v6  ;;  %v2129_v6 = vld [vmem:[#allocation15 + $0x8] sm:$0xff]  }
 0x6e0   :  { %1545 = vadd.xlane.f32.xlu0 %v1544_v18  ;;  %2077 = vmatpush3.bf16.msra.mxu0 %v2129_v6 }
 0x6e1   :  { %v1547_v20 = vsel %vm236_vm1, %v1541_v19, 0.0 }
 0x6e2   :  { %1548 = vadd.xlane.f32.xlu1 %v1547_v20 }
 0x76d   :  { %v1546_v21 = vpop.xlane.xlu0 %1545 }
 0x76e   :  { %v1551_v22 = vmul.f32 0.03125, %v1546_v21 }
 0x76f   :  { %v1549_v23 = vpop.xlane.xlu1 %1548 }
 0x770   :  { %v1553_v24 = vsub.f32 %v1540_v17, %v1551_v22  ;;  %v1552_v25 = vmul.f32 0.03125, %v1549_v23 }
 0x772   :  { %v1554_v26 = vsub.f32 %v1541_v19, %v1552_v25  ;;  %v1555_v27 = vmul.f32 %v1553_v24, %v1553_v24 }
 0x774   :  { %v1557_v28 = vsel %vm236_vm1, %v1555_v27, 0.0  ;;  %v1556_v29 = vmul.f32 %v1554_v26, %v1554_v26 }
 0x775   :  { %1558 = vadd.xlane.f32.xlu0 %v1557_v28  ;;  %v1886_v28 = vld [vmem:[#allocation24] ss:$0 sm:$0xff] }
 0x776   :  { %v1560_v5 = vsel %vm236_vm1, %v1556_v29, 0.0 }
 0x779   :  { %1561 = vadd.xlane.f32.xlu0 %v1560_v5 }
 0x802   :  { %v1559_v33 = vpop.xlane.xlu0 %1558 }
 0x803   :  { %v1563_v35 = vmul.f32 0.03125, %v1559_v33 }
 0x805   :  { %v1565_v36 = vadd.f32 1e-05, %v1563_v35 }
 0x806   :  { %v1562_v37 = vpop.xlane.xlu0 %1561 }
 0x807   :  { %2166 = vrsqrt.f32 %v1565_v36  ;;  %v1564_v39 = vmul.f32 0.03125, %v1562_v37 }
 0x809   :  { %v1566_v40 = vadd.f32 1e-05, %v1564_v39 }
 0x80b   :  { %2168 = vrsqrt.f32 %v1566_v40 }
 0x811   :  { %v2167_v41 = vpop.eup %2166 }
 0x812   :  { %v1569_v42 = vmul.f32 %v2167_v41, %v1553_v24 }
 0x814   :  { %v1577_v46 = vmul.f32 %v1874_v44, %v1569_v42 }
 0x815   :  { %v2169_v45 = vpop.eup %2168 }
 0x816   :  { %v1570_v47 = vmul.f32 %v2169_v45, %v1554_v26  ;;  %v1585_v34 = vadd.f32 %v1875_v48, %v1577_v46 }
 0x818   :  { %v1578_v49 = vmul.f32 %v1874_v44, %v1570_v47 }
 0x81a   :  { %v1586_v38 = vadd.f32 %v1875_v48, %v1578_v49 }
 0x81c   :  { %v1587_v51 = vpack.c.bf16 %v1586_v38, %v1585_v34 }
 0x81e   :  { %2079 = vmatmul.mubr.msk.bf16.vlgmr.msra.gmra.mrb[40].mxu0 %vm236_vm1, %v1587_v51 }
 0x8f1   :  { %v1648_v53 = vpop.f32.mrb[40].mxu0 }
 0x8f2   :  { %v1649_v54 = vadd.f32 %v1876_v43, %v1648_v53  ;;  %v2080_v55 = vpop.f32.mrb[41].mxu0 }
 0x8f3   :  { %v1651_v56 = vpop.f32.mrb[42].mxu0 }
 0x8f4   :  { %v1652_v57 = vadd.f32 %v1876_v43, %v1651_v56  ;;  %v2081_v58 = vpop.f32.mrb[43].mxu0  ;;  %v1655_v59 = vmax.f32 %v1649_v54, 0.0 }
 0x8f6   :  { %v1656_v60 = vmax.f32 %v1652_v57, 0.0 }
 0x8f8   :  { %v1657_v61 = vpack.c.bf16 %v1656_v60, %v1655_v59 }
 0x8fa   :  { %2091 = vmatmul.mubr.msk.bf16.vlgmr.msra.gmra.mrb[40].mxu1 %vm1697_vm8, %v1657_v61 }
 0x9cd   :  { %v1735_v63 = vpop.f32.mrb[40].mxu1 }
 0x9ce   :  { %v1736_v1 = vadd.f32 %v1880_v62, %v1735_v63  ;;  %v2092_v2 = vpop.f32.mrb[41].mxu1 }
 0x9cf   :  { %v1738_v3 = vpop.f32.mrb[42].mxu1 }
 0x9d0   :  { %v1739_v0 = vadd.f32 %v1880_v62, %v1738_v3  ;;  %v2093_v4 = vpop.f32.mrb[43].mxu1  ;;  %v1742_v8 = vadd.f32 %v1736_v1, %v1585_v34 }
 0x9d2   :  { %v1746_v9 = vsel %vm236_vm1, %v1742_v8, 0.0  ;;  %v1743_v10 = vadd.f32 %v1739_v0, %v1586_v38 }
 0x9d3   :  { %1747 = vadd.xlane.f32.xlu1 %v1746_v9 }
 0x9d4   :  { %v1749_v12 = vsel %vm236_vm1, %v1743_v10, 0.0 }
 0x9d5   :  { %1750 = vadd.xlane.f32.xlu0 %v1749_v12 }
 0xa60   :  { %v1748_v13 = vpop.xlane.xlu1 %1747 }
 0xa61   :  { %v1752_v7 = vmul.f32 0.03125, %v1748_v13 }
 0xa62   :  { %v1751_v14 = vpop.xlane.xlu0 %1750 }
 0xa63   :  { %v1754_v15 = vsub.f32 %v1742_v8, %v1752_v7  ;;  %v1753_v16 = vmul.f32 0.03125, %v1751_v14 }
 0xa65   :  { %v1755_v11 = vsub.f32 %v1743_v10, %v1753_v16  ;;  %v1756_v17 = vmul.f32 %v1754_v15, %v1754_v15 }
 0xa67   :  { %v1758_v18 = vsel %vm236_vm1, %v1756_v17, 0.0  ;;  %v1757_v19 = vmul.f32 %v1755_v11, %v1755_v11 }
 0xa68   :  { %1759 = vadd.xlane.f32.xlu1 %v1758_v18 }
 0xa69   :  { %v1761_v20 = vsel %vm236_vm1, %v1757_v19, 0.0 }
 0xa6a   :  { %1762 = vadd.xlane.f32.xlu0 %v1761_v20 }
 0xaf5   :  { %v1760_v21 = vpop.xlane.xlu1 %1759 }
 0xaf6   :  { %v1764_v22 = vmul.f32 0.03125, %v1760_v21 }
 0xaf7   :  { %v1763_v23 = vpop.xlane.xlu0 %1762 }
 0xaf8   :  { %v1766_v24 = vadd.f32 1e-05, %v1764_v22  ;;  %v1765_v25 = vmul.f32 0.03125, %v1763_v23 }
 0xafa   :  { %2170 = vrsqrt.f32 %v1766_v24  ;;  %v1767_v26 = vadd.f32 1e-05, %v1765_v25 }
 0xafc   :  { %2172 = vrsqrt.f32 %v1767_v26 }
 0xb04   :  { %v2171_v27 = vpop.eup %2170 }
 0xb05   :  { %v1770_v29 = vmul.f32 %v2171_v27, %v1754_v15 }
 0xb06   :  { %v2173_v5 = vpop.eup %2172 }
 0xb07   :  { %v1771_v6 = vmul.f32 %v2173_v5, %v1755_v11  ;;  %v1778_v31 = vmul.f32 %v1886_v28, %v1770_v29 }
 0xb09   :  { %v1779_v32 = vmul.f32 %v1886_v28, %v1771_v6  ;;  %v1786_v33 = vadd.f32 %v1887_v30, %v1778_v31 }
 0xb0b   :  { %v1787_v35 = vadd.f32 %v1887_v30, %v1779_v32  ;;  %1788 = vst.msk [vmem:[#allocation27] sm:$0xff] %vm236_vm1, %v1786_v33 }
 0xb0d   :  { %1789 = vst.msk [vmem:[#allocation27 + $0x8] sm:$0xff] %vm236_vm1, %v1787_v35 }
 0xb0e   :  { %2471 = shalt.err (!%p2468_p10)
}
 0xb0f   :  { %s2472_s30 = scalar_lea.hbm %s3032_s13, 256 }
 0xb10   :  { %p2473_p11 = scmp.ne.s32.totalorder %s3032_s13, %s2472_s30  ;;  %p2476_p12 = scmp.lt.u32.totalorder %s2472_s30, %s3032_s13 }
 0xb12   :  { %p2478_p13 = pnand %p2476_p12, %p2473_p11 }
 0xb14   :  { %2481 = shalt.err (!%p2478_p13)
}
 0xb15   :  { %1801 = dma.vmem_to_hbm [thread:$0]  %s1796_s17, 256, %s3032_s13, [#allocation8], %s2507_s11, %s2507_s11, %s2508_s21  }
 0xb16   :  { %2496 = dma.done.wait [#allocation8], 256  }
 0xb17   :  { %2497 = vsyncadd [#allocation8], 4294967040 }
 0xb18   :  { %1805 = vsyncpa [#allocation7], 1 }
 0xb19   :  { %1806 = vsyncpa [#allocation10], 1 }
 0xb1a   :  { %1807 = vsyncpa [#allocation13], 1 }
 0xb1b   :  { %1808 = vsyncpa [#allocation16], 1 }
 0xb1c   :  { %1809 = vsyncpa [#allocation19], 1 }
 0xb1d   :  { %1810 = vsyncpa [#allocation22], 1 }
 0xb1e   :  { %1811 = vsyncpa [#allocation25], 1 }
 0xb1f   :  { %1812 = vsyncpa [#allocation8], 1 }

// kernel: tpu_custom_call.1
= control target key start
LH: loop header
LB: loop body
LE: loop exit
PB: predicated region body
PF: predicated region fallthrough
CT: control target
= control target key end

     0   :  { %18 = vsyncpa [#allocation7], 0  ;;  %s3019_s0 = inlined_call_operand.hbm [shape: f32[2,8,32], index: 0, kind: input, shape index: {}]   ;;  %s3020_s1 = inlined_call_operand.hbm [shape: bf16[32,96], index: 1, kind: input, shape index: {}]   ;;  %s3021_s2 = inlined_call_operand.hbm [shape: f32[1,96], index: 2, kind: input, shape index: {}]   ;;  %s3022_s3 = inlined_call_operand.hbm [shape: bf16[32,32], index: 3, kind: input, shape index: {}]   ;;  %s3023_s4 = inlined_call_operand.hbm [shape: f32[1,32], index: 4, kind: input, shape index: {}]   ;;  %s3024_s5 = inlined_call_operand.hbm [shape: bf16[32,64], index: 5, kind: input, shape index: {}]   ;;  %s3025_s6 = inlined_call_operand.hbm [shape: f32[1,64], index: 6, kind: input, shape index: {}]   ;;  %s3026_s7 = inlined_call_operand.hbm [shape: bf16[64,32], index: 7, kind: input, shape index: {}]   ;;  %s3027_s8 = inlined_call_operand.hbm [shape: f32[1,32], index: 8, kind: input, shape index: {}]   ;;  %s3028_s9 = inlined_call_operand.hbm [shape: f32[1,32], index: 9, kind: input, shape index: {}]   ;;  %s3029_s10 = inlined_call_operand.hbm [shape: f32[1,32], index: 10, kind: input, shape index: {}]   ;;  %s3030_s11 = inlined_call_operand.hbm [shape: f32[1,32], index: 11, kind: input, shape index: {}]   ;;  %s3031_s12 = inlined_call_operand.hbm [shape: f32[1,32], index: 12, kind: input, shape index: {}]   ;;  %s3032_s13 = inlined_call_operand.hbm [shape: f32[2,8,32], index: 13, kind: output, shape index: {}]  }
   0x1   :  { %19 = vsyncpa [#allocation10], 0 }
   0x2   :  { %20 = vsyncpa [#allocation13], 0 }
   0x3   :  { %21 = vsyncpa [#allocation16], 0 }
   0x4   :  { %22 = vsyncpa [#allocation19], 0 }
   0x5   :  { %23 = vsyncpa [#allocation22], 0 }
   0x6   :  { %24 = vsyncpa [#allocation25], 0 }
   0x7   :  { %25 = vsyncpa [#allocation8], 0  ;;  %s2498_s25 = smov [#allocation9]   ;;  %s2174_s29 = scalar_lea.hbm %s3020_s1, 256 }
   0x8   :  { %s43_s26 = sshll.u32 %s2498_s25, 4  ;;  %p2175_p0 = scmp.ne.s32.totalorder %s3020_s1, %s2174_s29  ;;  %s44_s26 = int_to_ptr.vmem [resolvable:$true] %s43_s26 }
   0x9   :  { %p2178_p1 = scmp.lt.u32.totalorder %s2174_s29, %s3020_s1 }
   0xb   :  { %p2180_p2 = pnand %p2178_p1, %p2175_p0 }
   0xd   :  { %2183 = shalt.err (!%p2180_p2)
}
   0xe   :  { %s2184_s17 = scalar_lea.vmem %s44_s26, 256  ;;  %p2189_p4 = scmp.lt.s32.totalorder %s44_s26, %s44_s26 }
   0xf   :  { %p2185_p3 = scmp.ne.s32.totalorder %s44_s26, %s2184_s17  ;;  %p2190_p5 = scmp.lt.s32.totalorder %s2184_s17, %s2184_s17 }
  0x11   :  { %p2191_p6 = por %p2190_p5, %p2189_p4 }
  0x13   :  { %p2192_p7 = pnand %p2191_p6, %p2185_p3 }
  0x15   :  { %2195 = shalt.err (!%p2192_p7)
}
  0x16   :  { %s2499_s18 = smov 64   ;;  %s2500_s19 = smov 4  }
  0x17   :  { %49 = dma.hbm_to_vmem [thread:$0]  %s3020_s1, 256, %s44_s26, [#allocation10], %s2499_s18, %s2499_s18, %s2500_s19  }
  0x18   :  { %s2501_s22 = smov [#allocation12]   ;;  %s2502_s24 = smov [#allocation15]  }
  0x19   :  { %s65_s23 = sshll.u32 %s2501_s22, 4  ;;  %s87_s25 = sshll.u32 %s2502_s24, 4  ;;  %s66_s23 = int_to_ptr.vmem [resolvable:$true] %s65_s23  ;;  %s88_s25 = int_to_ptr.vmem [resolvable:$true] %s87_s25 }
  0x1a   :  { %s2196_s29 = scalar_lea.hbm %s3022_s3, 256 }
  0x1b   :  { %p2197_p8 = scmp.ne.s32.totalorder %s3022_s3, %s2196_s29  ;;  %p2200_p9 = scmp.lt.u32.totalorder %s2196_s29, %s3022_s3 }
  0x1d   :  { %p2202_p10 = pnand %p2200_p9, %p2197_p8 }
  0x1f   :  { %2205 = shalt.err (!%p2202_p10)
}
  0x20   :  { %s2206_s1 = scalar_lea.vmem %s66_s23, 256  ;;  %p2211_p12 = scmp.lt.s32.totalorder %s66_s23, %s66_s23 }
  0x21   :  { %p2207_p11 = scmp.ne.s32.totalorder %s66_s23, %s2206_s1  ;;  %p2212_p13 = scmp.lt.s32.totalorder %s2206_s1, %s2206_s1 }
  0x23   :  { %p2213_p0 = por %p2212_p13, %p2211_p12 }
  0x25   :  { %p2214_p1 = pnand %p2213_p0, %p2207_p11 }
  0x27   :  { %2217 = shalt.err (!%p2214_p1)
}
  0x28   :  { %71 = dma.hbm_to_vmem [thread:$0]  %s3022_s3, 256, %s66_s23, [#allocation13], %s2499_s18, %s2499_s18, %s2500_s19  }
  0x29   :  { %s2218_s22 = scalar_lea.hbm %s3024_s5, 256 }
  0x2a   :  { %p2219_p2 = scmp.ne.s32.totalorder %s3024_s5, %s2218_s22  ;;  %p2222_p3 = scmp.lt.u32.totalorder %s2218_s22, %s3024_s5 }
  0x2c   :  { %p2224_p4 = pnand %p2222_p3, %p2219_p2 }
  0x2e   :  { %2227 = shalt.err (!%p2224_p4)
}
  0x2f   :  { %s2228_s30 = scalar_lea.vmem %s88_s25, 256  ;;  %p2233_p6 = scmp.lt.s32.totalorder %s88_s25, %s88_s25 }
  0x30   :  { %p2229_p5 = scmp.ne.s32.totalorder %s88_s25, %s2228_s30  ;;  %p2234_p7 = scmp.lt.s32.totalorder %s2228_s30, %s2228_s30 }
  0x32   :  { %p2235_p8 = por %p2234_p7, %p2233_p6 }
  0x34   :  { %p2236_p9 = pnand %p2235_p8, %p2229_p5 }
  0x36   :  { %2239 = shalt.err (!%p2236_p9)
}
  0x37   :  { %93 = dma.hbm_to_vmem [thread:$0]  %s3024_s5, 256, %s88_s25, [#allocation16], %s2499_s18, %s2499_s18, %s2500_s19  }
  0x38   :  { %s2503_s14 = smov [#allocation18]   ;;  %s2504_s16 = smov [#allocation21]  }
  0x39   :  { %s109_s15 = sshll.u32 %s2503_s14, 4  ;;  %s132_s1 = sshll.u32 %s2504_s16, 4  ;;  %s110_s15 = int_to_ptr.vmem [resolvable:$true] %s109_s15  ;;  %s133_s1 = int_to_ptr.vmem [resolvable:$true] %s132_s1 }
  0x3a   :  { %s2240_s20 = scalar_lea.hbm %s3026_s7, 512 }
  0x3b   :  { %p2241_p10 = scmp.ne.s32.totalorder %s3026_s7, %s2240_s20  ;;  %p2244_p11 = scmp.lt.u32.totalorder %s2240_s20, %s3026_s7 }
  0x3d   :  { %p2246_p12 = pnand %p2244_p11, %p2241_p10 }
  0x3f   :  { %2249 = shalt.err (!%p2246_p12)
}
  0x40   :  { %s2250_s5 = scalar_lea.vmem %s110_s15, 512  ;;  %p2255_p0 = scmp.lt.s32.totalorder %s110_s15, %s110_s15 }
  0x41   :  { %p2251_p13 = scmp.ne.s32.totalorder %s110_s15, %s2250_s5  ;;  %p2256_p1 = scmp.lt.s32.totalorder %s2250_s5, %s2250_s5 }
  0x43   :  { %p2257_p2 = por %p2256_p1, %p2255_p0 }
  0x45   :  { %p2258_p3 = pnand %p2257_p2, %p2251_p13 }
  0x47   :  { %2261 = shalt.err (!%p2258_p3)
}
  0x48   :  { %115 = dma.hbm_to_vmem [thread:$0]  %s3026_s7, 512, %s110_s15, [#allocation19], %s2499_s18, %s2499_s18, %s2500_s19  }
  0x49   :  { %s2262_s3 = scalar_lea.hbm %s3028_s9, 16 }
  0x4a   :  { %p2263_p4 = scmp.ne.s32.totalorder %s3028_s9, %s2262_s3  ;;  %p2266_p5 = scmp.lt.u32.totalorder %s2262_s3, %s3028_s9 }
  0x4c   :  { %p2268_p6 = pnand %p2266_p5, %p2263_p4 }
  0x4e   :  { %2271 = shalt.err (!%p2268_p6)
}
  0x4f   :  { %s2272_s17 = scalar_lea.vmem %s133_s1, 16  ;;  %s2276_s20 = scalar_lea.vmem %s133_s1, 32 }
  0x50   :  { %p2273_p7 = scmp.ne.s32.totalorder %s133_s1, %s2272_s17  ;;  %p2277_p8 = scmp.lt.s32.totalorder %s133_s1, %s133_s1 }
  0x51   :  { %p2278_p9 = scmp.lt.s32.totalorder %s2276_s20, %s2272_s17 }
  0x53   :  { %p2279_p10 = por %p2278_p9, %p2277_p8 }
  0x55   :  { %p2280_p11 = pnand %p2279_p10, %p2273_p7 }
  0x57   :  { %2283 = shalt.err (!%p2280_p11)
}
  0x58   :  { %135 = dma.hbm_to_vmem [thread:$0]  %s3028_s9, 16, %s133_s1, [#allocation22]  }
  0x59   :  { %s2505_s15 = smov [#allocation24]   ;;  %s2506_s22 = smov [#allocation6]  }
  0x5a   :  { %s152_s21 = sshll.u32 %s2505_s15, 4  ;;  %s31_s24 = sshll.u32 %s2506_s22, 4  ;;  %s153_s21 = int_to_ptr.vmem [resolvable:$true] %s152_s21  ;;  %s32_s24 = int_to_ptr.vmem [resolvable:$true] %s31_s24 }
  0x5b   :  { %s2284_s25 = scalar_lea.hbm %s3030_s11, 16 }
  0x5c   :  { %p2285_p12 = scmp.ne.s32.totalorder %s3030_s11, %s2284_s25  ;;  %p2288_p13 = scmp.lt.u32.totalorder %s2284_s25, %s3030_s11 }
  0x5e   :  { %p2290_p0 = pnand %p2288_p13, %p2285_p12 }
  0x60   :  { %2293 = shalt.err (!%p2290_p0)
}
  0x61   :  { %s2294_s9 = scalar_lea.vmem %s153_s21, 16  ;;  %s2298_s1 = scalar_lea.vmem %s153_s21, 32 }
  0x62   :  { %p2295_p1 = scmp.ne.s32.totalorder %s153_s21, %s2294_s9  ;;  %p2299_p2 = scmp.lt.s32.totalorder %s153_s21, %s153_s21 }
  0x63   :  { %p2300_p3 = scmp.lt.s32.totalorder %s2298_s1, %s2294_s9 }
  0x65   :  { %p2301_p4 = por %p2300_p3, %p2299_p2 }
  0x67   :  { %p2302_p5 = pnand %p2301_p4, %p2295_p1 }
  0x69   :  { %2305 = shalt.err (!%p2302_p5)
}
  0x6a   :  { %155 = dma.hbm_to_vmem [thread:$0]  %s3030_s11, 16, %s153_s21, [#allocation25]  }
  0x6b   :  { %s2306_s17 = scalar_lea.hbm %s3019_s0, 256 }
  0x6c   :  { %p2307_p6 = scmp.ne.s32.totalorder %s3019_s0, %s2306_s17  ;;  %p2310_p7 = scmp.lt.u32.totalorder %s2306_s17, %s3019_s0 }
  0x6e   :  { %p2312_p8 = pnand %p2310_p7, %p2307_p6 }
  0x70   :  { %2315 = shalt.err (!%p2312_p8)
}
  0x71   :  { %s2316_s22 = scalar_lea.vmem %s32_s24, 256  ;;  %p2321_p10 = scmp.lt.s32.totalorder %s32_s24, %s32_s24 }
  0x72   :  { %p2317_p9 = scmp.ne.s32.totalorder %s32_s24, %s2316_s22  ;;  %p2322_p11 = scmp.lt.s32.totalorder %s2316_s22, %s2316_s22 }
  0x74   :  { %p2323_p12 = por %p2322_p11, %p2321_p10 }
  0x76   :  { %p2324_p13 = pnand %p2323_p12, %p2317_p9 }
  0x78   :  { %2327 = shalt.err (!%p2324_p13)
}
  0x79   :  { %s2507_s11 = smov 128   ;;  %s2508_s21 = smov 8  }
  0x7a   :  { %37 = dma.hbm_to_vmem [thread:$0]  %s3019_s0, 256, %s32_s24, [#allocation7], %s2507_s11, %s2507_s11, %s2508_s21  }
  0x7b   :  { %s2509_s25 = smov [#allocation11]   ;;  %s2510_s29 = smov [#allocation14]  }
  0x7c   :  { %s56_s28 = sshll.u32 %s2509_s25, 4  ;;  %s78_s30 = sshll.u32 %s2510_s29, 4  ;;  %s57_s28 = int_to_ptr.vmem [resolvable:$true] %s56_s28  ;;  %s79_s30 = int_to_ptr.vmem [resolvable:$true] %s78_s30 }
  0x7d   :  { %s2328_s1 = scalar_lea.hbm %s3021_s2, 16 }
  0x7e   :  { %p2329_p0 = scmp.ne.s32.totalorder %s3021_s2, %s2328_s1  ;;  %p2332_p1 = scmp.lt.u32.totalorder %s2328_s1, %s3021_s2 }
  0x80   :  { %p2334_p2 = pnand %p2332_p1, %p2329_p0 }
  0x82   :  { %2337 = shalt.err (!%p2334_p2)
}
  0x83   :  { %s2338_s0 = scalar_lea.vmem %s57_s28, 16  ;;  %s2342_s24 = scalar_lea.vmem %s57_s28, 32 }
  0x84   :  { %p2339_p3 = scmp.ne.s32.totalorder %s57_s28, %s2338_s0  ;;  %p2343_p4 = scmp.lt.s32.totalorder %s57_s28, %s57_s28 }
  0x85   :  { %p2344_p5 = scmp.lt.s32.totalorder %s2342_s24, %s2338_s0 }
  0x87   :  { %p2345_p6 = por %p2344_p5, %p2343_p4 }
  0x89   :  { %p2346_p7 = pnand %p2345_p6, %p2339_p3 }
  0x8b   :  { %2349 = shalt.err (!%p2346_p7)
}
  0x8c   :  { %59 = dma.hbm_to_vmem [thread:$0]  %s3021_s2, 16, %s57_s28, [#allocation10]  }
  0x8d   :  { %s2350_s15 = scalar_lea.hbm %s3023_s4, 16 }
  0x8e   :  { %p2351_p8 = scmp.ne.s32.totalorder %s3023_s4, %s2350_s15  ;;  %p2354_p9 = scmp.lt.u32.totalorder %s2350_s15, %s3023_s4 }
  0x90   :  { %p2356_p10 = pnand %p2354_p9, %p2351_p8 }
  0x92   :  { %2359 = shalt.err (!%p2356_p10)
}
  0x93   :  { %s2360_s29 = scalar_lea.vmem %s79_s30, 16  ;;  %s2364_s3 = scalar_lea.vmem %s79_s30, 32 }
  0x94   :  { %p2361_p11 = scmp.ne.s32.totalorder %s79_s30, %s2360_s29  ;;  %p2365_p12 = scmp.lt.s32.totalorder %s79_s30, %s79_s30 }
  0x95   :  { %p2366_p13 = scmp.lt.s32.totalorder %s2364_s3, %s2360_s29 }
  0x97   :  { %p2367_p0 = por %p2366_p13, %p2365_p12 }
  0x99   :  { %p2368_p1 = pnand %p2367_p0, %p2361_p11 }
  0x9b   :  { %2371 = shalt.err (!%p2368_p1)
}
  0x9c   :  { %81 = dma.hbm_to_vmem [thread:$0]  %s3023_s4, 16, %s79_s30, [#allocation13]  }
  0x9d   :  { %s2511_s9 = smov [#allocation17]   ;;  %s2512_s23 = smov [#allocation20]  }
  0x9e   :  { %s100_s1 = sshll.u32 %s2511_s9, 4  ;;  %s122_s14 = sshll.u32 %s2512_s23, 4  ;;  %s101_s1 = int_to_ptr.vmem [resolvable:$true] %s100_s1  ;;  %s123_s14 = int_to_ptr.vmem [resolvable:$true] %s122_s14 }
  0x9f   :  { %s2372_s0 = scalar_lea.hbm %s3025_s6, 16 }
  0xa0   :  { %p2373_p2 = scmp.ne.s32.totalorder %s3025_s6, %s2372_s0  ;;  %p2376_p3 = scmp.lt.u32.totalorder %s2372_s0, %s3025_s6 }
  0xa2   :  { %p2378_p4 = pnand %p2376_p3, %p2373_p2 }
  0xa4   :  { %2381 = shalt.err (!%p2378_p4)
}
  0xa5   :  { %s2382_s4 = scalar_lea.vmem %s101_s1, 16  ;;  %s2386_s30 = scalar_lea.vmem %s101_s1, 32 }
  0xa6   :  { %p2383_p5 = scmp.ne.s32.totalorder %s101_s1, %s2382_s4  ;;  %p2387_p6 = scmp.lt.s32.totalorder %s101_s1, %s101_s1 }
  0xa7   :  { %p2388_p7 = scmp.lt.s32.totalorder %s2386_s30, %s2382_s4 }
  0xa9   :  { %p2389_p8 = por %p2388_p7, %p2387_p6 }
  0xab   :  { %p2390_p9 = pnand %p2389_p8, %p2383_p5 }
  0xad   :  { %2393 = shalt.err (!%p2390_p9)
}
  0xae   :  { %103 = dma.hbm_to_vmem [thread:$0]  %s3025_s6, 16, %s101_s1, [#allocation16]  }
  0xaf   :  { %s2394_s5 = scalar_lea.hbm %s3027_s8, 16 }
  0xb0   :  { %p2395_p10 = scmp.ne.s32.totalorder %s3027_s8, %s2394_s5  ;;  %p2398_p11 = scmp.lt.u32.totalorder %s2394_s5, %s3027_s8 }
  0xb2   :  { %p2400_p12 = pnand %p2398_p11, %p2395_p10 }
  0xb4   :  { %2403 = shalt.err (!%p2400_p12)
}
  0xb5   :  { %s2404_s28 = scalar_lea.vmem %s123_s14, 16  ;;  %s2408_s9 = scalar_lea.vmem %s123_s14, 32 }
  0xb6   :  { %p2405_p13 = scmp.ne.s32.totalorder %s123_s14, %s2404_s28  ;;  %p2409_p0 = scmp.lt.s32.totalorder %s123_s14, %s123_s14 }
  0xb7   :  { %p2410_p1 = scmp.lt.s32.totalorder %s2408_s9, %s2404_s28 }
  0xb9   :  { %p2411_p2 = por %p2410_p1, %p2409_p0 }
  0xbb   :  { %p2412_p3 = pnand %p2411_p2, %p2405_p13 }
  0xbd   :  { %2415 = shalt.err (!%p2412_p3)
}
  0xbe   :  { %125 = dma.hbm_to_vmem [thread:$0]  %s3027_s8, 16, %s123_s14, [#allocation19]  }
  0xbf   :  { %s2513_s23 = smov [#allocation23]   ;;  %s2514_s26 = smov [#allocation26]  }
  0xc0   :  { %s142_s16 = sshll.u32 %s2513_s23, 4  ;;  %s162_s0 = sshll.u32 %s2514_s26, 4  ;;  %s143_s16 = int_to_ptr.vmem [resolvable:$true] %s142_s16  ;;  %s163_s0 = int_to_ptr.vmem [resolvable:$true] %s162_s0 }
  0xc1   :  { %s2416_s20 = scalar_lea.hbm %s3029_s10, 16 }
  0xc2   :  { %p2417_p4 = scmp.ne.s32.totalorder %s3029_s10, %s2416_s20  ;;  %p2420_p5 = scmp.lt.u32.totalorder %s2416_s20, %s3029_s10 }
  0xc4   :  { %p2422_p6 = pnand %p2420_p5, %p2417_p4 }
  0xc6   :  { %2425 = shalt.err (!%p2422_p6)
}
  0xc7   :  { %s2426_s8 = scalar_lea.vmem %s143_s16, 16  ;;  %s2430_s14 = scalar_lea.vmem %s143_s16, 32 }
  0xc8   :  { %p2427_p7 = scmp.ne.s32.totalorder %s143_s16, %s2426_s8  ;;  %p2431_p8 = scmp.lt.s32.totalorder %s143_s16, %s143_s16 }
  0xc9   :  { %p2432_p9 = scmp.lt.s32.totalorder %s2430_s14, %s2426_s8 }
  0xcb   :  { %p2433_p10 = por %p2432_p9, %p2431_p8 }
  0xcd   :  { %p2434_p11 = pnand %p2433_p10, %p2427_p7 }
  0xcf   :  { %2437 = shalt.err (!%p2434_p11)
}
  0xd0   :  { %145 = dma.hbm_to_vmem [thread:$0]  %s3029_s10, 16, %s143_s16, [#allocation22]  }
  0xd1   :  { %s2438_s25 = scalar_lea.hbm %s3031_s12, 16 }
  0xd2   :  { %p2439_p12 = scmp.ne.s32.totalorder %s3031_s12, %s2438_s25  ;;  %p2442_p13 = scmp.lt.u32.totalorder %s2438_s25, %s3031_s12 }
  0xd4   :  { %p2444_p0 = pnand %p2442_p13, %p2439_p12 }
  0xd6   :  { %2447 = shalt.err (!%p2444_p0)
}
  0xd7   :  { %s2448_s9 = scalar_lea.vmem %s163_s0, 16  ;;  %s2452_s6 = scalar_lea.vmem %s163_s0, 32 }
  0xd8   :  { %p2449_p1 = scmp.ne.s32.totalorder %s163_s0, %s2448_s9  ;;  %p2453_p2 = scmp.lt.s32.totalorder %s163_s0, %s163_s0 }
  0xd9   :  { %p2454_p3 = scmp.lt.s32.totalorder %s2452_s6, %s2448_s9 }
  0xdb   :  { %p2455_p4 = por %p2454_p3, %p2453_p2 }
  0xdd   :  { %p2456_p5 = pnand %p2455_p4, %p2449_p1 }
  0xdf   :  { %2459 = shalt.err (!%p2456_p5)
}
  0xe0   :  { %165 = dma.hbm_to_vmem [thread:$0]  %s3031_s12, 16, %s163_s0, [#allocation25]  }
  0xe1   :  { %2482 = dma.done.wait [#allocation7], 256  }
  0xe2   :  { %2483 = vsyncadd [#allocation7], 4294967040 }
  0xe3   :  { %2484 = dma.done.wait [#allocation10], 272  }
  0xe4   :  { %2485 = vsyncadd [#allocation10], 4294967024 }
  0xe5   :  { %2486 = dma.done.wait [#allocation13], 272  }
  0xe6   :  { %2487 = vsyncadd [#allocation13], 4294967024 }
  0xe7   :  { %2488 = dma.done.wait [#allocation16], 272  }
  0xe8   :  { %2489 = vsyncadd [#allocation16], 4294967024 }
  0xe9   :  { %2490 = dma.done.wait [#allocation19], 528  }
  0xea   :  { %2491 = vsyncadd [#allocation19], 4294966768 }
  0xeb   :  { %2492 = dma.done.wait [#allocation22], 32  }
  0xec   :  { %2493 = vsyncadd [#allocation22], 4294967264 }
  0xed   :  { %2494 = dma.done.wait [#allocation25], 32  }
  0xee   :  { %2495 = vsyncadd [#allocation25], 4294967264  ;;  %v2515_v0 = vmov 0.0   ;;  %vm2516_vm0 = vmmov 0   ;;  %v2120_v1 = vld [vmem:[#allocation9] sm:$0xff]   ;;  %v2121_v2 = vld [vmem:[#allocation9 + $0x8] sm:$0xff]  }
  0xef   :  { %1946 = vmatprep.subr.bf16.mxu0 %v2515_v0  ;;  %1950 = vmatprep.mubr.msk.bf16.mxu0 %vm2516_vm0, %v2515_v0  ;;  %s2517_s12 = smov 96   ;;  %v2122_v3 = vld [vmem:[#allocation9] sm:$0xff]   ;;  %v2123_v4 = vld [vmem:[#allocation9 + $0x8] sm:$0xff]   ;;  %v2771_v5 = vld [vmem:[#allocation6] sm:$0xff]  ;;  %vm236_vm1 = vcmask 261120   ;;  %vm289_vm2 = vcmask 60416  }
  0xf0   :  { %1954 = vmatprep.subr.bf16.mxu1 %v2515_v0  ;;  %1958 = vmatprep.mubr.msk.bf16.mxu1 %vm2516_vm0, %v2515_v0  ;;  %v2773_v6 = vld [vmem:[#allocation6 + $0x8] sm:$0xff]  ;;  %v2775_v7 = vld [vmem:[#allocation11] ss:$0 sm:$0xff]  ;;  %s2518_s23 = smov 120   ;;  %s2519_s16 = smov 112   ;;  %v2124_v19 = vld [vmem:[#allocation9 + $0x8] sm:$0xff]  }
  0xf1   :  { %339 = vrot.lane.b32.xlu0 %v2120_v1, %s2517_s12  ;;  %1947 = vmatpush3.bf16.msra.mxu0 %v2122_v3  ;;  %v2781_v8 = vpack.c.bf16 %v2773_v6, %v2771_v5  ;;  %s2520_s26 = smov 104   ;;  %vm541_vm3 = vcmask 64512   ;;  %v2125_v33 = vld [vmem:[#allocation9] sm:$0xff]   ;;  %vm601_vm4 = vcmask 1043456   ;;  %s2522_s0 = smov 24   ;;  %vm764_vm5 = vcmask 130112  }
  0xf2   :  { %1948 = vmatprep.subr.bf16.mxu0 %v2515_v0  ;;  %345 = vrot.lane.b32.xlu1 %v2775_v7, %s2517_s12  ;;  %vm882_vm6 = vcmask 195712   ;;  %vm1000_vm7 = vcmask 261312   ;;  %vm1697_vm8 = vcmask 523264   ;;  %s2523_s24 = smov [#allocation27]  }
  0xf3   :  { %s1795_s17 = sshll.u32 %s2523_s24, 4  ;;  %s1796_s17 = int_to_ptr.vmem [resolvable:$true] %s1795_s17 }
  0xf4   :  { %s2460_s20 = scalar_lea.vmem %s1796_s17, 256  ;;  %p2465_p7 = scmp.lt.s32.totalorder %s1796_s17, %s1796_s17 }
  0xf5   :  { %341 = vrot.lane.b32.xlu0 %v2121_v2, %s2517_s12  ;;  %1949 = vmatpush3.bf16.msra.mxu0 %v2123_v4  ;;  %p2461_p6 = scmp.ne.s32.totalorder %s1796_s17, %s2460_s20  ;;  %p2466_p8 = scmp.lt.s32.totalorder %s2460_s20, %s2460_s20 }
  0xf6   :  { %1962 = vmatprep.subr.bf16.mxu0 %v2515_v0 }
  0xf7   :  { %p2467_p9 = por %p2466_p8, %p2465_p7 }
  0xf8   :  { %1951 = vmatmul.mubr.msk.bf16.vlgmr.msra.gmra.mrb[0].mxu0 %vm236_vm1, %v2781_v8 }
  0xf9   :  { %1966 = vmatprep.mubr.msk.bf16.mxu0 %vm2516_vm0, %v2515_v0  ;;  %p2468_p10 = pnand %p2467_p9, %p2461_p6 }
 0x163   :  { %v340_v9 = vpop.permute.xlu0 %339 }
 0x164   :  { %1955 = vmatpush3.bf16.msra.mxu1 %v340_v9  ;;  %v346_v20 = vpop.permute.xlu1 %345 }
 0x165   :  { %1956 = vmatprep.subr.bf16.mxu1 %v2515_v0 }
 0x167   :  { %v342_v10 = vpop.permute.xlu0 %341 }
 0x168   :  { %1957 = vmatpush3.bf16.msra.mxu1 %v342_v10 }
 0x169   :  { %1970 = vmatprep.subr.bf16.mxu1 %v2515_v0 }
 0x16b   :  { %1959 = vmatmul.mubr.msk.bf16.vlgmr.msra.gmra.mrb[0].mxu1 %vm236_vm1, %v2781_v8 }
 0x16c   :  { %1972 = vmatprep.mubr.msk.bf16.mxu1 %vm2516_vm0, %v2515_v0 }
 0x1cb   :  { %v274_v11 = vpop.f32.mrb[0].mxu0 }
 0x1cc   :  { %v275_v12 = vadd.f32 %v2775_v7, %v274_v11  ;;  %v1952_v13 = vpop.f32.mrb[1].mxu0 }
 0x1cd   :  { %v277_v14 = vpop.f32.mrb[2].mxu0 }
 0x1ce   :  { %v1888_v15 = vpack.c.bf16 %v275_v12, %v275_v12  ;;  %v278_v16 = vadd.f32 %v2775_v7, %v277_v14  ;;  %v1953_v17 = vpop.f32.mrb[3].mxu0 }
 0x1d0   :  { %290 = vst.msk [vmem:[#allocation2] sm:$0xf] %vm289_vm2, %v1888_v15  ;;  %292 = vrot.lane.b32.xlu0 %v1888_v15, %s2518_s23  ;;  %v1889_v18 = vpack.c.bf16 %v278_v16, %v278_v16 }
 0x1d2   :  { %291 = vst.msk [vmem:[#allocation2 + $0x10] sm:$0xf] %vm289_vm2, %v1889_v18 }
 0x1d4   :  { %301 = vrot.lane.b32.xlu0 %v1888_v15, %s2519_s16 }
 0x1d7   :  { %v538_v36 = vld [vmem:[#allocation2] sm:$0xf] }
 0x1d8   :  { %310 = vrot.lane.b32.xlu0 %v1888_v15, %s2520_s26 }
 0x1d9   :  { %v1005_v59 = vld [vmem:[#allocation2 + $0x10] sm:$0xf] }
 0x1dc   :  { %448 = vrot.lane.b32.xlu0 %v2124_v19, %s2499_s18 }
 0x1e0   :  { %294 = vrot.lane.b32.xlu0 %v1889_v18, %s2518_s23 }
 0x1e4   :  { %303 = vrot.lane.b32.xlu0 %v1889_v18, %s2519_s16 }
 0x1e8   :  { %312 = vrot.lane.b32.xlu0 %v1889_v18, %s2520_s26 }
 0x23e   :  { %v382_v21 = vpop.f32.mrb[0].mxu1 }
 0x23f   :  { %v383_v22 = vadd.f32 %v382_v21, %v346_v20  ;;  %v1960_v23 = vpop.f32.mrb[1].mxu1 }
 0x240   :  { %v385_v24 = vpop.f32.mrb[2].mxu1 }
 0x241   :  { %v1890_v25 = vpack.c.bf16 %v383_v22, %v383_v22  ;;  %v386_v26 = vadd.f32 %v385_v24, %v346_v20  ;;  %v1961_v27 = vpop.f32.mrb[3].mxu1 }
 0x242   :  { %v293_v29 = vpop.permute.xlu0 %292 }
 0x243   :  { %397 = vst.msk [vmem:[#allocation3] sm:$0xf] %vm289_vm2, %v1890_v25  ;;  %v1891_v28 = vpack.c.bf16 %v386_v26, %v386_v26  ;;  %399 = vrot.lane.b32.xlu1 %v1890_v25, %s2518_s23  ;;  %299 = vst.msk [vmem:[#allocation2 + $0x4] sm:$0xf] %vm289_vm2, %v293_v29 }
 0x245   :  { %398 = vst.msk [vmem:[#allocation3 + $0x10] sm:$0xf] %vm289_vm2, %v1891_v28 }
 0x246   :  { %v302_v30 = vpop.permute.xlu0 %301 }
 0x247   :  { %408 = vrot.lane.b32.xlu1 %v1890_v25, %s2519_s16  ;;  %308 = vst.msk [vmem:[#allocation2 + $0x8] sm:$0xf] %vm289_vm2, %v302_v30 }
 0x24a   :  { %v539_v31 = vld [vmem:[#allocation3] sm:$0xf]  ;;  %v311_v34 = vpop.permute.xlu0 %310  ;;  %v651_v48 = vld [vmem:[#allocation2 + $0x4] sm:$0xf] }
 0x24b   :  { %417 = vrot.lane.b32.xlu1 %v1890_v25, %s2520_s26  ;;  %v546_v32 = vsel %vm541_vm3, %v539_v31, 0  ;;  %317 = vst.msk [vmem:[#allocation2 + $0xc] sm:$0xf] %vm289_vm2, %v311_v34 }
 0x24c   :  { %1971 = vmatpush3.bf16.xpose.msra.mxu1 %v546_v32  ;;  %v1007_v55 = vld [vmem:[#allocation3 + $0x10] sm:$0xf] }
 0x24d   :  { %1982 = vmatprep.subr.bf16.mxu1 %v2515_v0  ;;  %v1014_v57 = vsel %vm541_vm3, %v1007_v55, 0 }
 0x24e   :  { %v449_v35 = vpop.permute.xlu0 %448  ;;  %v769_v53 = vld [vmem:[#allocation2 + $0x8] sm:$0xf] }
 0x24f   :  { %446 = vrot.lane.b32.xlu1 %v2125_v33, %s2499_s18 }
 0x252   :  { %v295_v37 = vpop.permute.xlu0 %294  ;;  %v887_v56 = vld [vmem:[#allocation2 + $0xc] sm:$0xf] }
 0x253   :  { %401 = vrot.lane.b32.xlu1 %v1891_v28, %s2518_s23  ;;  %1973 = vmatmul.mubr.msk.bf16.vlgmr.msra.gmra.mrb[4].mxu1 %vm541_vm3, %v538_v36  ;;  %300 = vst.msk [vmem:[#allocation2 + $0x14] sm:$0xf] %vm289_vm2, %v295_v37 }
 0x254   :  { %1984 = vmatprep.mubr.msk.bf16.mxu1 %vm2516_vm0, %v2515_v0 }
 0x256   :  { %v304_v38 = vpop.permute.xlu0 %303 }
 0x257   :  { %410 = vrot.lane.b32.xlu1 %v1891_v28, %s2519_s16  ;;  %309 = vst.msk [vmem:[#allocation2 + $0x18] sm:$0xf] %vm289_vm2, %v304_v38 }
 0x25a   :  { %v313_v39 = vpop.permute.xlu0 %312  ;;  %v1118_v62 = vld [vmem:[#allocation2 + $0x14] sm:$0xf] }
 0x25b   :  { %419 = vrot.lane.b32.xlu1 %v1891_v28, %s2520_s26  ;;  %318 = vst.msk [vmem:[#allocation2 + $0x1c] sm:$0xf] %vm289_vm2, %v313_v39 }
 0x25e   :  { %v1235_v2 = vld [vmem:[#allocation2 + $0x18] sm:$0xf] }
 0x25f   :  { %452 = vrot.lane.b32.xlu1 %v2775_v7, %s2499_s18  ;;  %s2521_s18 = smov 16  }
 0x262   :  { %v1352_v4 = vld [vmem:[#allocation2 + $0x1c] sm:$0xf] }
 0x2b5   :  { %v400_v40 = vpop.permute.xlu1 %399 }
 0x2b6   :  { %406 = vst.msk [vmem:[#allocation3 + $0x4] sm:$0xf] %vm289_vm2, %v400_v40 }
 0x2b9   :  { %v409_v41 = vpop.permute.xlu1 %408 }
 0x2ba   :  { %415 = vst.msk [vmem:[#allocation3 + $0x8] sm:$0xf] %vm289_vm2, %v409_v41 }
 0x2bd   :  { %v418_v42 = vpop.permute.xlu1 %417  ;;  %v653_v43 = vld [vmem:[#allocation3 + $0x4] sm:$0xf] }
 0x2be   :  { %424 = vst.msk [vmem:[#allocation3 + $0xc] sm:$0xf] %vm289_vm2, %v418_v42  ;;  %v660_v44 = vsel %vm541_vm3, %v653_v43, 0 }
 0x2bf   :  { %1983 = vmatpush3.bf16.xpose.msra.mxu1 %v660_v44 }
 0x2c0   :  { %1994 = vmatprep.subr.bf16.mxu1 %v2515_v0 }
 0x2c1   :  { %v447_v45 = vpop.permute.xlu1 %446  ;;  %v771_v46 = vld [vmem:[#allocation3 + $0x8] sm:$0xf] }
 0x2c2   :  { %1963 = vmatpush3.bf16.msra.mxu0 %v447_v45  ;;  %v778_v49 = vsel %vm541_vm3, %v771_v46, 0 }
 0x2c3   :  { %1964 = vmatprep.subr.bf16.mxu0 %v2515_v0 }
 0x2c5   :  { %v402_v47 = vpop.permute.xlu1 %401  ;;  %v889_v51 = vld [vmem:[#allocation3 + $0xc] sm:$0xf] }
 0x2c6   :  { %407 = vst.msk [vmem:[#allocation3 + $0x14] sm:$0xf] %vm289_vm2, %v402_v47  ;;  %1965 = vmatpush3.bf16.msra.mxu0 %v449_v35  ;;  %1985 = vmatmul.mubr.msk.bf16.vlgmr.msra.gmra.mrb[8].mxu1 %vm541_vm3, %v651_v48  ;;  %v896_v54 = vsel %vm541_vm3, %v889_v51, 0 }
 0x2c7   :  { %1995 = vmatpush3.bf16.xpose.msra.mxu1 %v778_v49  ;;  %1996 = vmatprep.mubr.msk.bf16.mxu1 %vm2516_vm0, %v2515_v0 }
 0x2c8   :  { %2006 = vmatprep.subr.bf16.mxu1 %v2515_v0  ;;  %1976 = vmatprep.subr.bf16.mxu0 %v2515_v0 }
 0x2c9   :  { %v411_v50 = vpop.permute.xlu1 %410  ;;  %1967 = vmatmul.mubr.msk.bf16.vlgmr.msra.gmra.mrb[4].mxu0 %vm236_vm1, %v2781_v8 }
 0x2ca   :  { %416 = vst.msk [vmem:[#allocation3 + $0x18] sm:$0xf] %vm289_vm2, %v411_v50  ;;  %1978 = vmatprep.mubr.msk.bf16.mxu0 %vm2516_vm0, %v2515_v0 }
 0x2cd   :  { %v420_v52 = vpop.permute.xlu1 %419  ;;  %v1120_v58 = vld [vmem:[#allocation3 + $0x14] sm:$0xf] }
 0x2ce   :  { %425 = vst.msk [vmem:[#allocation3 + $0x1c] sm:$0xf] %vm289_vm2, %v420_v52  ;;  %1997 = vmatmul.mubr.msk.bf16.vlgmr.msra.gmra.mrb[12].mxu1 %vm541_vm3, %v769_v53  ;;  %v1127_v60 = vsel %vm541_vm3, %v1120_v58, 0 }
 0x2cf   :  { %2007 = vmatpush3.bf16.xpose.msra.mxu1 %v896_v54  ;;  %2008 = vmatprep.mubr.msk.bf16.mxu1 %vm2516_vm0, %v2515_v0 }
 0x2d0   :  { %2018 = vmatprep.subr.bf16.mxu1 %v2515_v0 }
 0x2d1   :  { %v1237_v61 = vld [vmem:[#allocation3 + $0x18] sm:$0xf]  ;;  %v453_v13 = vpop.permute.xlu1 %452 }
 0x2d2   :  { %v1244_v63 = vsel %vm541_vm3, %v1237_v61, 0 }
 0x2d5   :  { %v1354_v1 = vld [vmem:[#allocation3 + $0x1c] sm:$0xf] }
 0x2d6   :  { %2009 = vmatmul.mubr.msk.bf16.vlgmr.msra.gmra.mrb[16].mxu1 %vm541_vm3, %v887_v56  ;;  %v1361_v3 = vsel %vm541_vm3, %v1354_v1, 0 }
 0x2d7   :  { %2019 = vmatpush3.bf16.xpose.msra.mxu1 %v1014_v57  ;;  %2020 = vmatprep.mubr.msk.bf16.mxu1 %vm2516_vm0, %v2515_v0 }
 0x2d8   :  { %2030 = vmatprep.subr.bf16.mxu1 %v2515_v0 }
 0x2de   :  { %2021 = vmatmul.mubr.msk.bf16.vlgmr.msra.gmra.mrb[20].mxu1 %vm541_vm3, %v1005_v59 }
 0x2df   :  { %2031 = vmatpush3.bf16.xpose.msra.mxu1 %v1127_v60  ;;  %2032 = vmatprep.mubr.msk.bf16.mxu1 %vm2516_vm0, %v2515_v0 }
 0x2e0   :  { %2042 = vmatprep.subr.bf16.mxu1 %v2515_v0 }
 0x2e6   :  { %2033 = vmatmul.mubr.msk.bf16.vlgmr.msra.gmra.mrb[24].mxu1 %vm541_vm3, %v1118_v62 }
 0x2e7   :  { %2043 = vmatpush3.bf16.xpose.msra.mxu1 %v1244_v63  ;;  %2044 = vmatprep.mubr.msk.bf16.mxu1 %vm2516_vm0, %v2515_v0 }
 0x2e8   :  { %2054 = vmatprep.subr.bf16.mxu1 %v2515_v0 }
 0x2ee   :  { %2045 = vmatmul.mubr.msk.bf16.vlgmr.msra.gmra.mrb[28].mxu1 %vm541_vm3, %v1235_v2 }
 0x2ef   :  { %2055 = vmatpush3.bf16.xpose.msra.mxu1 %v1361_v3  ;;  %2056 = vmatprep.mubr.msk.bf16.mxu1 %vm2516_vm0, %v2515_v0 }
 0x2f0   :  { %2066 = vmatprep.subr.bf16.mxu1 %v2515_v0 }
 0x2f6   :  { %2057 = vmatmul.mubr.msk.bf16.vlgmr.msra.gmra.mrb[32].mxu1 %vm541_vm3, %v1352_v4 }
 0x2f7   :  { %2070 = vmatprep.mubr.msk.bf16.mxu1 %vm2516_vm0, %v2515_v0 }
 0x326   :  { %v2874_v7 = vpop.f32.mrb[4].mxu1 }
 0x327   :  { %v1974_v8 = vpop.f32.mrb[5].mxu1  ;;  %v588_v42 = vsel %vm541_vm3, %v2874_v7, -inf }
 0x328   :  { %v585_v9 = vpop.f32.mrb[6].mxu1 }
 0x329   :  { %v1975_v10 = vpop.f32.mrb[7].mxu1 }
 0x399   :  { %v2876_v11 = vpop.f32.mrb[8].mxu1 }
 0x39a   :  { %v1986_v12 = vpop.f32.mrb[9].mxu1  ;;  %v702_v48 = vsel %vm541_vm3, %v2876_v11, -inf }
 0x39b   :  { %v699_v14 = vpop.f32.mrb[10].mxu1 }
 0x39c   :  { %v489_v15 = vpop.f32.mrb[4].mxu0  ;;  %v1987_v16 = vpop.f32.mrb[11].mxu1 }
 0x39d   :  { %v490_v17 = vadd.f32 %v489_v15, %v453_v13  ;;  %v1968_v18 = vpop.f32.mrb[5].mxu0 }
 0x39e   :  { %v492_v19 = vpop.f32.mrb[6].mxu0 }
 0x39f   :  { %v1892_v20 = vpack.c.bf16 %v490_v17, %v490_v17  ;;  %v493_v21 = vadd.f32 %v492_v19, %v453_v13  ;;  %v1969_v22 = vpop.f32.mrb[7].mxu0 }
 0x3a1   :  { %504 = vst.msk [vmem:[#allocation4] sm:$0xf] %vm289_vm2, %v1892_v20  ;;  %v1893_v23 = vpack.c.bf16 %v493_v21, %v493_v21  ;;  %v2879_v24 = vpop.f32.mrb[12].mxu1  ;;  %515 = vrot.lane.b32.xlu0 %v1892_v20, %s2519_s16  ;;  %506 = vrot.lane.b32.xlu1 %v1892_v20, %s2518_s23 }
 0x3a2   :  { %v1998_v25 = vpop.f32.mrb[13].mxu1  ;;  %v820_v46 = vsel %vm541_vm3, %v2879_v24, -inf }
 0x3a3   :  { %505 = vst.msk [vmem:[#allocation4 + $0x10] sm:$0xf] %vm289_vm2, %v1893_v23  ;;  %v817_v26 = vpop.f32.mrb[14].mxu1 }
 0x3a4   :  { %v1999_v27 = vpop.f32.mrb[15].mxu1 }
 0x3a8   :  { %v540_v28 = vld [vmem:[#allocation4] sm:$0xf] }
 0x3a9   :  { %v2884_v29 = vpop.f32.mrb[16].mxu1  ;;  %v603_v30 = vsel %vm601_vm4, %v540_v28, 0 }
 0x3aa   :  { %v2010_v31 = vpop.f32.mrb[17].mxu1  ;;  %1977 = vmatpush3.bf16.msra.mxu0 %v603_v30  ;;  %v938_v49 = vsel %vm541_vm3, %v2884_v29, -inf  ;;  %v1009_v30 = vld [vmem:[#allocation4 + $0x10] sm:$0xf] }
 0x3ab   :  { %v935_v32 = vpop.f32.mrb[18].mxu1  ;;  %1988 = vmatprep.subr.bf16.mxu0 %v2515_v0 }
 0x3ac   :  { %v2011_v33 = vpop.f32.mrb[19].mxu1  ;;  %v1070_v32 = vsel %vm601_vm4, %v1009_v30, 0 }
 0x3b1   :  { %v2888_v34 = vpop.f32.mrb[20].mxu1 }
 0x3b2   :  { %v2022_v35 = vpop.f32.mrb[21].mxu1  ;;  %v1056_v55 = vsel %vm541_vm3, %v2888_v34, -inf }
 0x3b3   :  { %v1053_v36 = vpop.f32.mrb[22].mxu1 }
 0x3b4   :  { %v2023_v37 = vpop.f32.mrb[23].mxu1 }
 0x3b9   :  { %v2890_v38 = vpop.f32.mrb[24].mxu1 }
 0x3ba   :  { %v2034_v39 = vpop.f32.mrb[25].mxu1  ;;  %v1169_v54 = vsel %vm541_vm3, %v2890_v38, -inf }
 0x3bb   :  { %v1166_v40 = vpop.f32.mrb[26].mxu1 }
 0x3bc   :  { %v2035_v41 = vpop.f32.mrb[27].mxu1 }
 0x3c0   :  { %589 = vmax.xlane.f32.xlu0 %v588_v42 }
 0x3c1   :  { %v2894_v43 = vpop.f32.mrb[28].mxu1 }
 0x3c2   :  { %v2046_v44 = vpop.f32.mrb[29].mxu1  ;;  %v1286_v57 = vsel %vm541_vm3, %v2894_v43, -inf }
 0x3c3   :  { %v1283_v45 = vpop.f32.mrb[30].mxu1 }
 0x3c4   :  { %v2047_v47 = vpop.f32.mrb[31].mxu1  ;;  %821 = vmax.xlane.f32.xlu0 %v820_v46 }
 0x3c5   :  { %703 = vmax.xlane.f32.xlu1 %v702_v48 }
 0x3c8   :  { %939 = vmax.xlane.f32.xlu0 %v938_v49 }
 0x3c9   :  { %v2902_v50 = vpop.f32.mrb[32].mxu1 }
 0x3ca   :  { %v2058_v51 = vpop.f32.mrb[33].mxu1  ;;  %v1403_v56 = vsel %vm541_vm3, %v2902_v50, -inf }
 0x3cb   :  { %v1400_v52 = vpop.f32.mrb[34].mxu1 }
 0x3cc   :  { %v2059_v53 = vpop.f32.mrb[35].mxu1 }
 0x3d6   :  { %508 = vrot.lane.b32.xlu1 %v1893_v23, %s2518_s23 }
 0x3de   :  { %524 = vrot.lane.b32.xlu0 %v1892_v20, %s2520_s26 }
 0x3fa   :  { %1170 = vmax.xlane.f32.xlu1 %v1169_v54 }
 0x3fd   :  { %1057 = vmax.xlane.f32.xlu0 %v1056_v55 }
 0x3fe   :  { %1404 = vmax.xlane.f32.xlu1 %v1403_v56 }
 0x401   :  { %1287 = vmax.xlane.f32.xlu0 %v1286_v57 }
 0x40f   :  { %526 = vrot.lane.b32.xlu1 %v1893_v23, %s2520_s26 }
 0x413   :  { %v516_v58 = vpop.permute.xlu0 %515  ;;  %v507_v59 = vpop.permute.xlu1 %506 }
 0x414   :  { %522 = vst.msk [vmem:[#allocation4 + $0x8] sm:$0xf] %vm289_vm2, %v516_v58  ;;  %513 = vst.msk [vmem:[#allocation4 + $0x4] sm:$0xf] %vm289_vm2, %v507_v59 }
 0x417   :  { %517 = vrot.lane.b32.xlu0 %v1893_v23, %s2519_s16 }
 0x41b   :  { %v655_v15 = vld [vmem:[#allocation4 + $0x4] sm:$0xf]  ;;  %v773_v20 = vld [vmem:[#allocation4 + $0x8] sm:$0xf] }
 0x44d   :  { %v590_v60 = vpop.xlane.xlu0 %589 }
 0x44e   :  { %v591_v61 = vsub.f32 %v2874_v7, %v590_v60 }
 0x450   :  { %v592_v62 = vmul.f32 1.442695, %v591_v61 }
 0x451   :  { %v822_v63 = vpop.xlane.xlu0 %821 }
 0x452   :  { %2134 = vpow2.f32 %v592_v62  ;;  %v823_v1 = vsub.f32 %v2879_v24, %v822_v63  ;;  %v704_v2 = vpop.xlane.xlu1 %703  ;;  %v834_v24 = vsel %vm601_vm4, %v773_v20, 0 }
 0x453   :  { %v705_v3 = vsub.f32 %v2876_v11, %v704_v2  ;;  %v716_v11 = vsel %vm601_vm4, %v655_v15, 0 }
 0x454   :  { %v824_v4 = vmul.f32 1.442695, %v823_v1 }
 0x455   :  { %v706_v8 = vmul.f32 1.442695, %v705_v3  ;;  %v940_v9 = vpop.xlane.xlu0 %939 }
 0x456   :  { %v941_v10 = vsub.f32 %v2884_v29, %v940_v9  ;;  %v509_v12 = vpop.permute.xlu1 %508 }
 0x457   :  { %2136 = vpow2.f32 %v706_v8  ;;  %514 = vst.msk [vmem:[#allocation4 + $0x14] sm:$0xf] %vm289_vm2, %v509_v12 }
 0x458   :  { %2138 = vpow2.f32 %v824_v4  ;;  %v942_v13 = vmul.f32 1.442695, %v941_v10 }
 0x459   :  { %v525_v7 = vpop.permute.xlu0 %524 }
 0x45a   :  { %531 = vst.msk [vmem:[#allocation4 + $0xc] sm:$0xf] %vm289_vm2, %v525_v7  ;;  %2140 = vpow2.f32 %v942_v13 }
 0x45c   :  { %v2135_v14 = vpop.eup %2134 }
 0x45d   :  { %v597_v16 = vpack.c.bf16 %v2135_v14, %v2135_v14  ;;  %v594_v28 = vsel %vm541_vm3, %v2135_v14, 0.0 }
 0x45f   :  { %1979 = vmatmul.mubr.msk.bf16.vlgmr.msra.gmra.mrb[8].mxu0 %vm541_vm3, %v597_v16 }
 0x460   :  { %1989 = vmatpush3.bf16.msra.mxu0 %v716_v11  ;;  %1990 = vmatprep.mubr.msk.bf16.mxu0 %vm2516_vm0, %v2515_v0 }
 0x461   :  { %v2137_v17 = vpop.eup %2136  ;;  %2000 = vmatprep.subr.bf16.mxu0 %v2515_v0  ;;  %v891_v26 = vld [vmem:[#allocation4 + $0xc] sm:$0xf] }
 0x462   :  { %v708_v18 = vsel %vm541_vm3, %v2137_v17, 0.0  ;;  %v2139_v19 = vpop.eup %2138  ;;  %v711_v21 = vpack.c.bf16 %v2137_v17, %v2137_v17  ;;  %v952_v29 = vsel %vm601_vm4, %v891_v26, 0 }
 0x463   :  { %709 = vadd.xlane.f32.xlu1 %v708_v18  ;;  %v826_v22 = vsel %vm541_vm3, %v2139_v19, 0.0  ;;  %v829_v27 = vpack.c.bf16 %v2139_v19, %v2139_v19 }
 0x464   :  { %v2141_v23 = vpop.eup %2140 }
 0x465   :  { %v944_v25 = vsel %vm541_vm3, %v2141_v23, 0.0  ;;  %v947_v31 = vpack.c.bf16 %v2141_v23, %v2141_v23 }
 0x467   :  { %1991 = vmatmul.mubr.msk.bf16.vlgmr.msra.gmra.mrb[12].mxu0 %vm541_vm3, %v711_v21  ;;  %827 = vadd.xlane.f32.xlu1 %v826_v22 }
 0x468   :  { %2001 = vmatpush3.bf16.msra.mxu0 %v834_v24  ;;  %2002 = vmatprep.mubr.msk.bf16.mxu0 %vm2516_vm0, %v2515_v0 }
 0x469   :  { %2012 = vmatprep.subr.bf16.mxu0 %v2515_v0 }
 0x46b   :  { %945 = vadd.xlane.f32.xlu1 %v944_v25 }
 0x46f   :  { %2003 = vmatmul.mubr.msk.bf16.vlgmr.msra.gmra.mrb[16].mxu0 %vm541_vm3, %v829_v27  ;;  %595 = vadd.xlane.f32.xlu1 %v594_v28 }
 0x470   :  { %2013 = vmatpush3.bf16.msra.mxu0 %v952_v29  ;;  %2014 = vmatprep.mubr.msk.bf16.mxu0 %vm2516_vm0, %v2515_v0 }
 0x471   :  { %2024 = vmatprep.subr.bf16.mxu0 %v2515_v0 }
 0x477   :  { %2015 = vmatmul.mubr.msk.bf16.vlgmr.msra.gmra.mrb[20].mxu0 %vm541_vm3, %v947_v31 }
 0x478   :  { %2025 = vmatpush3.bf16.msra.mxu0 %v1070_v32  ;;  %2026 = vmatprep.mubr.msk.bf16.mxu0 %vm2516_vm0, %v2515_v0 }
 0x479   :  { %2036 = vmatprep.subr.bf16.mxu0 %v2515_v0 }
 0x487   :  { %v1171_v33 = vpop.xlane.xlu1 %1170 }
 0x488   :  { %v1172_v35 = vsub.f32 %v2890_v38, %v1171_v33 }
 0x48a   :  { %v1173_v36 = vmul.f32 1.442695, %v1172_v35  ;;  %v1058_v37 = vpop.xlane.xlu0 %1057 }
 0x48b   :  { %v1059_v39 = vsub.f32 %v2888_v34, %v1058_v37  ;;  %v1405_v40 = vpop.xlane.xlu1 %1404 }
 0x48c   :  { %2142 = vpow2.f32 %v1173_v36  ;;  %v1406_v42 = vsub.f32 %v2902_v50, %v1405_v40  ;;  %v1122_v50 = vld [vmem:[#allocation4 + $0x14] sm:$0xf] }
 0x48d   :  { %v1060_v41 = vmul.f32 1.442695, %v1059_v39 }
 0x48e   :  { %v1288_v44 = vpop.xlane.xlu0 %1287  ;;  %v1407_v47 = vmul.f32 1.442695, %v1406_v42 }
 0x48f   :  { %2144 = vpow2.f32 %v1060_v41  ;;  %v1289_v45 = vsub.f32 %v2894_v43, %v1288_v44  ;;  %v527_v46 = vpop.permute.xlu1 %526  ;;  %v1183_v43 = vsel %vm601_vm4, %v1122_v50, 0 }
 0x490   :  { %532 = vst.msk [vmem:[#allocation4 + $0x1c] sm:$0xf] %vm289_vm2, %v527_v46 }
 0x491   :  { %v1290_v48 = vmul.f32 1.442695, %v1289_v45 }
 0x492   :  { %v518_v49 = vpop.permute.xlu0 %517 }
 0x493   :  { %2146 = vpow2.f32 %v1290_v48  ;;  %523 = vst.msk [vmem:[#allocation4 + $0x18] sm:$0xf] %vm289_vm2, %v518_v49 }
 0x494   :  { %2148 = vpow2.f32 %v1407_v47 }
 0x496   :  { %v2143_v34 = vpop.eup %2142 }
 0x497   :  { %v1175_v38 = vsel %vm541_vm3, %v2143_v34, 0.0  ;;  %v1178_v58 = vpack.c.bf16 %v2143_v34, %v2143_v34  ;;  %v1356_v61 = vld [vmem:[#allocation4 + $0x1c] sm:$0xf] }
 0x498   :  { %1176 = vadd.xlane.f32.xlu0 %v1175_v38  ;;  %v1417_v63 = vsel %vm601_vm4, %v1356_v61, 0  ;;  %v2126_v38 = vld [vmem:[#allocation12] sm:$0xff]  }
 0x499   :  { %v2145_v51 = vpop.eup %2144  ;;  %2067 = vmatpush3.bf16.msra.mxu1 %v2126_v38 }
 0x49a   :  { %v1065_v52 = vpack.c.bf16 %v2145_v51, %v2145_v51  ;;  %v1239_v56 = vld [vmem:[#allocation4 + $0x18] sm:$0xf]  ;;  %v1062_v60 = vsel %vm541_vm3, %v2145_v51, 0.0  ;;  %2068 = vmatprep.subr.bf16.mxu1 %v2515_v0 }
 0x49b   :  { %v1300_v59 = vsel %vm601_vm4, %v1239_v56, 0 }
 0x49c   :  { %2027 = vmatmul.mubr.msk.bf16.vlgmr.msra.gmra.mrb[24].mxu0 %vm541_vm3, %v1065_v52  ;;  %v2127_v52 = vld [vmem:[#allocation12 + $0x8] sm:$0xff]  }
 0x49d   :  { %v2147_v53 = vpop.eup %2146  ;;  %2037 = vmatpush3.bf16.msra.mxu0 %v1183_v43  ;;  %2038 = vmatprep.mubr.msk.bf16.mxu0 %vm2516_vm0, %v2515_v0 }
 0x49e   :  { %v1292_v54 = vsel %vm541_vm3, %v2147_v53, 0.0  ;;  %2048 = vmatprep.subr.bf16.mxu0 %v2515_v0  ;;  %v2149_v55 = vpop.eup %2148  ;;  %v1295_v62 = vpack.c.bf16 %v2147_v53, %v2147_v53  ;;  %2069 = vmatpush3.bf16.msra.mxu1 %v2127_v52  ;;  %v2133_v52 = vld [vmem:[#allocation18 + $0x18] sm:$0xff]  }
 0x49f   :  { %1293 = vadd.xlane.f32.xlu0 %v1292_v54  ;;  %v1409_v57 = vsel %vm541_vm3, %v2149_v55, 0.0  ;;  %v1412_v1 = vpack.c.bf16 %v2149_v55, %v2149_v55  ;;  %2082 = vmatprep.subr.bf16.mxu1 %v2515_v0 }
 0x4a3   :  { %1410 = vadd.xlane.f32.xlu0 %v1409_v57 }
 0x4a4   :  { %2039 = vmatmul.mubr.msk.bf16.vlgmr.msra.gmra.mrb[28].mxu0 %vm541_vm3, %v1178_v58 }
 0x4a5   :  { %2049 = vmatpush3.bf16.msra.mxu0 %v1300_v59  ;;  %2050 = vmatprep.mubr.msk.bf16.mxu0 %vm2516_vm0, %v2515_v0 }
 0x4a6   :  { %2060 = vmatprep.subr.bf16.mxu0 %v2515_v0 }
 0x4a7   :  { %1063 = vadd.xlane.f32.xlu0 %v1062_v60 }
 0x4ac   :  { %2051 = vmatmul.mubr.msk.bf16.vlgmr.msra.gmra.mrb[32].mxu0 %vm541_vm3, %v1295_v62 }
 0x4ad   :  { %2061 = vmatpush3.bf16.msra.mxu0 %v1417_v63  ;;  %2062 = vmatprep.mubr.msk.bf16.mxu0 %vm2516_vm0, %v2515_v0 }
 0x4ae   :  { %2074 = vmatprep.subr.bf16.mxu0 %v2515_v0 }
 0x4b4   :  { %2063 = vmatmul.mubr.msk.bf16.vlgmr.msra.gmra.mrb[36].mxu0 %vm541_vm3, %v1412_v1 }
 0x4b5   :  { %2078 = vmatprep.mubr.msk.bf16.mxu0 %vm2516_vm0, %v2515_v0 }
 0x4f0   :  { %v710_v2 = vpop.xlane.xlu1 %709 }
 0x4f4   :  { %v828_v3 = vpop.xlane.xlu1 %827 }
 0x4f8   :  { %v946_v4 = vpop.xlane.xlu1 %945 }
 0x4fc   :  { %v596_v8 = vpop.xlane.xlu1 %595 }
 0x4fd   :  { %2150 = vrcp.f32 %v596_v8 }
 0x4fe   :  { %2152 = vrcp.f32 %v710_v2 }
 0x4ff   :  { %2154 = vrcp.f32 %v828_v3 }
 0x500   :  { %2156 = vrcp.f32 %v946_v4 }
 0x507   :  { %v2151_v9 = vpop.eup %2150 }
 0x508   :  { %v2153_v15 = vpop.eup %2152 }
 0x509   :  { %v2155_v20 = vpop.eup %2154 }
 0x50a   :  { %v2157_v26 = vpop.eup %2156 }
 0x525   :  { %v1177_v32 = vpop.xlane.xlu0 %1176 }
 0x52c   :  { %v1294_v33 = vpop.xlane.xlu0 %1293 }
 0x530   :  { %v1411_v35 = vpop.xlane.xlu0 %1410 }
 0x532   :  { %v639_v10 = vpop.f32.mrb[8].mxu0 }
 0x533   :  { %v646_v12 = vmul.f32 %v2151_v9, %v639_v10  ;;  %v1980_v13 = vpop.f32.mrb[9].mxu0 }
 0x534   :  { %v642_v7 = vpop.f32.mrb[10].mxu0  ;;  %v1064_v36 = vpop.xlane.xlu0 %1063 }
 0x535   :  { %647 = vst.msk [vmem:[#allocation5] sm:$0xff] %vm541_vm3, %v646_v12  ;;  %v1981_v14 = vpop.f32.mrb[11].mxu0  ;;  %2158 = vrcp.f32 %v1064_v36  ;;  %v1870_v12 = vld [vmem:[#allocation14] ss:$0 sm:$0xff] }
 0x536   :  { %2160 = vrcp.f32 %v1177_v32  ;;  %v2131_v32 = vld [vmem:[#allocation18 + $0x8] sm:$0xff]  }
 0x537   :  { %2162 = vrcp.f32 %v1294_v33 }
 0x538   :  { %2164 = vrcp.f32 %v1411_v35 }
 0x53a   :  { %v752_v16 = vpop.f32.mrb[12].mxu0 }
 0x53b   :  { %v759_v11 = vmul.f32 %v2153_v15, %v752_v16  ;;  %v1992_v17 = vpop.f32.mrb[13].mxu0 }
 0x53c   :  { %v755_v18 = vpop.f32.mrb[14].mxu0 }
 0x53d   :  { %761 = vrot.lane.b32.xlu1 %v759_v11, %s2508_s21  ;;  %v1993_v19 = vpop.f32.mrb[15].mxu0 }
 0x53f   :  { %v2159_v37 = vpop.eup %2158 }
 0x540   :  { %v2161_v45 = vpop.eup %2160 }
 0x541   :  { %v2163_v51 = vpop.eup %2162 }
 0x542   :  { %v870_v21 = vpop.f32.mrb[16].mxu0  ;;  %v2165_v56 = vpop.eup %2164 }
 0x543   :  { %v877_v22 = vmul.f32 %v2155_v20, %v870_v21  ;;  %v2004_v23 = vpop.f32.mrb[17].mxu0 }
 0x544   :  { %v873_v24 = vpop.f32.mrb[18].mxu0 }
 0x545   :  { %879 = vrot.lane.b32.xlu1 %v877_v22, %s2521_s18  ;;  %v2005_v25 = vpop.f32.mrb[19].mxu0 }
 0x54a   :  { %v988_v27 = vpop.f32.mrb[20].mxu0 }
 0x54b   :  { %v995_v28 = vmul.f32 %v2157_v26, %v988_v27  ;;  %v2016_v29 = vpop.f32.mrb[21].mxu0 }
 0x54c   :  { %v991_v30 = vpop.f32.mrb[22].mxu0 }
 0x54d   :  { %v2017_v31 = vpop.f32.mrb[23].mxu0  ;;  %v2128_v30 = vld [vmem:[#allocation15] sm:$0xff]  }
 0x54e   :  { %2075 = vmatpush3.bf16.msra.mxu0 %v2128_v30  ;;  %v2130_v31 = vld [vmem:[#allocation18] sm:$0xff]   ;;  %v1887_v30 = vld [vmem:[#allocation26] ss:$0 sm:$0xff] }
 0x54f   :  { %2076 = vmatprep.subr.bf16.mxu0 %v2515_v0 }
 0x56f   :  { %v1106_v39 = vpop.f32.mrb[24].mxu0 }
 0x570   :  { %v1113_v40 = vmul.f32 %v2159_v37, %v1106_v39  ;;  %v2028_v41 = vpop.f32.mrb[25].mxu0 }
 0x571   :  { %v1109_v42 = vpop.f32.mrb[26].mxu0 }
 0x572   :  { %1114 = vst.msk [vmem:[#allocation5 + $0x8] sm:$0xff] %vm541_vm3, %v1113_v40  ;;  %v2029_v44 = vpop.f32.mrb[27].mxu0 }
 0x573   :  { %v1874_v44 = vld [vmem:[#allocation21] ss:$0 sm:$0xff] }
 0x577   :  { %v1219_v46 = vpop.f32.mrb[28].mxu0 }
 0x578   :  { %v1226_v47 = vmul.f32 %v2161_v45, %v1219_v46  ;;  %v2040_v48 = vpop.f32.mrb[29].mxu0 }
 0x579   :  { %v1222_v49 = vpop.f32.mrb[30].mxu0  ;;  %v1875_v48 = vld [vmem:[#allocation23] ss:$0 sm:$0xff] }
 0x57a   :  { %1228 = vrot.lane.b32.xlu0 %v1226_v47, %s2508_s21  ;;  %v2041_v34 = vpop.f32.mrb[31].mxu0 }
 0x57e   :  { %997 = vrot.lane.b32.xlu0 %v995_v28, %s2522_s0 }
 0x57f   :  { %v1336_v50 = vpop.f32.mrb[32].mxu0 }
 0x580   :  { %v1343_v43 = vmul.f32 %v2163_v51, %v1336_v50  ;;  %v2052_v53 = vpop.f32.mrb[33].mxu0  ;;  %v2132_v50 = vld [vmem:[#allocation18 + $0x10] sm:$0xff]  }
 0x581   :  { %v1339_v54 = vpop.f32.mrb[34].mxu0 }
 0x582   :  { %1345 = vrot.lane.b32.xlu1 %v1343_v43, %s2521_s18  ;;  %v2053_v55 = vpop.f32.mrb[35].mxu0  ;;  %v1876_v43 = vld [vmem:[#allocation17] ss:$0 sm:$0xff] }
 0x587   :  { %v1453_v57 = vpop.f32.mrb[36].mxu0 }
 0x588   :  { %v1460_v58 = vmul.f32 %v2165_v56, %v1453_v57  ;;  %v2064_v59 = vpop.f32.mrb[37].mxu0 }
 0x589   :  { %v1456_v60 = vpop.f32.mrb[38].mxu0 }
 0x58a   :  { %1462 = vrot.lane.b32.xlu1 %v1460_v58, %s2522_s0  ;;  %v2065_v61 = vpop.f32.mrb[39].mxu0 }
 0x5af   :  { %v762_v62 = vpop.permute.xlu1 %761 }
 0x5b0   :  { %765 = vst.msk [vmem:[#allocation5] sm:$0xff] %vm764_vm5, %v762_v62  ;;  %v1880_v62 = vld [vmem:[#allocation20] ss:$0 sm:$0xff] }
 0x5b7   :  { %v880_v63 = vpop.permute.xlu1 %879 }
 0x5b8   :  { %883 = vst.msk [vmem:[#allocation5] sm:$0xff] %vm882_vm6, %v880_v63 }
 0x5ec   :  { %v1229_v1 = vpop.permute.xlu0 %1228 }
 0x5ed   :  { %1231 = vst.msk [vmem:[#allocation5 + $0x8] sm:$0xff] %vm764_vm5, %v1229_v1 }
 0x5f0   :  { %v998_v2 = vpop.permute.xlu0 %997 }
 0x5f1   :  { %1001 = vst.msk [vmem:[#allocation5] sm:$0xff] %vm1000_vm7, %v998_v2 }
 0x5f4   :  { %v1346_v3 = vpop.permute.xlu1 %1345 }
 0x5f5   :  { %1348 = vst.msk [vmem:[#allocation5 + $0x8] sm:$0xff] %vm882_vm6, %v1346_v3 }
 0x5f8   :  { %v1469_v8 = vld [vmem:[#allocation5] sm:$0xff] }
 0x5fc   :  { %v1463_v4 = vpop.permute.xlu1 %1462 }
 0x5fd   :  { %1465 = vst.msk [vmem:[#allocation5 + $0x8] sm:$0xff] %vm1000_vm7, %v1463_v4 }
 0x604   :  { %v1470_v9 = vld [vmem:[#allocation5 + $0x8] sm:$0xff] }
 0x605   :  { %v1471_v10 = vpack.c.bf16 %v1470_v9, %v1469_v8 }
 0x607   :  { %2071 = vmatmul.mubr.msk.bf16.vlgmr.msra.gmra.mrb[36].mxu1 %vm236_vm1, %v1471_v10 }
 0x608   :  { %2090 = vmatprep.mubr.msk.bf16.mxu1 %vm2516_vm0, %v2515_v0  ;;  %2083 = vmatpush3.bf16.msra.mxu1 %v2130_v31 }
 0x609   :  { %2084 = vmatprep.subr.bf16.mxu1 %v2515_v0 }
 0x60c   :  { %2085 = vmatpush3.bf16.msra.mxu1 %v2131_v32 }
 0x60d   :  { %2086 = vmatprep.subr.bf16.mxu1 %v2515_v0 }
 0x610   :  { %2087 = vmatpush3.bf16.msra.mxu1 %v2132_v50 }
 0x611   :  { %2088 = vmatprep.subr.bf16.mxu1 %v2515_v0 }
 0x614   :  { %2089 = vmatpush3.bf16.msra.mxu1 %v2133_v52 }
 0x6da   :  { %v1533_v13 = vpop.f32.mrb[36].mxu1 }
 0x6db   :  { %v1534_v7 = vadd.f32 %v1870_v12, %v1533_v13  ;;  %v2072_v14 = vpop.f32.mrb[37].mxu1 }
 0x6dc   :  { %v1536_v15 = vpop.f32.mrb[38].mxu1 }
 0x6dd   :  { %v1537_v16 = vadd.f32 %v1870_v12, %v1536_v15  ;;  %v2073_v11 = vpop.f32.mrb[39].mxu1  ;;  %v1540_v17 = vadd.f32 %v1534_v7, %v2771_v5 }
 0x6df   :  { %v1544_v18 = vsel %vm236_vm1, %v1540_v17, 0.0  ;;  %v1541_v19 = vadd.f32 %v1537_v16, %v2773_v6  ;;  %v2129_v6 = vld [vmem:[#allocation15 + $0x8] sm:$0xff]  }
 0x6e0   :  { %1545 = vadd.xlane.f32.xlu0 %v1544_v18  ;;  %2077 = vmatpush3.bf16.msra.mxu0 %v2129_v6 }
 0x6e1   :  { %v1547_v20 = vsel %vm236_vm1, %v1541_v19, 0.0 }
 0x6e2   :  { %1548 = vadd.xlane.f32.xlu1 %v1547_v20 }
 0x76d   :  { %v1546_v21 = vpop.xlane.xlu0 %1545 }
 0x76e   :  { %v1551_v22 = vmul.f32 0.03125, %v1546_v21 }
 0x76f   :  { %v1549_v23 = vpop.xlane.xlu1 %1548 }
 0x770   :  { %v1553_v24 = vsub.f32 %v1540_v17, %v1551_v22  ;;  %v1552_v25 = vmul.f32 0.03125, %v1549_v23 }
 0x772   :  { %v1554_v26 = vsub.f32 %v1541_v19, %v1552_v25  ;;  %v1555_v27 = vmul.f32 %v1553_v24, %v1553_v24 }
 0x774   :  { %v1557_v28 = vsel %vm236_vm1, %v1555_v27, 0.0  ;;  %v1556_v29 = vmul.f32 %v1554_v26, %v1554_v26 }
 0x775   :  { %1558 = vadd.xlane.f32.xlu0 %v1557_v28  ;;  %v1886_v28 = vld [vmem:[#allocation24] ss:$0 sm:$0xff] }
 0x776   :  { %v1560_v5 = vsel %vm236_vm1, %v1556_v29, 0.0 }
 0x779   :  { %1561 = vadd.xlane.f32.xlu0 %v1560_v5 }
 0x802   :  { %v1559_v33 = vpop.xlane.xlu0 %1558 }
 0x803   :  { %v1563_v35 = vmul.f32 0.03125, %v1559_v33 }
 0x805   :  { %v1565_v36 = vadd.f32 1e-05, %v1563_v35 }
 0x806   :  { %v1562_v37 = vpop.xlane.xlu0 %1561 }
 0x807   :  { %2166 = vrsqrt.f32 %v1565_v36  ;;  %v1564_v39 = vmul.f32 0.03125, %v1562_v37 }
 0x809   :  { %v1566_v40 = vadd.f32 1e-05, %v1564_v39 }
 0x80b   :  { %2168 = vrsqrt.f32 %v1566_v40 }
 0x811   :  { %v2167_v41 = vpop.eup %2166 }
 0x812   :  { %v1569_v42 = vmul.f32 %v2167_v41, %v1553_v24 }
 0x814   :  { %v1577_v46 = vmul.f32 %v1874_v44, %v1569_v42 }
 0x815   :  { %v2169_v45 = vpop.eup %2168 }
 0x816   :  { %v1570_v47 = vmul.f32 %v2169_v45, %v1554_v26  ;;  %v1585_v34 = vadd.f32 %v1875_v48, %v1577_v46 }
 0x818   :  { %v1578_v49 = vmul.f32 %v1874_v44, %v1570_v47 }
 0x81a   :  { %v1586_v38 = vadd.f32 %v1875_v48, %v1578_v49 }
 0x81c   :  { %v1587_v51 = vpack.c.bf16 %v1586_v38, %v1585_v34 }
 0x81e   :  { %2079 = vmatmul.mubr.msk.bf16.vlgmr.msra.gmra.mrb[40].mxu0 %vm236_vm1, %v1587_v51 }
 0x8f1   :  { %v1648_v53 = vpop.f32.mrb[40].mxu0 }
 0x8f2   :  { %v1649_v54 = vadd.f32 %v1876_v43, %v1648_v53  ;;  %v2080_v55 = vpop.f32.mrb[41].mxu0 }
 0x8f3   :  { %v1651_v56 = vpop.f32.mrb[42].mxu0 }
 0x8f4   :  { %v1652_v57 = vadd.f32 %v1876_v43, %v1651_v56  ;;  %v2081_v58 = vpop.f32.mrb[43].mxu0  ;;  %v1655_v59 = vmax.f32 %v1649_v54, 0.0 }
 0x8f6   :  { %v1656_v60 = vmax.f32 %v1652_v57, 0.0 }
 0x8f8   :  { %v1657_v61 = vpack.c.bf16 %v1656_v60, %v1655_v59 }
 0x8fa   :  { %2091 = vmatmul.mubr.msk.bf16.vlgmr.msra.gmra.mrb[40].mxu1 %vm1697_vm8, %v1657_v61 }
 0x9cd   :  { %v1735_v63 = vpop.f32.mrb[40].mxu1 }
 0x9ce   :  { %v1736_v1 = vadd.f32 %v1880_v62, %v1735_v63  ;;  %v2092_v2 = vpop.f32.mrb[41].mxu1 }
 0x9cf   :  { %v1738_v3 = vpop.f32.mrb[42].mxu1 }
 0x9d0   :  { %v1739_v0 = vadd.f32 %v1880_v62, %v1738_v3  ;;  %v2093_v4 = vpop.f32.mrb[43].mxu1  ;;  %v1742_v8 = vadd.f32 %v1736_v1, %v1585_v34 }
 0x9d2   :  { %v1746_v9 = vsel %vm236_vm1, %v1742_v8, 0.0  ;;  %v1743_v10 = vadd.f32 %v1739_v0, %v1586_v38 }
 0x9d3   :  { %1747 = vadd.xlane.f32.xlu1 %v1746_v9 }
 0x9d4   :  { %v1749_v12 = vsel %vm236_vm1, %v1743_v10, 0.0 }
 0x9d5   :  { %1750 = vadd.xlane.f32.xlu0 %v1749_v12 }
 0xa60   :  { %v1748_v13 = vpop.xlane.xlu1 %1747 }
 0xa61   :  { %v1752_v7 = vmul.f32 0.03125, %v1748_v13 }
 0xa62   :  { %v1751_v14 = vpop.xlane.xlu0 %1750 }
 0xa63   :  { %v1754_v15 = vsub.f32 %v1742_v8, %v1752_v7  ;;  %v1753_v16 = vmul.f32 0.03125, %v1751_v14 }
 0xa65   :  { %v1755_v11 = vsub.f32 %v1743_v10, %v1753_v16  ;;  %v1756_v17 = vmul.f32 %v1754_v15, %v1754_v15 }
 0xa67   :  { %v1758_v18 = vsel %vm236_vm1, %v1756_v17, 0.0  ;;  %v1757_v19 = vmul.f32 %v1755_v11, %v1755_v11 }
 0xa68   :  { %1759 = vadd.xlane.f32.xlu1 %v1758_v18 }
 0xa69   :  { %v1761_v20 = vsel %vm236_vm1, %v1757_v19, 0.0 }
 0xa6a   :  { %1762 = vadd.xlane.f32.xlu0 %v1761_v20 }
 0xaf5   :  { %v1760_v21 = vpop.xlane.xlu1 %1759 }
 0xaf6   :  { %v1764_v22 = vmul.f32 0.03125, %v1760_v21 }
 0xaf7   :  { %v1763_v23 = vpop.xlane.xlu0 %1762 }
 0xaf8   :  { %v1766_v24 = vadd.f32 1e-05, %v1764_v22  ;;  %v1765_v25 = vmul.f32 0.03125, %v1763_v23 }
 0xafa   :  { %2170 = vrsqrt.f32 %v1766_v24  ;;  %v1767_v26 = vadd.f32 1e-05, %v1765_v25 }
 0xafc   :  { %2172 = vrsqrt.f32 %v1767_v26 }
 0xb04   :  { %v2171_v27 = vpop.eup %2170 }
 0xb05   :  { %v1770_v29 = vmul.f32 %v2171_v27, %v1754_v15 }
 0xb06   :  { %v2173_v5 = vpop.eup %2172 }
 0xb07   :  { %v1771_v6 = vmul.f32 %v2173_v5, %v1755_v11  ;;  %v1778_v31 = vmul.f32 %v1886_v28, %v1770_v29 }
 0xb09   :  { %v1779_v32 = vmul.f32 %v1886_v28, %v1771_v6  ;;  %v1786_v33 = vadd.f32 %v1887_v30, %v1778_v31 }
 0xb0b   :  { %v1787_v35 = vadd.f32 %v1887_v30, %v1779_v32  ;;  %1788 = vst.msk [vmem:[#allocation27] sm:$0xff] %vm236_vm1, %v1786_v33 }
 0xb0d   :  { %1789 = vst.msk [vmem:[#allocation27 + $0x8] sm:$0xff] %vm236_vm1, %v1787_v35 }
 0xb0e   :  { %2471 = shalt.err (!%p2468_p10)
}
 0xb0f   :  { %s2472_s30 = scalar_lea.hbm %s3032_s13, 256 }
 0xb10   :  { %p2473_p11 = scmp.ne.s32.totalorder %s3032_s13, %s2472_s30  ;;  %p2476_p12 = scmp.lt.u32.totalorder %s2472_s30, %s3032_s13 }
 0xb12   :  { %p2478_p13 = pnand %p2476_p12, %p2473_p11 }
 0xb14   :  { %2481 = shalt.err (!%p2478_p13)
}
 0xb15   :  { %1801 = dma.vmem_to_hbm [thread:$0]  %s1796_s17, 256, %s3032_s13, [#allocation8], %s2507_s11, %s2507_s11, %s2508_s21  }
 0xb16   :  { %2496 = dma.done.wait [#allocation8], 256  }
 0xb17   :  { %2497 = vsyncadd [#allocation8], 4294967040 }
 0xb18   :  { %1805 = vsyncpa [#allocation7], 1 }
 0xb19   :  { %1806 = vsyncpa [#allocation10], 1 }
 0xb1a   :  { %1807 = vsyncpa [#allocation13], 1 }
 0xb1b   :  { %1808 = vsyncpa [#allocation16], 1 }
 0xb1c   :  { %1809 = vsyncpa [#allocation19], 1 }
 0xb1d   :  { %1810 = vsyncpa [#allocation22], 1 }
 0xb1e   :  { %1811 = vsyncpa [#allocation25], 1 }
 0xb1f   :  { %1812 = vsyncpa [#allocation8], 1 }

</bundles_post_ra>
